<compile_context>
chip_gen: v7x
topology: tpu7x:2x2x1
jax: 0.10.0
libtpu: 0.0.40
codegen_flags: <defaults>
</compile_context>

<pallas_src>
import math
import numpy as np
import jax
import jax.numpy as jnp
from jax.experimental import pallas as pl
from jax.experimental.pallas import tpu as pltpu

# ----------------------------- configuration --------------------------------
IMG, PATCH, IN_CH = 32, 16, 3
NP_SIDE = IMG // PATCH
NPATCH = NP_SIDE * NP_SIDE            # 4 patches
SEQ = NPATCH + 1                      # + cls token -> 5 real tokens
SEQ_PAD = 8                           # sublane-aligned token count
PD = IN_CH * PATCH * PATCH            # 768 flattened patch dim
DIM = 128                             # embed dim   (ViT-L: 1024)
NH, HD = 4, 32                        # heads       (ViT-L: 16 x 64)
MLP = 2 * DIM                         # mlp hidden  (ViT-L: 4*dim)
DEPTH = 2                             # blocks      (ViT-L: 24)
HEAD_HIDDEN = 128
NUM_EMOTIONS = 4
LANE = 128
EPS = 1e-6
SCALE = 1.0 / math.sqrt(HD)


def _ln(x, g, b):
    mu = jnp.mean(x, axis=-1, keepdims=True)
    var = jnp.mean(jnp.square(x - mu), axis=-1, keepdims=True)
    return (x - mu) * jax.lax.rsqrt(var + EPS) * g + b


def _mm(a, w_bf16):
    # f32 activation -> bf16 MXU operand, f32 accumulation (inference-safe).
    return jnp.dot(a.astype(jnp.bfloat16), w_bf16,
                   preferred_element_type=jnp.float32)


# --------------------------- fused per-image kernel ---------------------------
def _vit_kernel(patches_ref, base_ref, w_pe_ref,
                ln1g_ref, ln1b_ref, wq_ref, wk_ref, wv_ref,
                bq_ref, bk_ref, bv_ref, wo_ref, bo_ref,
                ln2g_ref, ln2b_ref, w1_ref, b1_ref, w2_ref, b2_ref,
                lng_ref, lnb_ref, fc1w_ref, fc1b_ref, fc2w_ref, fc2b_ref,
                o_ref):
    # additive key-padding mask over the padded key axis (0 valid / -1e30 pad)
    kidx = jax.lax.broadcasted_iota(jnp.int32, (1, 1, SEQ_PAD), 2)
    kmask = jnp.where(kidx < SEQ, 0.0, -1e30).astype(jnp.float32)

    # patch embedding: Conv2d(16,16,stride=16) == matmul.  cls / pos / conv
    # bias are pre-folded into `base` by the wrapper; pad rows are zero.
    x = base_ref[0] + jnp.dot(patches_ref[0], w_pe_ref[...],
                              preferred_element_type=jnp.float32)   # (8, 128) f32

    # TODO(synk): at real ViT-L scale DEPTH should become a pipelined grid axis
    # with streamed per-layer weights; unrolled here (total weights << VMEM).
    for d in range(DEPTH):
        # ---- multi-head self-attention (pre-LN), head-batched einsums ----
        h = _ln(x, ln1g_ref[d], ln1b_ref[d])
        hb = jnp.broadcast_to(h.astype(jnp.bfloat16)[None],
                              (NH, SEQ_PAD, DIM))                    # (NH, 8, 128)
        q = jnp.einsum('hsc,hcd->hsd', hb, wq_ref[d],
                       preferred_element_type=jnp.float32) + bq_ref[d]
        k = jnp.einsum('hsc,hcd->hsd', hb, wk_ref[d],
                       preferred_element_type=jnp.float32) + bk_ref[d]
        v = jnp.einsum('hsc,hcd->hsd', hb, wv_ref[d],
                       preferred_element_type=jnp.float32) + bv_ref[d]

        s = jnp.einsum('hqd,hkd->hqk', q.astype(jnp.bfloat16),
                       k.astype(jnp.bfloat16),
                       preferred_element_type=jnp.float32) * SCALE   # (NH, 8, 8)
        s = s + kmask
        s = s - jnp.max(s, axis=-1, keepdims=True)
        p = jnp.exp(s)
        p = p * pl.reciprocal(jnp.sum(p, axis=-1, keepdims=True), approx=True)

        ctx = jnp.einsum('hqk,hkd->hqd', p.astype(jnp.bfloat16),
                         v.astype(jnp.bfloat16),
                         preferred_element_type=jnp.float32)         # (NH, 8, 32)
        attn = jnp.einsum('hqd,hde->hqe', ctx.astype(jnp.bfloat16), wo_ref[d],
                          preferred_element_type=jnp.float32).sum(axis=0)
        x = x + attn + bo_ref[d]

        # ---- MLP (pre-LN) ----
        h2 = _ln(x, ln2g_ref[d], ln2b_ref[d])
        m = _mm(h2, w1_ref[d]) + b1_ref[d]
        # TODO(synk): timm ViT uses exact (erf) GELU; tanh approximation here.
        m = jax.nn.gelu(m, approximate=True)
        x = x + _mm(m, w2_ref[d]) + b2_ref[d]

    # final LayerNorm + emotion head on the full 8-row slab (lane/sublane-dense
    # store); only the cls row (row 0) is meaningful and read by the wrapper.
    feats = _ln(x, lng_ref[...], lnb_ref[...])
    hh = jnp.maximum(_mm(feats, fc1w_ref[...]) + fc1b_ref[...], 0.0)
    # nn.Dropout(0.4) is identity in the inference forward pass.
    o_ref[0] = (_mm(hh, fc2w_ref[...]) + fc2b_ref[...]).astype(o_ref.dtype)


# --------------------------------- wrapper -----------------------------------
def _extract_patch_slab(x):
    """NCHW -> (B, SEQ_PAD, C*ph*pw); row 0 (cls) and pad rows are zero.

    (c, ph, pw)-major flatten so a matmul with the Conv2d weight reshaped to
    (C*ph*pw, DIM) reproduces Conv2d(kernel=16, stride=16)."""
    B = x.shape[0]
    xp = x.reshape(B, IN_CH, NP_SIDE, PATCH, NP_SIDE, PATCH)
    xp = xp.transpose(0, 2, 4, 1, 3, 5).reshape(B, NPATCH, PD)
    return jnp.pad(xp, ((0, 0), (1, SEQ_PAD - 1 - NPATCH), (0, 0)))


def emotion_classifier_vit_forward(x, p):
    B = x.shape[0]
    bf16 = jnp.bfloat16

    # ---- host-side (XLA) prep: O(B) work only ----
    patches = _extract_patch_slab(x).astype(bf16)                    # (B, 8, 768)

    # base slab: row0 = cls+pos0, patch rows = pos+conv_bias, pad rows = 0
    row0 = p['cls'] + p['pos'][0:1]
    rows = jnp.concatenate([row0, p['pos'][1:SEQ] + p['b_pe']], axis=0)
    rows = jnp.pad(rows, ((0, SEQ_PAD - SEQ), (0, 0)))
    base = jnp.broadcast_to(rows[None], (B, SEQ_PAD, DIM)).astype(jnp.float32)

    # ---- weights: head-major reshapes + bf16 pre-cast (halves weight DMA) ----
    wqkv5 = p['w_qkv'].reshape(DEPTH, DIM, 3, NH, HD)
    wq = wqkv5[:, :, 0].transpose(0, 2, 1, 3).astype(bf16)           # (D, NH, DIM, HD)
    wk = wqkv5[:, :, 1].transpose(0, 2, 1, 3).astype(bf16)
    wv = wqkv5[:, :, 2].transpose(0, 2, 1, 3).astype(bf16)
    bqkv5 = p['b_qkv'].reshape(DEPTH, 1, 3, NH, HD)
    bq = bqkv5[:, :, 0].transpose(0, 2, 1, 3)                        # (D, NH, 1, HD)
    bk = bqkv5[:, :, 1].transpose(0, 2, 1, 3)
    bv = bqkv5[:, :, 2].transpose(0, 2, 1, 3)
    wo = p['w_o'].reshape(DEPTH, NH, HD, DIM).astype(bf16)
    w_pe = p['w_pe'].astype(bf16)
    w1 = p['w_m1'].astype(bf16)
    w2 = p['w_m2'].astype(bf16)
    fc1w = p['fc1_w'].astype(bf16)
    # lane-pad the 4-wide classifier so the in-kernel output store is lane-dense
    fc2w = jnp.pad(p['fc2_w'], ((0, 0), (0, LANE - NUM_EMOTIONS))).astype(bf16)
    fc2b = jnp.pad(p['fc2_b'], ((0, 0), (0, LANE - NUM_EMOTIONS)))

    args = (patches, base, w_pe,
            p['ln1_g'], p['ln1_b'], wq, wk, wv, bq, bk, bv, wo, p['b_o'],
            p['ln2_g'], p['ln2_b'], w1, p['b_m1'], w2, p['b_m2'],
            p['ln_g'], p['ln_b'], fc1w, p['fc1_b'], fc2w, fc2b)

    def _per_batch(a):
        rest = a.ndim - 1
        return pl.BlockSpec((1,) + tuple(a.shape[1:]),
                            lambda b, _n=rest: (b,) + (0,) * _n)

    def _resident(a):
        nd = a.ndim
        return pl.BlockSpec(tuple(a.shape), lambda b, _nd=nd: (0,) * _nd)

    in_specs = [_per_batch(patches), _per_batch(base)] + \
               [_resident(a) for a in args[2:]]
    out_spec = pl.BlockSpec((1, SEQ_PAD, LANE), lambda b: (b, 0, 0))

    flops_layer = (2 * SEQ_PAD * DIM * 3 * DIM             # qkv projection
                   + 4 * NH * SEQ_PAD * SEQ_PAD * HD       # scores + context
                   + 2 * SEQ_PAD * DIM * DIM               # output projection
                   + 4 * SEQ_PAD * DIM * MLP)              # mlp
    flops = B * (2 * SEQ_PAD * PD * DIM + DEPTH * flops_layer
                 + 2 * SEQ_PAD * DIM * HEAD_HIDDEN
                 + 2 * SEQ_PAD * HEAD_HIDDEN * LANE)
    transcendentals = B * DEPTH * (NH * SEQ_PAD * SEQ_PAD + SEQ_PAD * MLP)
    bytes_accessed = int(sum(int(a.size) * a.dtype.itemsize for a in args)
                         + B * SEQ_PAD * LANE * 4)

    out = pl.pallas_call(
        _vit_kernel,
        out_shape=jax.ShapeDtypeStruct((B, SEQ_PAD, LANE), jnp.float32),
        grid=(B,),
        in_specs=in_specs,
        out_specs=out_spec,
        compiler_params=pltpu.CompilerParams(
            dimension_semantics=("parallel",)),     # v7x: batch split across TCs
        cost_estimate=pl.CostEstimate(flops=flops,
                                      transcendentals=transcendentals,
                                      bytes_accessed=bytes_accessed),
    )(*args)
    return out[:, 0, :NUM_EMOTIONS]


# --------------------------- pure-JAX f32 reference ---------------------------
def forward_reference(x, p):
    B = x.shape[0]
    xp = x.reshape(B, IN_CH, NP_SIDE, PATCH, NP_SIDE, PATCH)
    xp = xp.transpose(0, 2, 4, 1, 3, 5).reshape(B, NPATCH, PD)
    tok = xp @ p['w_pe'] + p['b_pe']                                  # (B, 4, DIM)
    cls = jnp.broadcast_to(p['cls'][None], (B, 1, DIM))
    xs = jnp.concatenate([cls, tok], axis=1) + p['pos'][None]         # (B, 5, DIM)
    for d in range(DEPTH):
        h = _ln(xs, p['ln1_g'][d], p['ln1_b'][d])
        qkv = h @ p['w_qkv'][d] + p['b_qkv'][d]
        q, k, v = jnp.split(qkv, 3, axis=-1)
        def heads(t):
            return t.reshape(B, SEQ, NH, HD).transpose(0, 2, 1, 3)
        qh, kh, vh = heads(q), heads(k), heads(v)
        s = jnp.einsum('bhqd,bhkd->bhqk', qh, kh) * SCALE
        pr = jax.nn.softmax(s, axis=-1)
        ctx = jnp.einsum('bhqk,bhkd->bhqd', pr, vh)
        ctx = ctx.transpose(0, 2, 1, 3).reshape(B, SEQ, DIM)
        xs = xs + ctx @ p['w_o'][d] + p['b_o'][d]
        h2 = _ln(xs, p['ln2_g'][d], p['ln2_b'][d])
        m = jax.nn.gelu(h2 @ p['w_m1'][d] + p['b_m1'][d], approximate=True)
        xs = xs + m @ p['w_m2'][d] + p['b_m2'][d]
    feats = _ln(xs[:, 0], p['ln_g'], p['ln_b'])
    hh = jnp.maximum(feats @ p['fc1_w'] + p['fc1_b'], 0.0)
    return hh @ p['fc2_w'] + p['fc2_b']


# --------------------------------- params ------------------------------------
def init_params(key):
    def nrm(k, shape, std=0.02):
        return (std * jax.random.normal(k, shape)).astype(jnp.float32)
    keys = iter(jax.random.split(key, 32))
    p = {}
    # TODO(synk): pretrained timm vit_large_patch16_384 weights cannot be
    # loaded here; deterministic synthetic init at a reduced scale.
    p['w_pe'] = nrm(next(keys), (PD, DIM))
    p['b_pe'] = nrm(next(keys), (1, DIM))
    p['cls'] = nrm(next(keys), (1, DIM))
    p['pos'] = nrm(next(keys), (SEQ, DIM))
    p['ln1_g'] = 1.0 + nrm(next(keys), (DEPTH, 1, DIM))
    p['ln1_b'] = nrm(next(keys), (DEPTH, 1, DIM))
    p['w_qkv'] = nrm(next(keys), (DEPTH, DIM, 3 * DIM))
    p['b_qkv'] = nrm(next(keys), (DEPTH, 1, 3 * DIM))
    p['w_o'] = nrm(next(keys), (DEPTH, DIM, DIM))
    p['b_o'] = nrm(next(keys), (DEPTH, 1, DIM))
    p['ln2_g'] = 1.0 + nrm(next(keys), (DEPTH, 1, DIM))
    p['ln2_b'] = nrm(next(keys), (DEPTH, 1, DIM))
    p['w_m1'] = nrm(next(keys), (DEPTH, DIM, MLP))
    p['b_m1'] = nrm(next(keys), (DEPTH, 1, MLP))
    p['w_m2'] = nrm(next(keys), (DEPTH, MLP, DIM))
    p['b_m2'] = nrm(next(keys), (DEPTH, 1, DIM))
    p['ln_g'] = 1.0 + nrm(next(keys), (1, DIM))
    p['ln_b'] = nrm(next(keys), (1, DIM))
    p['fc1_w'] = nrm(next(keys), (DIM, HEAD_HIDDEN))
    p['fc1_b'] = nrm(next(keys), (1, HEAD_HIDDEN))
    p['fc2_w'] = nrm(next(keys), (HEAD_HIDDEN, NUM_EMOTIONS))
    p['fc2_b'] = nrm(next(keys), (1, NUM_EMOTIONS))
    return p


if __name__ == "__main__":
    key = jax.random.PRNGKey(0)
    kx, kp = jax.random.split(key)
    x = jax.random.normal(kx, (2, IN_CH, IMG, IMG), dtype=jnp.float32)  # NCHW
    params = init_params(kp)

    logits = jax.jit(emotion_classifier_vit_forward)(x, params)
    jax.block_until_ready(logits)
    assert logits.shape == (2, NUM_EMOTIONS) and logits.dtype == jnp.float32

    # tolerance absorbs bf16 MXU operands + approx-reciprocal softmax vs the
    # exact-f32 reference (observed error is ~1e-3 at this scale).
    ref = forward_reference(x, params)
    np.testing.assert_allclose(np.asarray(logits), np.asarray(ref),
                               atol=1.5e-2, rtol=2e-2)
    print("KERNEL_OK")
</pallas_src>

<mosaic_0001>
module attributes {stable_mosaic.version = 11 : i64} {
  func.func @_vit_kernel(%arg0: i32, %arg1: memref<1x8x768xbf16, #tpu.memory_space<vmem>>, %arg2: memref<1x8x128xf32, #tpu.memory_space<vmem>>, %arg3: memref<768x128xbf16, #tpu.memory_space<vmem>>, %arg4: memref<2x1x128xf32, #tpu.memory_space<vmem>>, %arg5: memref<2x1x128xf32, #tpu.memory_space<vmem>>, %arg6: memref<2x4x128x32xbf16, #tpu.memory_space<vmem>>, %arg7: memref<2x4x128x32xbf16, #tpu.memory_space<vmem>>, %arg8: memref<2x4x128x32xbf16, #tpu.memory_space<vmem>>, %arg9: memref<2x4x1x32xf32, #tpu.memory_space<vmem>>, %arg10: memref<2x4x1x32xf32, #tpu.memory_space<vmem>>, %arg11: memref<2x4x1x32xf32, #tpu.memory_space<vmem>>, %arg12: memref<2x4x32x128xbf16, #tpu.memory_space<vmem>>, %arg13: memref<2x1x128xf32, #tpu.memory_space<vmem>>, %arg14: memref<2x1x128xf32, #tpu.memory_space<vmem>>, %arg15: memref<2x1x128xf32, #tpu.memory_space<vmem>>, %arg16: memref<2x128x256xbf16, #tpu.memory_space<vmem>>, %arg17: memref<2x1x256xf32, #tpu.memory_space<vmem>>, %arg18: memref<2x256x128xbf16, #tpu.memory_space<vmem>>, %arg19: memref<2x1x128xf32, #tpu.memory_space<vmem>>, %arg20: memref<1x128xf32, #tpu.memory_space<vmem>>, %arg21: memref<1x128xf32, #tpu.memory_space<vmem>>, %arg22: memref<128x128xbf16, #tpu.memory_space<vmem>>, %arg23: memref<1x128xf32, #tpu.memory_space<vmem>>, %arg24: memref<128x128xbf16, #tpu.memory_space<vmem>>, %arg25: memref<1x128xf32, #tpu.memory_space<vmem>>, %arg26: memref<1x8x128xf32, #tpu.memory_space<vmem>>) attributes {dimension_semantics = [#tpu.dimension_semantics<parallel>], iteration_bounds = array<i64: 2>, scalar_prefetch = 0 : i64, scratch_operands = 0 : i64, tpu.core_type = #tpu.core_type<tc>, window_params = [{transform_indices = @transform_0, window_bounds = array<i64: 1, 8, 768>}, {transform_indices = @transform_1, window_bounds = array<i64: 1, 8, 128>}, {pipeline_mode = #tpu.pipeline_mode<synchronous>, transform_indices = @transform_2, window_bounds = array<i64: 768, 128>}, {pipeline_mode = #tpu.pipeline_mode<synchronous>, transform_indices = @transform_3, window_bounds = array<i64: 2, 1, 128>}, {pipeline_mode = #tpu.pipeline_mode<synchronous>, transform_indices = @transform_4, window_bounds = array<i64: 2, 1, 128>}, {pipeline_mode = #tpu.pipeline_mode<synchronous>, transform_indices = @transform_5, window_bounds = array<i64: 2, 4, 128, 32>}, {pipeline_mode = #tpu.pipeline_mode<synchronous>, transform_indices = @transform_6, window_bounds = array<i64: 2, 4, 128, 32>}, {pipeline_mode = #tpu.pipeline_mode<synchronous>, transform_indices = @transform_7, window_bounds = array<i64: 2, 4, 128, 32>}, {pipeline_mode = #tpu.pipeline_mode<synchronous>, transform_indices = @transform_8, window_bounds = array<i64: 2, 4, 1, 32>}, {pipeline_mode = #tpu.pipeline_mode<synchronous>, transform_indices = @transform_9, window_bounds = array<i64: 2, 4, 1, 32>}, {pipeline_mode = #tpu.pipeline_mode<synchronous>, transform_indices = @transform_10, window_bounds = array<i64: 2, 4, 1, 32>}, {pipeline_mode = #tpu.pipeline_mode<synchronous>, transform_indices = @transform_11, window_bounds = array<i64: 2, 4, 32, 128>}, {pipeline_mode = #tpu.pipeline_mode<synchronous>, transform_indices = @transform_12, window_bounds = array<i64: 2, 1, 128>}, {pipeline_mode = #tpu.pipeline_mode<synchronous>, transform_indices = @transform_13, window_bounds = array<i64: 2, 1, 128>}, {pipeline_mode = #tpu.pipeline_mode<synchronous>, transform_indices = @transform_14, window_bounds = array<i64: 2, 1, 128>}, {pipeline_mode = #tpu.pipeline_mode<synchronous>, transform_indices = @transform_15, window_bounds = array<i64: 2, 128, 256>}, {pipeline_mode = #tpu.pipeline_mode<synchronous>, transform_indices = @transform_16, window_bounds = array<i64: 2, 1, 256>}, {pipeline_mode = #tpu.pipeline_mode<synchronous>, transform_indices = @transform_17, window_bounds = array<i64: 2, 256, 128>}, {pipeline_mode = #tpu.pipeline_mode<synchronous>, transform_indices = @transform_18, window_bounds = array<i64: 2, 1, 128>}, {pipeline_mode = #tpu.pipeline_mode<synchronous>, transform_indices = @transform_19, window_bounds = array<i64: 1, 128>}, {pipeline_mode = #tpu.pipeline_mode<synchronous>, transform_indices = @transform_20, window_bounds = array<i64: 1, 128>}, {pipeline_mode = #tpu.pipeline_mode<synchronous>, transform_indices = @transform_21, window_bounds = array<i64: 128, 128>}, {pipeline_mode = #tpu.pipeline_mode<synchronous>, transform_indices = @transform_22, window_bounds = array<i64: 1, 128>}, {pipeline_mode = #tpu.pipeline_mode<synchronous>, transform_indices = @transform_23, window_bounds = array<i64: 128, 128>}, {pipeline_mode = #tpu.pipeline_mode<synchronous>, transform_indices = @transform_24, window_bounds = array<i64: 1, 128>}, {transform_indices = @transform_25, window_bounds = array<i64: 1, 8, 128>}]} {
    %0 = tpu.iota {dimensions = array<i32: 2>} : vector<1x1x8xi32>
    %c5_i32 = arith.constant 5 : i32
    %1 = vector.broadcast %c5_i32 : i32 to vector<1x1x8xi32>
    %2 = arith.cmpi slt, %0, %1 : vector<1x1x8xi32>
    %cst = arith.constant 0.000000e+00 : f32
    %cst_0 = arith.constant -1.000000e+30 : f32
    %3 = vector.broadcast %cst : f32 to vector<1x1x8xf32>
    %4 = vector.broadcast %cst_0 : f32 to vector<1x1x8xf32>
    %5 = arith.select %2, %3, %4 : vector<1x1x8xi1>, vector<1x1x8xf32>
    %c0 = arith.constant 0 : index
    %c0_1 = arith.constant 0 : index
    %c0_2 = arith.constant 0 : index
    %6 = vector.load %arg2[%c0, %c0_1, %c0_2] : memref<1x8x128xf32, #tpu.memory_space<vmem>>, vector<1x8x128xf32>
    %7 = vector.shape_cast %6 : vector<1x8x128xf32> to vector<8x128xf32>
    %c0_3 = arith.constant 0 : index
    %c0_4 = arith.constant 0 : index
    %c0_5 = arith.constant 0 : index
    %8 = vector.load %arg1[%c0_3, %c0_4, %c0_5] : memref<1x8x768xbf16, #tpu.memory_space<vmem>>, vector<1x8x768xbf16>
    %9 = vector.shape_cast %8 : vector<1x8x768xbf16> to vector<8x768xbf16>
    %c0_6 = arith.constant 0 : index
    %c0_7 = arith.constant 0 : index
    %10 = vector.load %arg3[%c0_6, %c0_7] : memref<768x128xbf16, #tpu.memory_space<vmem>>, vector<768x128xbf16>
    %cst_8 = arith.constant dense<0.000000e+00> : vector<8x128xf32>
    %11 = tpu.matmul %9, %10, %cst_8 {dimension_numbers = #tpu.dot_dimension_numbers<[1], [0], [0], [1], [0, 0, 1, 1], [], []>} : vector<8x768xbf16>, vector<768x128xbf16>, vector<8x128xf32> -> vector<8x128xf32>
    %12 = arith.addf %7, %11 : vector<8x128xf32>
    %c0_9 = arith.constant 0 : index
    %c0_10 = arith.constant 0 : index
    %c0_11 = arith.constant 0 : index
    %13 = vector.load %arg4[%c0_9, %c0_10, %c0_11] : memref<2x1x128xf32, #tpu.memory_space<vmem>>, vector<1x1x128xf32>
    %14 = vector.shape_cast %13 : vector<1x1x128xf32> to vector<1x128xf32>
    %c0_12 = arith.constant 0 : index
    %c0_13 = arith.constant 0 : index
    %c0_14 = arith.constant 0 : index
    %15 = vector.load %arg5[%c0_12, %c0_13, %c0_14] : memref<2x1x128xf32, #tpu.memory_space<vmem>>, vector<1x1x128xf32>
    %16 = vector.shape_cast %15 : vector<1x1x128xf32> to vector<1x128xf32>
    %cst_15 = arith.constant dense<0.000000e+00> : vector<8xf32>
    %17 = vector.multi_reduction <add>, %12, %cst_15 [1] : vector<8x128xf32> to vector<8xf32>
    %18 = vector.shape_cast %17 : vector<8xf32> to vector<8x1xf32>
    %cst_16 = arith.constant 1.280000e+02 : f32
    %19 = vector.broadcast %cst_16 : f32 to vector<8x1xf32>
    %20 = arith.divf %18, %19 : vector<8x1xf32>
    %21 = vector.broadcast %20 : vector<8x1xf32> to vector<8x128xf32>
    %22 = arith.subf %12, %21 : vector<8x128xf32>
    %23 = arith.mulf %22, %22 : vector<8x128xf32>
    %cst_17 = arith.constant dense<0.000000e+00> : vector<8xf32>
    %24 = vector.multi_reduction <add>, %23, %cst_17 [1] : vector<8x128xf32> to vector<8xf32>
    %25 = vector.shape_cast %24 : vector<8xf32> to vector<8x1xf32>
    %cst_18 = arith.constant 1.280000e+02 : f32
    %26 = vector.broadcast %cst_18 : f32 to vector<8x1xf32>
    %27 = arith.divf %25, %26 : vector<8x1xf32>
    %28 = vector.broadcast %20 : vector<8x1xf32> to vector<8x128xf32>
    %29 = arith.subf %12, %28 : vector<8x128xf32>
    %cst_19 = arith.constant 9.99999997E-7 : f32
    %30 = vector.broadcast %cst_19 : f32 to vector<8x1xf32>
    %31 = arith.addf %27, %30 : vector<8x1xf32>
    %32 = math.rsqrt %31 : vector<8x1xf32>
    %33 = vector.broadcast %32 : vector<8x1xf32> to vector<8x128xf32>
    %34 = arith.mulf %29, %33 : vector<8x128xf32>
    %35 = vector.broadcast %14 : vector<1x128xf32> to vector<8x128xf32>
    %36 = arith.mulf %34, %35 : vector<8x128xf32>
    %37 = vector.broadcast %16 : vector<1x128xf32> to vector<8x128xf32>
    %38 = arith.addf %36, %37 : vector<8x128xf32>
    %39 = arith.truncf %38 : vector<8x128xf32> to vector<8x128xbf16>
    %40 = vector.shape_cast %39 : vector<8x128xbf16> to vector<1x8x128xbf16>
    %41 = vector.shape_cast %40 : vector<1x8x128xbf16> to vector<1x8x128xbf16>
    %42 = vector.broadcast %41 : vector<1x8x128xbf16> to vector<4x8x128xbf16>
    %c0_20 = arith.constant 0 : index
    %c0_21 = arith.constant 0 : index
    %c0_22 = arith.constant 0 : index
    %c0_23 = arith.constant 0 : index
    %43 = vector.load %arg6[%c0_20, %c0_21, %c0_22, %c0_23] : memref<2x4x128x32xbf16, #tpu.memory_space<vmem>>, vector<1x4x128x32xbf16>
    %44 = vector.shape_cast %43 : vector<1x4x128x32xbf16> to vector<4x128x32xbf16>
    "tpu.trace_start"() <{level = 10 : i32, message = "hsc,hcd->hsd"}> : () -> ()
    %cst_24 = arith.constant dense<0.000000e+00> : vector<4x8x32xf32>
    %45 = tpu.matmul %42, %44, %cst_24 {dimension_numbers = #tpu.dot_dimension_numbers<[2], [1], [1], [2], [0, 0, 0, 1, 1, 2], [0], [0]>} : vector<4x8x128xbf16>, vector<4x128x32xbf16>, vector<4x8x32xf32> -> vector<4x8x32xf32>
    "tpu.trace_stop"() : () -> ()
    %c0_25 = arith.constant 0 : index
    %c0_26 = arith.constant 0 : index
    %c0_27 = arith.constant 0 : index
    %c0_28 = arith.constant 0 : index
    %46 = vector.load %arg9[%c0_25, %c0_26, %c0_27, %c0_28] : memref<2x4x1x32xf32, #tpu.memory_space<vmem>>, vector<1x4x1x32xf32>
    %47 = vector.shape_cast %46 : vector<1x4x1x32xf32> to vector<4x1x32xf32>
    %48 = vector.broadcast %47 : vector<4x1x32xf32> to vector<4x8x32xf32>
    %49 = arith.addf %45, %48 : vector<4x8x32xf32>
    %c0_29 = arith.constant 0 : index
    %c0_30 = arith.constant 0 : index
    %c0_31 = arith.constant 0 : index
    %c0_32 = arith.constant 0 : index
    %50 = vector.load %arg7[%c0_29, %c0_30, %c0_31, %c0_32] : memref<2x4x128x32xbf16, #tpu.memory_space<vmem>>, vector<1x4x128x32xbf16>
    %51 = vector.shape_cast %50 : vector<1x4x128x32xbf16> to vector<4x128x32xbf16>
    "tpu.trace_start"() <{level = 10 : i32, message = "hsc,hcd->hsd"}> : () -> ()
    %cst_33 = arith.constant dense<0.000000e+00> : vector<4x8x32xf32>
    %52 = tpu.matmul %42, %51, %cst_33 {dimension_numbers = #tpu.dot_dimension_numbers<[2], [1], [1], [2], [0, 0, 0, 1, 1, 2], [0], [0]>} : vector<4x8x128xbf16>, vector<4x128x32xbf16>, vector<4x8x32xf32> -> vector<4x8x32xf32>
    "tpu.trace_stop"() : () -> ()
    %c0_34 = arith.constant 0 : index
    %c0_35 = arith.constant 0 : index
    %c0_36 = arith.constant 0 : index
    %c0_37 = arith.constant 0 : index
    %53 = vector.load %arg10[%c0_34, %c0_35, %c0_36, %c0_37] : memref<2x4x1x32xf32, #tpu.memory_space<vmem>>, vector<1x4x1x32xf32>
    %54 = vector.shape_cast %53 : vector<1x4x1x32xf32> to vector<4x1x32xf32>
    %55 = vector.broadcast %54 : vector<4x1x32xf32> to vector<4x8x32xf32>
    %56 = arith.addf %52, %55 : vector<4x8x32xf32>
    %c0_38 = arith.constant 0 : index
    %c0_39 = arith.constant 0 : index
    %c0_40 = arith.constant 0 : index
    %c0_41 = arith.constant 0 : index
    %57 = vector.load %arg8[%c0_38, %c0_39, %c0_40, %c0_41] : memref<2x4x128x32xbf16, #tpu.memory_space<vmem>>, vector<1x4x128x32xbf16>
    %58 = vector.shape_cast %57 : vector<1x4x128x32xbf16> to vector<4x128x32xbf16>
    "tpu.trace_start"() <{level = 10 : i32, message = "hsc,hcd->hsd"}> : () -> ()
    %cst_42 = arith.constant dense<0.000000e+00> : vector<4x8x32xf32>
    %59 = tpu.matmul %42, %58, %cst_42 {dimension_numbers = #tpu.dot_dimension_numbers<[2], [1], [1], [2], [0, 0, 0, 1, 1, 2], [0], [0]>} : vector<4x8x128xbf16>, vector<4x128x32xbf16>, vector<4x8x32xf32> -> vector<4x8x32xf32>
    "tpu.trace_stop"() : () -> ()
    %c0_43 = arith.constant 0 : index
    %c0_44 = arith.constant 0 : index
    %c0_45 = arith.constant 0 : index
    %c0_46 = arith.constant 0 : index
    %60 = vector.load %arg11[%c0_43, %c0_44, %c0_45, %c0_46] : memref<2x4x1x32xf32, #tpu.memory_space<vmem>>, vector<1x4x1x32xf32>
    %61 = vector.shape_cast %60 : vector<1x4x1x32xf32> to vector<4x1x32xf32>
    %62 = vector.broadcast %61 : vector<4x1x32xf32> to vector<4x8x32xf32>
    %63 = arith.addf %59, %62 : vector<4x8x32xf32>
    %64 = arith.truncf %49 : vector<4x8x32xf32> to vector<4x8x32xbf16>
    %65 = arith.truncf %56 : vector<4x8x32xf32> to vector<4x8x32xbf16>
    "tpu.trace_start"() <{level = 10 : i32, message = "hqd,hkd->hqk"}> : () -> ()
    %cst_47 = arith.constant dense<0.000000e+00> : vector<4x8x8xf32>
    %66 = tpu.matmul %64, %65, %cst_47 {dimension_numbers = #tpu.dot_dimension_numbers<[2], [2], [1], [1], [0, 0, 0, 1, 1, 1], [0], [0]>} : vector<4x8x32xbf16>, vector<4x8x32xbf16>, vector<4x8x8xf32> -> vector<4x8x8xf32>
    "tpu.trace_stop"() : () -> ()
    %cst_48 = arith.constant 0.176776692 : f32
    %67 = vector.broadcast %cst_48 : f32 to vector<4x8x8xf32>
    %68 = arith.mulf %66, %67 : vector<4x8x8xf32>
    %69 = vector.broadcast %5 : vector<1x1x8xf32> to vector<4x8x8xf32>
    %70 = arith.addf %68, %69 : vector<4x8x8xf32>
    %cst_49 = arith.constant dense<0xFF800000> : vector<4x8xf32>
    %71 = vector.multi_reduction <maximumf>, %70, %cst_49 [2] : vector<4x8x8xf32> to vector<4x8xf32>
    %72 = vector.shape_cast %71 : vector<4x8xf32> to vector<4x8x1xf32>
    %73 = vector.broadcast %72 : vector<4x8x1xf32> to vector<4x8x8xf32>
    %74 = arith.subf %70, %73 : vector<4x8x8xf32>
    %75 = math.exp %74 : vector<4x8x8xf32>
    %cst_50 = arith.constant dense<0.000000e+00> : vector<4x8xf32>
    %76 = vector.multi_reduction <add>, %75, %cst_50 [2] : vector<4x8x8xf32> to vector<4x8xf32>
    %77 = vector.shape_cast %76 : vector<4x8xf32> to vector<4x8x1xf32>
    %78 = tpu.reciprocal %77 {approx = true} : vector<4x8x1xf32> -> vector<4x8x1xf32>
    %79 = vector.broadcast %78 : vector<4x8x1xf32> to vector<4x8x8xf32>
    %80 = arith.mulf %75, %79 : vector<4x8x8xf32>
    %81 = arith.truncf %80 : vector<4x8x8xf32> to vector<4x8x8xbf16>
    %82 = arith.truncf %63 : vector<4x8x32xf32> to vector<4x8x32xbf16>
    "tpu.trace_start"() <{level = 10 : i32, message = "hqk,hkd->hqd"}> : () -> ()
    %cst_51 = arith.constant dense<0.000000e+00> : vector<4x8x32xf32>
    %83 = tpu.matmul %81, %82, %cst_51 {dimension_numbers = #tpu.dot_dimension_numbers<[2], [1], [1], [2], [0, 0, 0, 1, 1, 2], [0], [0]>} : vector<4x8x8xbf16>, vector<4x8x32xbf16>, vector<4x8x32xf32> -> vector<4x8x32xf32>
    "tpu.trace_stop"() : () -> ()
    %84 = arith.truncf %83 : vector<4x8x32xf32> to vector<4x8x32xbf16>
    %c0_52 = arith.constant 0 : index
    %c0_53 = arith.constant 0 : index
    %c0_54 = arith.constant 0 : index
    %c0_55 = arith.constant 0 : index
    %85 = vector.load %arg12[%c0_52, %c0_53, %c0_54, %c0_55] : memref<2x4x32x128xbf16, #tpu.memory_space<vmem>>, vector<1x4x32x128xbf16>
    %86 = vector.shape_cast %85 : vector<1x4x32x128xbf16> to vector<4x32x128xbf16>
    "tpu.trace_start"() <{level = 10 : i32, message = "hqd,hde->hqe"}> : () -> ()
    %cst_56 = arith.constant dense<0.000000e+00> : vector<4x8x128xf32>
    %87 = tpu.matmul %84, %86, %cst_56 {dimension_numbers = #tpu.dot_dimension_numbers<[2], [1], [1], [2], [0, 0, 0, 1, 1, 2], [0], [0]>} : vector<4x8x32xbf16>, vector<4x32x128xbf16>, vector<4x8x128xf32> -> vector<4x8x128xf32>
    "tpu.trace_stop"() : () -> ()
    %cst_57 = arith.constant dense<0.000000e+00> : vector<8x128xf32>
    %88 = vector.multi_reduction <add>, %87, %cst_57 [0] : vector<4x8x128xf32> to vector<8x128xf32>
    %89 = arith.addf %12, %88 : vector<8x128xf32>
    %c0_58 = arith.constant 0 : index
    %c0_59 = arith.constant 0 : index
    %c0_60 = arith.constant 0 : index
    %90 = vector.load %arg13[%c0_58, %c0_59, %c0_60] : memref<2x1x128xf32, #tpu.memory_space<vmem>>, vector<1x1x128xf32>
    %91 = vector.shape_cast %90 : vector<1x1x128xf32> to vector<1x128xf32>
    %92 = vector.broadcast %91 : vector<1x128xf32> to vector<8x128xf32>
    %93 = arith.addf %89, %92 : vector<8x128xf32>
    %c0_61 = arith.constant 0 : index
    %c0_62 = arith.constant 0 : index
    %c0_63 = arith.constant 0 : index
    %94 = vector.load %arg14[%c0_61, %c0_62, %c0_63] : memref<2x1x128xf32, #tpu.memory_space<vmem>>, vector<1x1x128xf32>
    %95 = vector.shape_cast %94 : vector<1x1x128xf32> to vector<1x128xf32>
    %c0_64 = arith.constant 0 : index
    %c0_65 = arith.constant 0 : index
    %c0_66 = arith.constant 0 : index
    %96 = vector.load %arg15[%c0_64, %c0_65, %c0_66] : memref<2x1x128xf32, #tpu.memory_space<vmem>>, vector<1x1x128xf32>
    %97 = vector.shape_cast %96 : vector<1x1x128xf32> to vector<1x128xf32>
    %cst_67 = arith.constant dense<0.000000e+00> : vector<8xf32>
    %98 = vector.multi_reduction <add>, %93, %cst_67 [1] : vector<8x128xf32> to vector<8xf32>
    %99 = vector.shape_cast %98 : vector<8xf32> to vector<8x1xf32>
    %cst_68 = arith.constant 1.280000e+02 : f32
    %100 = vector.broadcast %cst_68 : f32 to vector<8x1xf32>
    %101 = arith.divf %99, %100 : vector<8x1xf32>
    %102 = vector.broadcast %101 : vector<8x1xf32> to vector<8x128xf32>
    %103 = arith.subf %93, %102 : vector<8x128xf32>
    %104 = arith.mulf %103, %103 : vector<8x128xf32>
    %cst_69 = arith.constant dense<0.000000e+00> : vector<8xf32>
    %105 = vector.multi_reduction <add>, %104, %cst_69 [1] : vector<8x128xf32> to vector<8xf32>
    %106 = vector.shape_cast %105 : vector<8xf32> to vector<8x1xf32>
    %cst_70 = arith.constant 1.280000e+02 : f32
    %107 = vector.broadcast %cst_70 : f32 to vector<8x1xf32>
    %108 = arith.divf %106, %107 : vector<8x1xf32>
    %109 = vector.broadcast %101 : vector<8x1xf32> to vector<8x128xf32>
    %110 = arith.subf %93, %109 : vector<8x128xf32>
    %cst_71 = arith.constant 9.99999997E-7 : f32
    %111 = vector.broadcast %cst_71 : f32 to vector<8x1xf32>
    %112 = arith.addf %108, %111 : vector<8x1xf32>
    %113 = math.rsqrt %112 : vector<8x1xf32>
    %114 = vector.broadcast %113 : vector<8x1xf32> to vector<8x128xf32>
    %115 = arith.mulf %110, %114 : vector<8x128xf32>
    %116 = vector.broadcast %95 : vector<1x128xf32> to vector<8x128xf32>
    %117 = arith.mulf %115, %116 : vector<8x128xf32>
    %118 = vector.broadcast %97 : vector<1x128xf32> to vector<8x128xf32>
    %119 = arith.addf %117, %118 : vector<8x128xf32>
    %c0_72 = arith.constant 0 : index
    %c0_73 = arith.constant 0 : index
    %c0_74 = arith.constant 0 : index
    %120 = vector.load %arg16[%c0_72, %c0_73, %c0_74] : memref<2x128x256xbf16, #tpu.memory_space<vmem>>, vector<1x128x256xbf16>
    %121 = vector.shape_cast %120 : vector<1x128x256xbf16> to vector<128x256xbf16>
    %122 = arith.truncf %119 : vector<8x128xf32> to vector<8x128xbf16>
    %cst_75 = arith.constant dense<0.000000e+00> : vector<8x256xf32>
    %123 = tpu.matmul %122, %121, %cst_75 {dimension_numbers = #tpu.dot_dimension_numbers<[1], [0], [0], [1], [0, 0, 1, 1], [], []>} : vector<8x128xbf16>, vector<128x256xbf16>, vector<8x256xf32> -> vector<8x256xf32>
    %c0_76 = arith.constant 0 : index
    %c0_77 = arith.constant 0 : index
    %c0_78 = arith.constant 0 : index
    %124 = vector.load %arg17[%c0_76, %c0_77, %c0_78] : memref<2x1x256xf32, #tpu.memory_space<vmem>>, vector<1x1x256xf32>
    %125 = vector.shape_cast %124 : vector<1x1x256xf32> to vector<1x256xf32>
    %126 = vector.broadcast %125 : vector<1x256xf32> to vector<8x256xf32>
    %127 = arith.addf %123, %126 : vector<8x256xf32>
    %128 = arith.mulf %127, %127 : vector<8x256xf32>
    %129 = arith.mulf %127, %128 : vector<8x256xf32>
    %cst_79 = arith.constant 4.471500e-02 : f32
    %130 = vector.broadcast %cst_79 : f32 to vector<8x256xf32>
    %131 = arith.mulf %130, %129 : vector<8x256xf32>
    %132 = arith.addf %127, %131 : vector<8x256xf32>
    %cst_80 = arith.constant 0.797884583 : f32
    %133 = vector.broadcast %cst_80 : f32 to vector<8x256xf32>
    %134 = arith.mulf %133, %132 : vector<8x256xf32>
    %135 = math.tanh %134 : vector<8x256xf32>
    %cst_81 = arith.constant 1.000000e+00 : f32
    %136 = vector.broadcast %cst_81 : f32 to vector<8x256xf32>
    %137 = arith.addf %136, %135 : vector<8x256xf32>
    %cst_82 = arith.constant 5.000000e-01 : f32
    %138 = vector.broadcast %cst_82 : f32 to vector<8x256xf32>
    %139 = arith.mulf %138, %137 : vector<8x256xf32>
    %140 = arith.mulf %127, %139 : vector<8x256xf32>
    %c0_83 = arith.constant 0 : index
    %c0_84 = arith.constant 0 : index
    %c0_85 = arith.constant 0 : index
    %141 = vector.load %arg18[%c0_83, %c0_84, %c0_85] : memref<2x256x128xbf16, #tpu.memory_space<vmem>>, vector<1x256x128xbf16>
    %142 = vector.shape_cast %141 : vector<1x256x128xbf16> to vector<256x128xbf16>
    %143 = arith.truncf %140 : vector<8x256xf32> to vector<8x256xbf16>
    %cst_86 = arith.constant dense<0.000000e+00> : vector<8x128xf32>
    %144 = tpu.matmul %143, %142, %cst_86 {dimension_numbers = #tpu.dot_dimension_numbers<[1], [0], [0], [1], [0, 0, 1, 1], [], []>} : vector<8x256xbf16>, vector<256x128xbf16>, vector<8x128xf32> -> vector<8x128xf32>
    %145 = arith.addf %93, %144 : vector<8x128xf32>
    %c0_87 = arith.constant 0 : index
    %c0_88 = arith.constant 0 : index
    %c0_89 = arith.constant 0 : index
    %146 = vector.load %arg19[%c0_87, %c0_88, %c0_89] : memref<2x1x128xf32, #tpu.memory_space<vmem>>, vector<1x1x128xf32>
    %147 = vector.shape_cast %146 : vector<1x1x128xf32> to vector<1x128xf32>
    %148 = vector.broadcast %147 : vector<1x128xf32> to vector<8x128xf32>
    %149 = arith.addf %145, %148 : vector<8x128xf32>
    %c1 = arith.constant 1 : index
    %c0_90 = arith.constant 0 : index
    %c0_91 = arith.constant 0 : index
    %150 = vector.load %arg4[%c1, %c0_90, %c0_91] : memref<2x1x128xf32, #tpu.memory_space<vmem>>, vector<1x1x128xf32>
    %151 = vector.shape_cast %150 : vector<1x1x128xf32> to vector<1x128xf32>
    %c1_92 = arith.constant 1 : index
    %c0_93 = arith.constant 0 : index
    %c0_94 = arith.constant 0 : index
    %152 = vector.load %arg5[%c1_92, %c0_93, %c0_94] : memref<2x1x128xf32, #tpu.memory_space<vmem>>, vector<1x1x128xf32>
    %153 = vector.shape_cast %152 : vector<1x1x128xf32> to vector<1x128xf32>
    %cst_95 = arith.constant dense<0.000000e+00> : vector<8xf32>
    %154 = vector.multi_reduction <add>, %149, %cst_95 [1] : vector<8x128xf32> to vector<8xf32>
    %155 = vector.shape_cast %154 : vector<8xf32> to vector<8x1xf32>
    %cst_96 = arith.constant 1.280000e+02 : f32
    %156 = vector.broadcast %cst_96 : f32 to vector<8x1xf32>
    %157 = arith.divf %155, %156 : vector<8x1xf32>
    %158 = vector.broadcast %157 : vector<8x1xf32> to vector<8x128xf32>
    %159 = arith.subf %149, %158 : vector<8x128xf32>
    %160 = arith.mulf %159, %159 : vector<8x128xf32>
    %cst_97 = arith.constant dense<0.000000e+00> : vector<8xf32>
    %161 = vector.multi_reduction <add>, %160, %cst_97 [1] : vector<8x128xf32> to vector<8xf32>
    %162 = vector.shape_cast %161 : vector<8xf32> to vector<8x1xf32>
    %cst_98 = arith.constant 1.280000e+02 : f32
    %163 = vector.broadcast %cst_98 : f32 to vector<8x1xf32>
    %164 = arith.divf %162, %163 : vector<8x1xf32>
    %165 = vector.broadcast %157 : vector<8x1xf32> to vector<8x128xf32>
    %166 = arith.subf %149, %165 : vector<8x128xf32>
    %cst_99 = arith.constant 9.99999997E-7 : f32
    %167 = vector.broadcast %cst_99 : f32 to vector<8x1xf32>
    %168 = arith.addf %164, %167 : vector<8x1xf32>
    %169 = math.rsqrt %168 : vector<8x1xf32>
    %170 = vector.broadcast %169 : vector<8x1xf32> to vector<8x128xf32>
    %171 = arith.mulf %166, %170 : vector<8x128xf32>
    %172 = vector.broadcast %151 : vector<1x128xf32> to vector<8x128xf32>
    %173 = arith.mulf %171, %172 : vector<8x128xf32>
    %174 = vector.broadcast %153 : vector<1x128xf32> to vector<8x128xf32>
    %175 = arith.addf %173, %174 : vector<8x128xf32>
    %176 = arith.truncf %175 : vector<8x128xf32> to vector<8x128xbf16>
    %177 = vector.shape_cast %176 : vector<8x128xbf16> to vector<1x8x128xbf16>
    %178 = vector.shape_cast %177 : vector<1x8x128xbf16> to vector<1x8x128xbf16>
    %179 = vector.broadcast %178 : vector<1x8x128xbf16> to vector<4x8x128xbf16>
    %c1_100 = arith.constant 1 : index
    %c0_101 = arith.constant 0 : index
    %c0_102 = arith.constant 0 : index
    %c0_103 = arith.constant 0 : index
    %180 = vector.load %arg6[%c1_100, %c0_101, %c0_102, %c0_103] : memref<2x4x128x32xbf16, #tpu.memory_space<vmem>>, vector<1x4x128x32xbf16>
    %181 = vector.shape_cast %180 : vector<1x4x128x32xbf16> to vector<4x128x32xbf16>
    "tpu.trace_start"() <{level = 10 : i32, message = "hsc,hcd->hsd"}> : () -> ()
    %cst_104 = arith.constant dense<0.000000e+00> : vector<4x8x32xf32>
    %182 = tpu.matmul %179, %181, %cst_104 {dimension_numbers = #tpu.dot_dimension_numbers<[2], [1], [1], [2], [0, 0, 0, 1, 1, 2], [0], [0]>} : vector<4x8x128xbf16>, vector<4x128x32xbf16>, vector<4x8x32xf32> -> vector<4x8x32xf32>
    "tpu.trace_stop"() : () -> ()
    %c1_105 = arith.constant 1 : index
    %c0_106 = arith.constant 0 : index
    %c0_107 = arith.constant 0 : index
    %c0_108 = arith.constant 0 : index
    %183 = vector.load %arg9[%c1_105, %c0_106, %c0_107, %c0_108] : memref<2x4x1x32xf32, #tpu.memory_space<vmem>>, vector<1x4x1x32xf32>
    %184 = vector.shape_cast %183 : vector<1x4x1x32xf32> to vector<4x1x32xf32>
    %185 = vector.broadcast %184 : vector<4x1x32xf32> to vector<4x8x32xf32>
    %186 = arith.addf %182, %185 : vector<4x8x32xf32>
    %c1_109 = arith.constant 1 : index
    %c0_110 = arith.constant 0 : index
    %c0_111 = arith.constant 0 : index
    %c0_112 = arith.constant 0 : index
    %187 = vector.load %arg7[%c1_109, %c0_110, %c0_111, %c0_112] : memref<2x4x128x32xbf16, #tpu.memory_space<vmem>>, vector<1x4x128x32xbf16>
    %188 = vector.shape_cast %187 : vector<1x4x128x32xbf16> to vector<4x128x32xbf16>
    "tpu.trace_start"() <{level = 10 : i32, message = "hsc,hcd->hsd"}> : () -> ()
    %cst_113 = arith.constant dense<0.000000e+00> : vector<4x8x32xf32>
    %189 = tpu.matmul %179, %188, %cst_113 {dimension_numbers = #tpu.dot_dimension_numbers<[2], [1], [1], [2], [0, 0, 0, 1, 1, 2], [0], [0]>} : vector<4x8x128xbf16>, vector<4x128x32xbf16>, vector<4x8x32xf32> -> vector<4x8x32xf32>
    "tpu.trace_stop"() : () -> ()
    %c1_114 = arith.constant 1 : index
    %c0_115 = arith.constant 0 : index
    %c0_116 = arith.constant 0 : index
    %c0_117 = arith.constant 0 : index
    %190 = vector.load %arg10[%c1_114, %c0_115, %c0_116, %c0_117] : memref<2x4x1x32xf32, #tpu.memory_space<vmem>>, vector<1x4x1x32xf32>
    %191 = vector.shape_cast %190 : vector<1x4x1x32xf32> to vector<4x1x32xf32>
    %192 = vector.broadcast %191 : vector<4x1x32xf32> to vector<4x8x32xf32>
    %193 = arith.addf %189, %192 : vector<4x8x32xf32>
    %c1_118 = arith.constant 1 : index
    %c0_119 = arith.constant 0 : index
    %c0_120 = arith.constant 0 : index
    %c0_121 = arith.constant 0 : index
    %194 = vector.load %arg8[%c1_118, %c0_119, %c0_120, %c0_121] : memref<2x4x128x32xbf16, #tpu.memory_space<vmem>>, vector<1x4x128x32xbf16>
    %195 = vector.shape_cast %194 : vector<1x4x128x32xbf16> to vector<4x128x32xbf16>
    "tpu.trace_start"() <{level = 10 : i32, message = "hsc,hcd->hsd"}> : () -> ()
    %cst_122 = arith.constant dense<0.000000e+00> : vector<4x8x32xf32>
    %196 = tpu.matmul %179, %195, %cst_122 {dimension_numbers = #tpu.dot_dimension_numbers<[2], [1], [1], [2], [0, 0, 0, 1, 1, 2], [0], [0]>} : vector<4x8x128xbf16>, vector<4x128x32xbf16>, vector<4x8x32xf32> -> vector<4x8x32xf32>
    "tpu.trace_stop"() : () -> ()
    %c1_123 = arith.constant 1 : index
    %c0_124 = arith.constant 0 : index
    %c0_125 = arith.constant 0 : index
    %c0_126 = arith.constant 0 : index
    %197 = vector.load %arg11[%c1_123, %c0_124, %c0_125, %c0_126] : memref<2x4x1x32xf32, #tpu.memory_space<vmem>>, vector<1x4x1x32xf32>
    %198 = vector.shape_cast %197 : vector<1x4x1x32xf32> to vector<4x1x32xf32>
    %199 = vector.broadcast %198 : vector<4x1x32xf32> to vector<4x8x32xf32>
    %200 = arith.addf %196, %199 : vector<4x8x32xf32>
    %201 = arith.truncf %186 : vector<4x8x32xf32> to vector<4x8x32xbf16>
    %202 = arith.truncf %193 : vector<4x8x32xf32> to vector<4x8x32xbf16>
    "tpu.trace_start"() <{level = 10 : i32, message = "hqd,hkd->hqk"}> : () -> ()
    %cst_127 = arith.constant dense<0.000000e+00> : vector<4x8x8xf32>
    %203 = tpu.matmul %201, %202, %cst_127 {dimension_numbers = #tpu.dot_dimension_numbers<[2], [2], [1], [1], [0, 0, 0, 1, 1, 1], [0], [0]>} : vector<4x8x32xbf16>, vector<4x8x32xbf16>, vector<4x8x8xf32> -> vector<4x8x8xf32>
    "tpu.trace_stop"() : () -> ()
    %cst_128 = arith.constant 0.176776692 : f32
    %204 = vector.broadcast %cst_128 : f32 to vector<4x8x8xf32>
    %205 = arith.mulf %203, %204 : vector<4x8x8xf32>
    %206 = vector.broadcast %5 : vector<1x1x8xf32> to vector<4x8x8xf32>
    %207 = arith.addf %205, %206 : vector<4x8x8xf32>
    %cst_129 = arith.constant dense<0xFF800000> : vector<4x8xf32>
    %208 = vector.multi_reduction <maximumf>, %207, %cst_129 [2] : vector<4x8x8xf32> to vector<4x8xf32>
    %209 = vector.shape_cast %208 : vector<4x8xf32> to vector<4x8x1xf32>
    %210 = vector.broadcast %209 : vector<4x8x1xf32> to vector<4x8x8xf32>
    %211 = arith.subf %207, %210 : vector<4x8x8xf32>
    %212 = math.exp %211 : vector<4x8x8xf32>
    %cst_130 = arith.constant dense<0.000000e+00> : vector<4x8xf32>
    %213 = vector.multi_reduction <add>, %212, %cst_130 [2] : vector<4x8x8xf32> to vector<4x8xf32>
    %214 = vector.shape_cast %213 : vector<4x8xf32> to vector<4x8x1xf32>
    %215 = tpu.reciprocal %214 {approx = true} : vector<4x8x1xf32> -> vector<4x8x1xf32>
    %216 = vector.broadcast %215 : vector<4x8x1xf32> to vector<4x8x8xf32>
    %217 = arith.mulf %212, %216 : vector<4x8x8xf32>
    %218 = arith.truncf %217 : vector<4x8x8xf32> to vector<4x8x8xbf16>
    %219 = arith.truncf %200 : vector<4x8x32xf32> to vector<4x8x32xbf16>
    "tpu.trace_start"() <{level = 10 : i32, message = "hqk,hkd->hqd"}> : () -> ()
    %cst_131 = arith.constant dense<0.000000e+00> : vector<4x8x32xf32>
    %220 = tpu.matmul %218, %219, %cst_131 {dimension_numbers = #tpu.dot_dimension_numbers<[2], [1], [1], [2], [0, 0, 0, 1, 1, 2], [0], [0]>} : vector<4x8x8xbf16>, vector<4x8x32xbf16>, vector<4x8x32xf32> -> vector<4x8x32xf32>
    "tpu.trace_stop"() : () -> ()
    %221 = arith.truncf %220 : vector<4x8x32xf32> to vector<4x8x32xbf16>
    %c1_132 = arith.constant 1 : index
    %c0_133 = arith.constant 0 : index
    %c0_134 = arith.constant 0 : index
    %c0_135 = arith.constant 0 : index
    %222 = vector.load %arg12[%c1_132, %c0_133, %c0_134, %c0_135] : memref<2x4x32x128xbf16, #tpu.memory_space<vmem>>, vector<1x4x32x128xbf16>
    %223 = vector.shape_cast %222 : vector<1x4x32x128xbf16> to vector<4x32x128xbf16>
    "tpu.trace_start"() <{level = 10 : i32, message = "hqd,hde->hqe"}> : () -> ()
    %cst_136 = arith.constant dense<0.000000e+00> : vector<4x8x128xf32>
    %224 = tpu.matmul %221, %223, %cst_136 {dimension_numbers = #tpu.dot_dimension_numbers<[2], [1], [1], [2], [0, 0, 0, 1, 1, 2], [0], [0]>} : vector<4x8x32xbf16>, vector<4x32x128xbf16>, vector<4x8x128xf32> -> vector<4x8x128xf32>
    "tpu.trace_stop"() : () -> ()
    %cst_137 = arith.constant dense<0.000000e+00> : vector<8x128xf32>
    %225 = vector.multi_reduction <add>, %224, %cst_137 [0] : vector<4x8x128xf32> to vector<8x128xf32>
    %226 = arith.addf %149, %225 : vector<8x128xf32>
    %c1_138 = arith.constant 1 : index
    %c0_139 = arith.constant 0 : index
    %c0_140 = arith.constant 0 : index
    %227 = vector.load %arg13[%c1_138, %c0_139, %c0_140] : memref<2x1x128xf32, #tpu.memory_space<vmem>>, vector<1x1x128xf32>
    %228 = vector.shape_cast %227 : vector<1x1x128xf32> to vector<1x128xf32>
    %229 = vector.broadcast %228 : vector<1x128xf32> to vector<8x128xf32>
    %230 = arith.addf %226, %229 : vector<8x128xf32>
    %c1_141 = arith.constant 1 : index
    %c0_142 = arith.constant 0 : index
    %c0_143 = arith.constant 0 : index
    %231 = vector.load %arg14[%c1_141, %c0_142, %c0_143] : memref<2x1x128xf32, #tpu.memory_space<vmem>>, vector<1x1x128xf32>
    %232 = vector.shape_cast %231 : vector<1x1x128xf32> to vector<1x128xf32>
    %c1_144 = arith.constant 1 : index
    %c0_145 = arith.constant 0 : index
    %c0_146 = arith.constant 0 : index
    %233 = vector.load %arg15[%c1_144, %c0_145, %c0_146] : memref<2x1x128xf32, #tpu.memory_space<vmem>>, vector<1x1x128xf32>
    %234 = vector.shape_cast %233 : vector<1x1x128xf32> to vector<1x128xf32>
    %cst_147 = arith.constant dense<0.000000e+00> : vector<8xf32>
    %235 = vector.multi_reduction <add>, %230, %cst_147 [1] : vector<8x128xf32> to vector<8xf32>
    %236 = vector.shape_cast %235 : vector<8xf32> to vector<8x1xf32>
    %cst_148 = arith.constant 1.280000e+02 : f32
    %237 = vector.broadcast %cst_148 : f32 to vector<8x1xf32>
    %238 = arith.divf %236, %237 : vector<8x1xf32>
    %239 = vector.broadcast %238 : vector<8x1xf32> to vector<8x128xf32>
    %240 = arith.subf %230, %239 : vector<8x128xf32>
    %241 = arith.mulf %240, %240 : vector<8x128xf32>
    %cst_149 = arith.constant dense<0.000000e+00> : vector<8xf32>
    %242 = vector.multi_reduction <add>, %241, %cst_149 [1] : vector<8x128xf32> to vector<8xf32>
    %243 = vector.shape_cast %242 : vector<8xf32> to vector<8x1xf32>
    %cst_150 = arith.constant 1.280000e+02 : f32
    %244 = vector.broadcast %cst_150 : f32 to vector<8x1xf32>
    %245 = arith.divf %243, %244 : vector<8x1xf32>
    %246 = vector.broadcast %238 : vector<8x1xf32> to vector<8x128xf32>
    %247 = arith.subf %230, %246 : vector<8x128xf32>
    %cst_151 = arith.constant 9.99999997E-7 : f32
    %248 = vector.broadcast %cst_151 : f32 to vector<8x1xf32>
    %249 = arith.addf %245, %248 : vector<8x1xf32>
    %250 = math.rsqrt %249 : vector<8x1xf32>
    %251 = vector.broadcast %250 : vector<8x1xf32> to vector<8x128xf32>
    %252 = arith.mulf %247, %251 : vector<8x128xf32>
    %253 = vector.broadcast %232 : vector<1x128xf32> to vector<8x128xf32>
    %254 = arith.mulf %252, %253 : vector<8x128xf32>
    %255 = vector.broadcast %234 : vector<1x128xf32> to vector<8x128xf32>
    %256 = arith.addf %254, %255 : vector<8x128xf32>
    %c1_152 = arith.constant 1 : index
    %c0_153 = arith.constant 0 : index
    %c0_154 = arith.constant 0 : index
    %257 = vector.load %arg16[%c1_152, %c0_153, %c0_154] : memref<2x128x256xbf16, #tpu.memory_space<vmem>>, vector<1x128x256xbf16>
    %258 = vector.shape_cast %257 : vector<1x128x256xbf16> to vector<128x256xbf16>
    %259 = arith.truncf %256 : vector<8x128xf32> to vector<8x128xbf16>
    %cst_155 = arith.constant dense<0.000000e+00> : vector<8x256xf32>
    %260 = tpu.matmul %259, %258, %cst_155 {dimension_numbers = #tpu.dot_dimension_numbers<[1], [0], [0], [1], [0, 0, 1, 1], [], []>} : vector<8x128xbf16>, vector<128x256xbf16>, vector<8x256xf32> -> vector<8x256xf32>
    %c1_156 = arith.constant 1 : index
    %c0_157 = arith.constant 0 : index
    %c0_158 = arith.constant 0 : index
    %261 = vector.load %arg17[%c1_156, %c0_157, %c0_158] : memref<2x1x256xf32, #tpu.memory_space<vmem>>, vector<1x1x256xf32>
    %262 = vector.shape_cast %261 : vector<1x1x256xf32> to vector<1x256xf32>
    %263 = vector.broadcast %262 : vector<1x256xf32> to vector<8x256xf32>
    %264 = arith.addf %260, %263 : vector<8x256xf32>
    %265 = arith.mulf %264, %264 : vector<8x256xf32>
    %266 = arith.mulf %264, %265 : vector<8x256xf32>
    %cst_159 = arith.constant 4.471500e-02 : f32
    %267 = vector.broadcast %cst_159 : f32 to vector<8x256xf32>
    %268 = arith.mulf %267, %266 : vector<8x256xf32>
    %269 = arith.addf %264, %268 : vector<8x256xf32>
    %cst_160 = arith.constant 0.797884583 : f32
    %270 = vector.broadcast %cst_160 : f32 to vector<8x256xf32>
    %271 = arith.mulf %270, %269 : vector<8x256xf32>
    %272 = math.tanh %271 : vector<8x256xf32>
    %cst_161 = arith.constant 1.000000e+00 : f32
    %273 = vector.broadcast %cst_161 : f32 to vector<8x256xf32>
    %274 = arith.addf %273, %272 : vector<8x256xf32>
    %cst_162 = arith.constant 5.000000e-01 : f32
    %275 = vector.broadcast %cst_162 : f32 to vector<8x256xf32>
    %276 = arith.mulf %275, %274 : vector<8x256xf32>
    %277 = arith.mulf %264, %276 : vector<8x256xf32>
    %c1_163 = arith.constant 1 : index
    %c0_164 = arith.constant 0 : index
    %c0_165 = arith.constant 0 : index
    %278 = vector.load %arg18[%c1_163, %c0_164, %c0_165] : memref<2x256x128xbf16, #tpu.memory_space<vmem>>, vector<1x256x128xbf16>
    %279 = vector.shape_cast %278 : vector<1x256x128xbf16> to vector<256x128xbf16>
    %280 = arith.truncf %277 : vector<8x256xf32> to vector<8x256xbf16>
    %cst_166 = arith.constant dense<0.000000e+00> : vector<8x128xf32>
    %281 = tpu.matmul %280, %279, %cst_166 {dimension_numbers = #tpu.dot_dimension_numbers<[1], [0], [0], [1], [0, 0, 1, 1], [], []>} : vector<8x256xbf16>, vector<256x128xbf16>, vector<8x128xf32> -> vector<8x128xf32>
    %282 = arith.addf %230, %281 : vector<8x128xf32>
    %c1_167 = arith.constant 1 : index
    %c0_168 = arith.constant 0 : index
    %c0_169 = arith.constant 0 : index
    %283 = vector.load %arg19[%c1_167, %c0_168, %c0_169] : memref<2x1x128xf32, #tpu.memory_space<vmem>>, vector<1x1x128xf32>
    %284 = vector.shape_cast %283 : vector<1x1x128xf32> to vector<1x128xf32>
    %285 = vector.broadcast %284 : vector<1x128xf32> to vector<8x128xf32>
    %286 = arith.addf %282, %285 : vector<8x128xf32>
    %c0_170 = arith.constant 0 : index
    %c0_171 = arith.constant 0 : index
    %287 = vector.load %arg20[%c0_170, %c0_171] : memref<1x128xf32, #tpu.memory_space<vmem>>, vector<1x128xf32>
    %c0_172 = arith.constant 0 : index
    %c0_173 = arith.constant 0 : index
    %288 = vector.load %arg21[%c0_172, %c0_173] : memref<1x128xf32, #tpu.memory_space<vmem>>, vector<1x128xf32>
    %cst_174 = arith.constant dense<0.000000e+00> : vector<8xf32>
    %289 = vector.multi_reduction <add>, %286, %cst_174 [1] : vector<8x128xf32> to vector<8xf32>
    %290 = vector.shape_cast %289 : vector<8xf32> to vector<8x1xf32>
    %cst_175 = arith.constant 1.280000e+02 : f32
    %291 = vector.broadcast %cst_175 : f32 to vector<8x1xf32>
    %292 = arith.divf %290, %291 : vector<8x1xf32>
    %293 = vector.broadcast %292 : vector<8x1xf32> to vector<8x128xf32>
    %294 = arith.subf %286, %293 : vector<8x128xf32>
    %295 = arith.mulf %294, %294 : vector<8x128xf32>
    %cst_176 = arith.constant dense<0.000000e+00> : vector<8xf32>
    %296 = vector.multi_reduction <add>, %295, %cst_176 [1] : vector<8x128xf32> to vector<8xf32>
    %297 = vector.shape_cast %296 : vector<8xf32> to vector<8x1xf32>
    %cst_177 = arith.constant 1.280000e+02 : f32
    %298 = vector.broadcast %cst_177 : f32 to vector<8x1xf32>
    %299 = arith.divf %297, %298 : vector<8x1xf32>
    %300 = vector.broadcast %292 : vector<8x1xf32> to vector<8x128xf32>
    %301 = arith.subf %286, %300 : vector<8x128xf32>
    %cst_178 = arith.constant 9.99999997E-7 : f32
    %302 = vector.broadcast %cst_178 : f32 to vector<8x1xf32>
    %303 = arith.addf %299, %302 : vector<8x1xf32>
    %304 = math.rsqrt %303 : vector<8x1xf32>
    %305 = vector.broadcast %304 : vector<8x1xf32> to vector<8x128xf32>
    %306 = arith.mulf %301, %305 : vector<8x128xf32>
    %307 = vector.broadcast %287 : vector<1x128xf32> to vector<8x128xf32>
    %308 = arith.mulf %306, %307 : vector<8x128xf32>
    %309 = vector.broadcast %288 : vector<1x128xf32> to vector<8x128xf32>
    %310 = arith.addf %308, %309 : vector<8x128xf32>
    %c0_179 = arith.constant 0 : index
    %c0_180 = arith.constant 0 : index
    %311 = vector.load %arg22[%c0_179, %c0_180] : memref<128x128xbf16, #tpu.memory_space<vmem>>, vector<128x128xbf16>
    %312 = arith.truncf %310 : vector<8x128xf32> to vector<8x128xbf16>
    %cst_181 = arith.constant dense<0.000000e+00> : vector<8x128xf32>
    %313 = tpu.matmul %312, %311, %cst_181 {dimension_numbers = #tpu.dot_dimension_numbers<[1], [0], [0], [1], [0, 0, 1, 1], [], []>} : vector<8x128xbf16>, vector<128x128xbf16>, vector<8x128xf32> -> vector<8x128xf32>
    %c0_182 = arith.constant 0 : index
    %c0_183 = arith.constant 0 : index
    %314 = vector.load %arg23[%c0_182, %c0_183] : memref<1x128xf32, #tpu.memory_space<vmem>>, vector<1x128xf32>
    %315 = vector.broadcast %314 : vector<1x128xf32> to vector<8x128xf32>
    %316 = arith.addf %313, %315 : vector<8x128xf32>
    %cst_184 = arith.constant 0.000000e+00 : f32
    %317 = vector.broadcast %cst_184 : f32 to vector<8x128xf32>
    %318 = arith.maximumf %316, %317 : vector<8x128xf32>
    %c0_185 = arith.constant 0 : index
    %c0_186 = arith.constant 0 : index
    %319 = vector.load %arg24[%c0_185, %c0_186] : memref<128x128xbf16, #tpu.memory_space<vmem>>, vector<128x128xbf16>
    %320 = arith.truncf %318 : vector<8x128xf32> to vector<8x128xbf16>
    %cst_187 = arith.constant dense<0.000000e+00> : vector<8x128xf32>
    %321 = tpu.matmul %320, %319, %cst_187 {dimension_numbers = #tpu.dot_dimension_numbers<[1], [0], [0], [1], [0, 0, 1, 1], [], []>} : vector<8x128xbf16>, vector<128x128xbf16>, vector<8x128xf32> -> vector<8x128xf32>
    %c0_188 = arith.constant 0 : index
    %c0_189 = arith.constant 0 : index
    %322 = vector.load %arg25[%c0_188, %c0_189] : memref<1x128xf32, #tpu.memory_space<vmem>>, vector<1x128xf32>
    %323 = vector.broadcast %322 : vector<1x128xf32> to vector<8x128xf32>
    %324 = arith.addf %321, %323 : vector<8x128xf32>
    %c0_190 = arith.constant 0 : index
    %c0_191 = arith.constant 0 : index
    %c0_192 = arith.constant 0 : index
    %325 = vector.load %arg26[%c0_190, %c0_191, %c0_192] : memref<1x8x128xf32, #tpu.memory_space<vmem>>, vector<1x8x128xf32>
    %326 = vector.shape_cast %325 : vector<1x8x128xf32> to vector<8x128xf32>
    %327 = vector.shape_cast %324 : vector<8x128xf32> to vector<1x8x128xf32>
    tpu.vector_store %arg26[%c0_190, %c0_191, %c0_192], %327 {strides = array<i32>} : memref<1x8x128xf32, #tpu.memory_space<vmem>>, vector<1x8x128xf32>,
    return
  }
  func.func @transform_0(%arg0: i32) -> (i32, i32, i32) {
    %c0_i32 = arith.constant 0 : i32
    %c0_i32_0 = arith.constant 0 : i32
    %c0_i32_1 = arith.constant 0 : i32
    return %arg0, %c0_i32, %c0_i32_0 : i32, i32, i32
  }
  func.func @transform_1(%arg0: i32) -> (i32, i32, i32) {
    %c0_i32 = arith.constant 0 : i32
    %c0_i32_0 = arith.constant 0 : i32
    %c0_i32_1 = arith.constant 0 : i32
    return %arg0, %c0_i32, %c0_i32_0 : i32, i32, i32
  }
  func.func @transform_2(%arg0: i32) -> (i32, i32) {
    %c0_i32 = arith.constant 0 : i32
    %c0_i32_0 = arith.constant 0 : i32
    %c0_i32_1 = arith.constant 0 : i32
    return %c0_i32, %c0_i32_0 : i32, i32
  }
  func.func @transform_3(%arg0: i32) -> (i32, i32, i32) {
    %c0_i32 = arith.constant 0 : i32
    %c0_i32_0 = arith.constant 0 : i32
    %c0_i32_1 = arith.constant 0 : i32
    %c0_i32_2 = arith.constant 0 : i32
    return %c0_i32, %c0_i32_0, %c0_i32_1 : i32, i32, i32
  }
  func.func @transform_4(%arg0: i32) -> (i32, i32, i32) {
    %c0_i32 = arith.constant 0 : i32
    %c0_i32_0 = arith.constant 0 : i32
    %c0_i32_1 = arith.constant 0 : i32
    %c0_i32_2 = arith.constant 0 : i32
    return %c0_i32, %c0_i32_0, %c0_i32_1 : i32, i32, i32
  }
  func.func @transform_5(%arg0: i32) -> (i32, i32, i32, i32) {
    %c0_i32 = arith.constant 0 : i32
    %c0_i32_0 = arith.constant 0 : i32
    %c0_i32_1 = arith.constant 0 : i32
    %c0_i32_2 = arith.constant 0 : i32
    %c0_i32_3 = arith.constant 0 : i32
    return %c0_i32, %c0_i32_0, %c0_i32_1, %c0_i32_2 : i32, i32, i32, i32
  }
  func.func @transform_6(%arg0: i32) -> (i32, i32, i32, i32) {
    %c0_i32 = arith.constant 0 : i32
    %c0_i32_0 = arith.constant 0 : i32
    %c0_i32_1 = arith.constant 0 : i32
    %c0_i32_2 = arith.constant 0 : i32
    %c0_i32_3 = arith.constant 0 : i32
    return %c0_i32, %c0_i32_0, %c0_i32_1, %c0_i32_2 : i32, i32, i32, i32
  }
  func.func @transform_7(%arg0: i32) -> (i32, i32, i32, i32) {
    %c0_i32 = arith.constant 0 : i32
    %c0_i32_0 = arith.constant 0 : i32
    %c0_i32_1 = arith.constant 0 : i32
    %c0_i32_2 = arith.constant 0 : i32
    %c0_i32_3 = arith.constant 0 : i32
    return %c0_i32, %c0_i32_0, %c0_i32_1, %c0_i32_2 : i32, i32, i32, i32
  }
  func.func @transform_8(%arg0: i32) -> (i32, i32, i32, i32) {
    %c0_i32 = arith.constant 0 : i32
    %c0_i32_0 = arith.constant 0 : i32
    %c0_i32_1 = arith.constant 0 : i32
    %c0_i32_2 = arith.constant 0 : i32
    %c0_i32_3 = arith.constant 0 : i32
    return %c0_i32, %c0_i32_0, %c0_i32_1, %c0_i32_2 : i32, i32, i32, i32
  }
  func.func @transform_9(%arg0: i32) -> (i32, i32, i32, i32) {
    %c0_i32 = arith.constant 0 : i32
    %c0_i32_0 = arith.constant 0 : i32
    %c0_i32_1 = arith.constant 0 : i32
    %c0_i32_2 = arith.constant 0 : i32
    %c0_i32_3 = arith.constant 0 : i32
    return %c0_i32, %c0_i32_0, %c0_i32_1, %c0_i32_2 : i32, i32, i32, i32
  }
  func.func @transform_10(%arg0: i32) -> (i32, i32, i32, i32) {
    %c0_i32 = arith.constant 0 : i32
    %c0_i32_0 = arith.constant 0 : i32
    %c0_i32_1 = arith.constant 0 : i32
    %c0_i32_2 = arith.constant 0 : i32
    %c0_i32_3 = arith.constant 0 : i32
    return %c0_i32, %c0_i32_0, %c0_i32_1, %c0_i32_2 : i32, i32, i32, i32
  }
  func.func @transform_11(%arg0: i32) -> (i32, i32, i32, i32) {
    %c0_i32 = arith.constant 0 : i32
    %c0_i32_0 = arith.constant 0 : i32
    %c0_i32_1 = arith.constant 0 : i32
    %c0_i32_2 = arith.constant 0 : i32
    %c0_i32_3 = arith.constant 0 : i32
    return %c0_i32, %c0_i32_0, %c0_i32_1, %c0_i32_2 : i32, i32, i32, i32
  }
  func.func @transform_12(%arg0: i32) -> (i32, i32, i32) {
    %c0_i32 = arith.constant 0 : i32
    %c0_i32_0 = arith.constant 0 : i32
    %c0_i32_1 = arith.constant 0 : i32
    %c0_i32_2 = arith.constant 0 : i32
    return %c0_i32, %c0_i32_0, %c0_i32_1 : i32, i32, i32
  }
  func.func @transform_13(%arg0: i32) -> (i32, i32, i32) {
    %c0_i32 = arith.constant 0 : i32
    %c0_i32_0 = arith.constant 0 : i32
    %c0_i32_1 = arith.constant 0 : i32
    %c0_i32_2 = arith.constant 0 : i32
    return %c0_i32, %c0_i32_0, %c0_i32_1 : i32, i32, i32
  }
  func.func @transform_14(%arg0: i32) -> (i32, i32, i32) {
    %c0_i32 = arith.constant 0 : i32
    %c0_i32_0 = arith.constant 0 : i32
    %c0_i32_1 = arith.constant 0 : i32
    %c0_i32_2 = arith.constant 0 : i32
    return %c0_i32, %c0_i32_0, %c0_i32_1 : i32, i32, i32
  }
  func.func @transform_15(%arg0: i32) -> (i32, i32, i32) {
    %c0_i32 = arith.constant 0 : i32
    %c0_i32_0 = arith.constant 0 : i32
    %c0_i32_1 = arith.constant 0 : i32
    %c0_i32_2 = arith.constant 0 : i32
    return %c0_i32, %c0_i32_0, %c0_i32_1 : i32, i32, i32
  }
  func.func @transform_16(%arg0: i32) -> (i32, i32, i32) {
    %c0_i32 = arith.constant 0 : i32
    %c0_i32_0 = arith.constant 0 : i32
    %c0_i32_1 = arith.constant 0 : i32
    %c0_i32_2 = arith.constant 0 : i32
    return %c0_i32, %c0_i32_0, %c0_i32_1 : i32, i32, i32
  }
  func.func @transform_17(%arg0: i32) -> (i32, i32, i32) {
    %c0_i32 = arith.constant 0 : i32
    %c0_i32_0 = arith.constant 0 : i32
    %c0_i32_1 = arith.constant 0 : i32
    %c0_i32_2 = arith.constant 0 : i32
    return %c0_i32, %c0_i32_0, %c0_i32_1 : i32, i32, i32
  }
  func.func @transform_18(%arg0: i32) -> (i32, i32, i32) {
    %c0_i32 = arith.constant 0 : i32
    %c0_i32_0 = arith.constant 0 : i32
    %c0_i32_1 = arith.constant 0 : i32
    %c0_i32_2 = arith.constant 0 : i32
    return %c0_i32, %c0_i32_0, %c0_i32_1 : i32, i32, i32
  }
  func.func @transform_19(%arg0: i32) -> (i32, i32) {
    %c0_i32 = arith.constant 0 : i32
    %c0_i32_0 = arith.constant 0 : i32
    %c0_i32_1 = arith.constant 0 : i32
    return %c0_i32, %c0_i32_0 : i32, i32
  }
  func.func @transform_20(%arg0: i32) -> (i32, i32) {
    %c0_i32 = arith.constant 0 : i32
    %c0_i32_0 = arith.constant 0 : i32
    %c0_i32_1 = arith.constant 0 : i32
    return %c0_i32, %c0_i32_0 : i32, i32
  }
  func.func @transform_21(%arg0: i32) -> (i32, i32) {
    %c0_i32 = arith.constant 0 : i32
    %c0_i32_0 = arith.constant 0 : i32
    %c0_i32_1 = arith.constant 0 : i32
    return %c0_i32, %c0_i32_0 : i32, i32
  }
  func.func @transform_22(%arg0: i32) -> (i32, i32) {
    %c0_i32 = arith.constant 0 : i32
    %c0_i32_0 = arith.constant 0 : i32
    %c0_i32_1 = arith.constant 0 : i32
    return %c0_i32, %c0_i32_0 : i32, i32
  }
  func.func @transform_23(%arg0: i32) -> (i32, i32) {
    %c0_i32 = arith.constant 0 : i32
    %c0_i32_0 = arith.constant 0 : i32
    %c0_i32_1 = arith.constant 0 : i32
    return %c0_i32, %c0_i32_0 : i32, i32
  }
  func.func @transform_24(%arg0: i32) -> (i32, i32) {
    %c0_i32 = arith.constant 0 : i32
    %c0_i32_0 = arith.constant 0 : i32
    %c0_i32_1 = arith.constant 0 : i32
    return %c0_i32, %c0_i32_0 : i32, i32
  }
  func.func @transform_25(%arg0: i32) -> (i32, i32, i32) {
    %c0_i32 = arith.constant 0 : i32
    %c0_i32_0 = arith.constant 0 : i32
    %c0_i32_1 = arith.constant 0 : i32
    return %arg0, %c0_i32, %c0_i32_0 : i32, i32, i32
  }
}

</mosaic_0001>

<bundles_post_ra>
// kernel: emotion_classifier_vit_forward.1
= control target key start
LH: loop header
LB: loop body
LE: loop exit
PB: predicated region body
PF: predicated region fallthrough
CT: control target
= control target key end

     0   :  { %s8831_s29 = smov 0   ;;  %s10487_s0 = inlined_call_operand.vmem [shape: bf16[2,8,768], index: 0, kind: input, shape index: {}]   ;;  %s10488_s1 = inlined_call_operand.vmem [shape: f32[2,8,128], index: 1, kind: input, shape index: {}]   ;;  %s10489_s2 = inlined_call_operand.vmem [shape: bf16[768,128], index: 2, kind: input, shape index: {}]   ;;  %s10490_s3 = inlined_call_operand.vmem [shape: f32[2,1,128], index: 3, kind: input, shape index: {}]   ;;  %s10491_s4 = inlined_call_operand.vmem [shape: f32[2,1,128], index: 4, kind: input, shape index: {}]   ;;  %s10492_s5 = inlined_call_operand.vmem [shape: bf16[2,4,128,32], index: 5, kind: input, shape index: {}]   ;;  %s10493_s6 = inlined_call_operand.vmem [shape: bf16[2,4,128,32], index: 6, kind: input, shape index: {}]   ;;  %s10494_s7 = inlined_call_operand.vmem [shape: bf16[2,4,128,32], index: 7, kind: input, shape index: {}]   ;;  %s10495_s8 = inlined_call_operand.vmem [shape: f32[2,4,1,32], index: 8, kind: input, shape index: {}]   ;;  %s10496_s9 = inlined_call_operand.vmem [shape: f32[2,4,1,32], index: 9, kind: input, shape index: {}]   ;;  %s10497_s10 = inlined_call_operand.vmem [shape: f32[2,4,1,32], index: 10, kind: input, shape index: {}]   ;;  %s10498_s11 = inlined_call_operand.vmem [shape: bf16[2,4,32,128], index: 11, kind: input, shape index: {}]   ;;  %s10499_s12 = inlined_call_operand.vmem [shape: f32[2,1,128], index: 12, kind: input, shape index: {}]   ;;  %s10500_s13 = inlined_call_operand.vmem [shape: f32[2,1,128], index: 13, kind: input, shape index: {}]   ;;  %s10501_s14 = inlined_call_operand.vmem [shape: f32[2,1,128], index: 14, kind: input, shape index: {}]   ;;  %s10502_s15 = inlined_call_operand.vmem [shape: bf16[2,128,256], index: 15, kind: input, shape index: {}]   ;;  %s10503_s16 = inlined_call_operand.vmem [shape: f32[2,1,256], index: 16, kind: input, shape index: {}]   ;;  %s10504_s17 = inlined_call_operand.vmem [shape: bf16[2,256,128], index: 17, kind: input, shape index: {}]   ;;  %s10505_s18 = inlined_call_operand.vmem [shape: f32[2,1,128], index: 18, kind: input, shape index: {}]   ;;  %s10506_s19 = inlined_call_operand.vmem [shape: f32[1,128], index: 19, kind: input, shape index: {}]   ;;  %s10507_s20 = inlined_call_operand.vmem [shape: f32[1,128], index: 20, kind: input, shape index: {}]   ;;  %s10508_s21 = inlined_call_operand.vmem [shape: bf16[128,128], index: 21, kind: input, shape index: {}]   ;;  %s10509_s22 = inlined_call_operand.vmem [shape: f32[1,128], index: 22, kind: input, shape index: {}]   ;;  %s10510_s23 = inlined_call_operand.vmem [shape: bf16[128,128], index: 23, kind: input, shape index: {}]   ;;  %s10511_s24 = inlined_call_operand.vmem [shape: f32[1,128], index: 24, kind: input, shape index: {}]   ;;  %s10512_s25 = inlined_call_operand.vmem [shape: f32[2,8,128], index: 25, kind: output, shape index: {}]  }
   0x1   :  { %10525 = sst [smem:[#allocation3_spill]] %s10487_s0 }
   0x2   :  { %10526 = sst [smem:[#allocation4_spill]] %s10488_s1 }
   0x3   :  { %10527 = sst [smem:[#allocation5_spill]] %s10489_s2 }
   0x4   :  { %10528 = sst [smem:[#allocation6_spill]] %s10490_s3 }
   0x5   :  { %10529 = sst [smem:[#allocation7_spill]] %s10491_s4 }
   0x6   :  { %10530 = sst [smem:[#allocation8_spill]] %s10492_s5 }
   0x7   :  { %10531 = sst [smem:[#allocation9_spill]] %s10493_s6 }
   0x8   :  { %10532 = sst [smem:[#allocation10_spill]] %s10494_s7 }
   0x9   :  { %10533 = sst [smem:[#allocation11_spill]] %s10495_s8 }
   0xa   :  { %10534 = sst [smem:[#allocation12_spill]] %s10496_s9 }
   0xb   :  { %10535 = sst [smem:[#allocation13_spill]] %s10509_s22 }
   0xc   :  { %10536 = sst [smem:[#allocation14_spill]] %s10511_s24 }
   0xd   :  { %10537 = sst [smem:[#allocation15_spill]] %s10512_s25 }
   0xe LB: > { %10538 = sst [smem:[#allocation2_spill]] %s8695_s29  ;;  %s6497_s2 = sadd.s32 4294967295, %s8695_s29   ;;  %s8695_s29 = sphi %s8831_s29, %s35_s29  }
   0xf   : > { %p6501_p0 = scmp.ge.s32.totalorder %s8695_s29, 1  ;;  %p696_p1 = scmp.lt.s32.totalorder %s8695_s29, 3 }
  0x11   : > { %p697_p2 = pnand %p6501_p0, %p696_p1 }
  0x12   : > { %s10539_s7 = sld [smem:[#allocation5_spill]] (!%p697_p2)  ;;  %p767_p3 = scmp.lt.s32.totalorder (!%p697_p2), %s6497_s2, 1  ;;  %vm8698_vm0 = vmmov (!%p697_p2), 0   ;;  %vm2684_vm1 = vcmask (!%p697_p2), 261120   ;;  %vm2933_vm2 = vcmask (!%p697_p2), 1043456   ;;  %vm2877_vm4 = vcmask (!%p697_p2), 64512  }
  0x13   : > { %700 = sbr.rel (%p697_p2) target bundleno = 5814 (0x16b6), region = 120  ;;  %s10540_s26 = sld [smem:[#allocation3_spill]] (!%p697_p2) }
  0x14   : > { %s10541_s5 = sld [smem:[#allocation4_spill]] (!%p697_p2)  ;;  %s10543_s27 = sld [smem:[#allocation6_spill]] (!%p697_p2) }
  0x15   : > { %s10545_s6 = sld [smem:[#allocation9_spill]] (!%p697_p2)  ;;  %s10548_s9 = sld [smem:[#allocation11_spill]] (!%p697_p2) }
  0x16   : > { %s10550_s29 = sld [smem:[#allocation14_spill]] (!%p697_p2)  ;;  %s10552_s3 = sld [smem:[#allocation15_spill]] (!%p697_p2) }
  0x18   : > { %v8281_v0 = vld [vmem:[%s10539_s7 + $0x40] sm:$0xff] (!%p697_p2)   ;;  %v8285_v4 = vld [vmem:[%s10539_s7 + $0x48] sm:$0xff] (!%p697_p2)   ;;  %v8289_v8 = vld [vmem:[%s10539_s7 + $0x50] sm:$0xff] (!%p697_p2)  }
  0x19   : > { %v8282_v1 = vld [vmem:[%s10539_s7 + $0xc0] sm:$0xff] (!%p697_p2)   ;;  %7188 = vmatprep.subr.bf16.mxu0 (!%p697_p2), %v8281_v0  ;;  %v8286_v5 = vld [vmem:[%s10539_s7 + $0xc8] sm:$0xff] (!%p697_p2)   ;;  %v8290_v9 = vld [vmem:[%s10539_s7 + $0xd0] sm:$0xff] (!%p697_p2)  }
  0x1a   : > { %v8283_v2 = vld [vmem:[%s10539_s7] sm:$0xff]   ;;  %7210 = vmatprep.subr.bf16.mxu1 %v8282_v1  ;;  %v8287_v6 = vld [vmem:[%s10539_s7 + $0x8] sm:$0xff]   ;;  %v8291_v10 = vld [vmem:[%s10539_s7 + $0x10] sm:$0xff]   ;;  %s10555_s2 = smov (!%p767_p3, %s6497_s2), 1 }
  0x1b   : > { %v8284_v3 = vld [vmem:[%s10539_s7 + $0x80] sm:$0xff]   ;;  %7189 = vmatpush3.bf16.msra.mxu0 %v8283_v2  ;;  %v8288_v7 = vld [vmem:[%s10539_s7 + $0x88] sm:$0xff]   ;;  %v8292_v11 = vld [vmem:[%s10539_s7 + $0x90] sm:$0xff]   ;;  %s8268_s1 = smul.u32 24, %s10555_s2  ;;  %s10521_s28 = sshll.u32 %s10555_s2, 3 }
  0x1c   : > { %7211 = vmatpush3.bf16.msra.mxu1 %v8284_v3  ;;  %7190 = vmatprep.subr.bf16.mxu0 %v8285_v4  ;;  %v8293_v12 = vld [vmem:[%s10539_s7 + $0x58] sm:$0xff]   ;;  %v8297_v16 = vld [vmem:[%s10539_s7 + $0x60] sm:$0xff]   ;;  %v8301_v20 = vld [vmem:[%s10539_s7 + $0x68] sm:$0xff]   ;;  %s775_s0 = scalar_lea.vmem %s10541_s5, %s10521_s28  ;;  %s10547_s5 = sld [smem:[#allocation12_spill]] }
  0x1d   : > { %7212 = vmatprep.subr.bf16.mxu1 %v8286_v5  ;;  %v8294_v13 = vld [vmem:[%s10539_s7 + $0xd8] sm:$0xff]   ;;  %v8298_v17 = vld [vmem:[%s10539_s7 + $0xe0] sm:$0xff]   ;;  %v8302_v21 = vld [vmem:[%s10539_s7 + $0xe8] sm:$0xff]   ;;  %s8939_s8 = scalar_lea.vmem %s10540_s26, %s8268_s1  ;;  %s10544_s1 = sld [smem:[#allocation7_spill]] }
  0x1e   : > { %v8295_v14 = vld [vmem:[%s10539_s7 + $0x18] sm:$0xff]   ;;  %v8299_v18 = vld [vmem:[%s10539_s7 + $0x20] sm:$0xff]   ;;  %v8303_v22 = vld [vmem:[%s10539_s7 + $0x28] sm:$0xff]   ;;  %s10551_s30 = sshll.u32 %s10555_s2, 3 }
  0x1f   : > { %7191 = vmatpush3.bf16.msra.mxu0 %v8287_v6  ;;  %v8296_v15 = vld [vmem:[%s10539_s7 + $0x98] sm:$0xff]   ;;  %v8300_v19 = vld [vmem:[%s10539_s7 + $0xa0] sm:$0xff]   ;;  %v8304_v23 = vld [vmem:[%s10539_s7 + $0xa8] sm:$0xff]  }
  0x20   : > { %7213 = vmatpush3.bf16.msra.mxu1 %v8288_v7  ;;  %7192 = vmatprep.subr.bf16.mxu0 %v8289_v8  ;;  %v8305_v24 = vld [vmem:[%s10539_s7 + $0x70] sm:$0xff]   ;;  %v8309_v28 = vld [vmem:[%s10539_s7 + $0x78] sm:$0xff]   ;;  %v786_v32 = vld [vmem:[%s8939_s8] sm:$0xff] }
  0x21   : > { %7214 = vmatprep.subr.bf16.mxu1 %v8290_v9  ;;  %v8306_v25 = vld [vmem:[%s10539_s7 + $0xf0] sm:$0xff]   ;;  %v8310_v29 = vld [vmem:[%s10539_s7 + $0xf8] sm:$0xff]   ;;  %v787_v33 = vld [vmem:[%s8939_s8 + $0x8] sm:$0xff]  ;;  %v6505_v34 = vcombine.low %v786_v32, %v786_v32  ;;  %v6506_v35 = vcombine.high %v786_v32, %v786_v32 }
  0x22   : > { %v8307_v26 = vld [vmem:[%s10539_s7 + $0x30] sm:$0xff]   ;;  %v8311_v30 = vld [vmem:[%s10539_s7 + $0x38] sm:$0xff]   ;;  %v6507_v36 = vcombine.low %v787_v33, %v787_v33  ;;  %v6508_v37 = vcombine.high %v787_v33, %v787_v33  ;;  %v8317_v38 = vld [vmem:[%s10539_s7 + $0x140] sm:$0xff]  }
  0x23   : > { %7193 = vmatpush3.bf16.msra.mxu0 %v8291_v10  ;;  %v8308_v27 = vld [vmem:[%s10539_s7 + $0xb0] sm:$0xff]   ;;  %v8312_v31 = vld [vmem:[%s10539_s7 + $0xb8] sm:$0xff]   ;;  %v8318_v39 = vld [vmem:[%s10539_s7 + $0x100] sm:$0xff]   ;;  %1226 = vmatprep.mubr.bf16.mxu0 %v6506_v35 }
  0x24   : > { %7215 = vmatpush3.bf16.msra.mxu1 %v8292_v11  ;;  %7194 = vmatprep.subr.bf16.mxu0 %v8293_v12  ;;  %v8319_v40 = vld [vmem:[%s10539_s7 + $0x148] sm:$0xff]   ;;  %v8321_v42 = vld [vmem:[%s10539_s7 + $0x150] sm:$0xff]   ;;  %v8323_v44 = vld [vmem:[%s10539_s7 + $0x158] sm:$0xff]  }
  0x25   : > { %7216 = vmatprep.subr.bf16.mxu1 %v8294_v13  ;;  %1266 = vmatprep.mubr.bf16.mxu1 %v6508_v37  ;;  %v8320_v41 = vld [vmem:[%s10539_s7 + $0x108] sm:$0xff]   ;;  %v8322_v43 = vld [vmem:[%s10539_s7 + $0x110] sm:$0xff]   ;;  %v8324_v45 = vld [vmem:[%s10539_s7 + $0x118] sm:$0xff]  }
  0x26   : > { %v8325_v46 = vld [vmem:[%s10539_s7 + $0x160] sm:$0xff]   ;;  %v788_v48 = vld [vmem:[%s8939_s8 + $0x10] sm:$0xff]  ;;  %v8327_v49 = vld [vmem:[%s10539_s7 + $0x168] sm:$0xff]   ;;  %s10542_s8 = sld [smem:[#allocation8_spill]] }
  0x27   : > { %7195 = vmatpush3.bf16.msra.mxu0 %v8295_v14  ;;  %v8326_v47 = vld [vmem:[%s10539_s7 + $0x120] sm:$0xff]   ;;  %v6510_v50 = vcombine.high %v788_v48, %v788_v48  ;;  %v8328_v51 = vld [vmem:[%s10539_s7 + $0x128] sm:$0xff]   ;;  %v8329_v52 = vld [vmem:[%s10539_s7 + $0x170] sm:$0xff]   ;;  %v6509_v56 = vcombine.low %v788_v48, %v788_v48  ;;  %v8697_v14 = vmov 0.0  }
  0x28   : > { %7217 = vmatpush3.bf16.msra.mxu1 %v8296_v15  ;;  %7196 = vmatprep.subr.bf16.mxu0 %v8297_v16  ;;  %v8330_v53 = vld [vmem:[%s10539_s7 + $0x130] sm:$0xff]   ;;  %v8331_v54 = vld [vmem:[%s10539_s7 + $0x178] sm:$0xff]   ;;  %v785_v9 = vld [vmem:[%s775_s0] sm:$0xff]  ;;  %s10546_s0 = sld [smem:[#allocation10_spill]] }
  0x29   : > { %7218 = vmatprep.subr.bf16.mxu1 %v8298_v17  ;;  %v8332_v55 = vld [vmem:[%s10539_s7 + $0x138] sm:$0xff]   ;;  %v6559_v37 = vld [vmem:[%s10543_s27] ss:$0 sm:$0xff]  ;;  %s10549_s7 = sld [smem:[#allocation13_spill]] }
  0x2b   : > { %7197 = vmatpush3.bf16.msra.mxu0 %v8299_v18 }
  0x2c   : > { %7219 = vmatpush3.bf16.msra.mxu1 %v8300_v19  ;;  %7198 = vmatprep.subr.bf16.mxu0 %v8301_v20  ;;  %v8335_v12 = vld [vmem:[%s10542_s8] sm:$0xff]   ;;  %v8337_v15 = vld [vmem:[%s10542_s8 + $0x8] sm:$0xff]   ;;  %v8339_v17 = vld [vmem:[%s10542_s8 + $0x10] sm:$0xff]  }
  0x2d   : > { %7220 = vmatprep.subr.bf16.mxu1 %v8302_v21  ;;  %v8336_v13 = vld [vmem:[%s10542_s8 + $0x40] sm:$0xff]   ;;  %v8338_v16 = vld [vmem:[%s10542_s8 + $0x48] sm:$0xff]   ;;  %v8340_v18 = vld [vmem:[%s10542_s8 + $0x50] sm:$0xff]  }
  0x2e   : > { %v8350_v32 = vld [vmem:[%s10542_s8 + $0x78] sm:$0xff]   ;;  %v8356_v48 = vld [vmem:[%s10542_s8 + $0xd0] sm:$0xff]  }
  0x2f   : > { %7199 = vmatpush3.bf16.msra.mxu0 %v8303_v22 }
  0x30   : > { %7221 = vmatpush3.bf16.msra.mxu1 %v8304_v23  ;;  %7200 = vmatprep.subr.bf16.mxu0 %v8305_v24  ;;  %v8341_v23 = vld [vmem:[%s10542_s8 + $0x18] sm:$0xff]  }
  0x31   : > { %7222 = vmatprep.subr.bf16.mxu1 %v8306_v25  ;;  %v8342_v24 = vld [vmem:[%s10542_s8 + $0x58] sm:$0xff]   ;;  %v8343_v25 = vld [vmem:[%s10542_s8 + $0x20] sm:$0xff]  }
  0x33   : > { %7201 = vmatpush3.bf16.msra.mxu0 %v8307_v26  ;;  %v8344_v26 = vld [vmem:[%s10542_s8 + $0x60] sm:$0xff]  }
  0x34   : > { %7223 = vmatpush3.bf16.msra.mxu1 %v8308_v27  ;;  %7202 = vmatprep.subr.bf16.mxu0 %v8309_v28  ;;  %v8345_v27 = vld [vmem:[%s10542_s8 + $0x28] sm:$0xff]  }
  0x35   : > { %7224 = vmatprep.subr.bf16.mxu1 %v8310_v29  ;;  %v8346_v28 = vld [vmem:[%s10542_s8 + $0x68] sm:$0xff]   ;;  %v8347_v29 = vld [vmem:[%s10542_s8 + $0x30] sm:$0xff]  }
  0x37   : > { %7203 = vmatpush3.bf16.msra.mxu0 %v8311_v30  ;;  %v8348_v30 = vld [vmem:[%s10542_s8 + $0x70] sm:$0xff]  }
  0x38   : > { %7225 = vmatpush3.bf16.msra.mxu1 %v8312_v31  ;;  %7232 = vmatprep.subr.bf16.mxu0 %v8317_v38  ;;  %v8349_v31 = vld [vmem:[%s10542_s8 + $0x38] sm:$0xff]  }
  0x39   : > { %7588 = vmatprep.subr.bf16.mxu1 %v8697_v14 }
  0x3a   : > { %1227 = vmatmul.mubr.bf16.vlgmr.msra.gmra.mrb[0].mxu0 %v6505_v34 }
  0x3b   : > { %1267 = vmatmul.mubr.bf16.vlgmr.msra.gmra.mrb[0].mxu1 %v6507_v36  ;;  %7233 = vmatpush3.bf16.msra.mxu0 %v8318_v39  ;;  %v6560_v39 = vld [vmem:[%s10544_s1] ss:$0 sm:$0xff] }
  0x3c   : > { %7234 = vmatprep.subr.bf16.mxu0 %v8319_v40  ;;  %1306 = vmatprep.mubr.bf16.mxu0 %v6510_v50  ;;  %v8358_v50 = vld [vmem:[%s10542_s8 + $0xd8] sm:$0xff]  }
  0x3d   : > { %7589 = vmatpush3.bf16.msra.mxu1 %v8335_v12  ;;  %7604 = vmatprep.mubr.msk.bf16.mxu1 %vm8698_vm0, %v8697_v14  ;;  %v8383_v12 = vld [vmem:[%s10545_s6 + $0x80] sm:$0xff]  }
  0x3e   : > { %7590 = vmatprep.subr.bf16.mxu1 %v8697_v14 }
  0x3f   : > { %7235 = vmatpush3.bf16.msra.mxu0 %v8320_v41 }
  0x40   : > { %7236 = vmatprep.subr.bf16.mxu0 %v8321_v42  ;;  %v8351_v42 = vld [vmem:[%s10542_s8 + $0x80] sm:$0xff]  }
  0x41   : > { %7591 = vmatpush3.bf16.msra.mxu1 %v8337_v15  ;;  %v8385_v15 = vld [vmem:[%s10545_s6 + $0x88] sm:$0xff]  }
  0x42   : > { %7592 = vmatprep.subr.bf16.mxu1 %v8697_v14 }
  0x43   : > { %7237 = vmatpush3.bf16.msra.mxu0 %v8322_v43  ;;  %v8352_v43 = vld [vmem:[%s10542_s8 + $0xc0] sm:$0xff]  }
  0x44   : > { %7238 = vmatprep.subr.bf16.mxu0 %v8323_v44 }
  0x45   : > { %7593 = vmatpush3.bf16.msra.mxu1 %v8339_v17  ;;  %v8387_v17 = vld [vmem:[%s10545_s6 + $0x90] sm:$0xff]  }
  0x46   : > { %7594 = vmatprep.subr.bf16.mxu1 %v8697_v14 }
  0x47   : > { %7239 = vmatpush3.bf16.msra.mxu0 %v8324_v45  ;;  %v8353_v45 = vld [vmem:[%s10542_s8 + $0x88] sm:$0xff]  }
  0x48   : > { %7240 = vmatprep.subr.bf16.mxu0 %v8325_v46  ;;  %v8354_v46 = vld [vmem:[%s10542_s8 + $0xc8] sm:$0xff]  }
  0x49   : > { %7595 = vmatpush3.bf16.msra.mxu1 %v8341_v23  ;;  %v8393_v23 = vld [vmem:[%s10545_s6 + $0xa8] sm:$0xff]  }
  0x4a   : > { %7596 = vmatprep.subr.bf16.mxu1 %v8697_v14 }
  0x4b   : > { %7241 = vmatpush3.bf16.msra.mxu0 %v8326_v47  ;;  %v8355_v47 = vld [vmem:[%s10542_s8 + $0x90] sm:$0xff]  }
  0x4c   : > { %7242 = vmatprep.subr.bf16.mxu0 %v8327_v49  ;;  %v8357_v49 = vld [vmem:[%s10542_s8 + $0x98] sm:$0xff]  }
  0x4d   : > { %7597 = vmatpush3.bf16.msra.mxu1 %v8343_v25  ;;  %v8395_v25 = vld [vmem:[%s10545_s6 + $0xb0] sm:$0xff]  }
  0x4e   : > { %7598 = vmatprep.subr.bf16.mxu1 %v8697_v14 }
  0x4f   : > { %7243 = vmatpush3.bf16.msra.mxu0 %v8328_v51  ;;  %v8359_v51 = vld [vmem:[%s10542_s8 + $0xa0] sm:$0xff]  }
  0x50   : > { %7244 = vmatprep.subr.bf16.mxu0 %v8329_v52  ;;  %v8360_v52 = vld [vmem:[%s10542_s8 + $0xe0] sm:$0xff]  }
  0x51   : > { %7599 = vmatpush3.bf16.msra.mxu1 %v8345_v27  ;;  %v8397_v27 = vld [vmem:[%s10545_s6 + $0xb8] sm:$0xff]  }
  0x52   : > { %7600 = vmatprep.subr.bf16.mxu1 %v8697_v14 }
  0x53   : > { %7245 = vmatpush3.bf16.msra.mxu0 %v8330_v53  ;;  %v8361_v53 = vld [vmem:[%s10542_s8 + $0xa8] sm:$0xff]  }
  0x54   : > { %7246 = vmatprep.subr.bf16.mxu0 %v8331_v54  ;;  %v8362_v54 = vld [vmem:[%s10542_s8 + $0xe8] sm:$0xff]  }
  0x55   : > { %7601 = vmatpush3.bf16.msra.mxu1 %v8347_v29  ;;  %v8399_v29 = vld [vmem:[%s10546_s0] sm:$0xff]  }
  0x56   : > { %7602 = vmatprep.subr.bf16.mxu1 %v8697_v14 }
  0x57   : > { %7247 = vmatpush3.bf16.msra.mxu0 %v8332_v55  ;;  %v8363_v55 = vld [vmem:[%s10542_s8 + $0xb0] sm:$0xff]  }
  0x58   : > { %7608 = vmatprep.subr.bf16.mxu0 %v8697_v14 }
  0x59   : > { %7603 = vmatpush3.bf16.msra.mxu1 %v8349_v31  ;;  %v8401_v31 = vld [vmem:[%s10546_s0 + $0x8] sm:$0xff]  }
  0x5a   : > { %1307 = vmatmul.mubr.bf16.vlgmr.msra.gmra.mrb[4].mxu0 %v6509_v56  ;;  %7628 = vmatprep.subr.bf16.mxu1 %v8697_v14  ;;  %v8364_v56 = vld [vmem:[%s10542_s8 + $0xf0] sm:$0xff]  }
  0x5b   : > { %7609 = vmatpush3.bf16.msra.mxu0 %v8336_v13  ;;  %7624 = vmatprep.mubr.msk.bf16.mxu0 %vm8698_vm0, %v8697_v14  ;;  %v8384_v13 = vld [vmem:[%s10545_s6 + $0xc0] sm:$0xff]  }
  0x5c   : > { %7610 = vmatprep.subr.bf16.mxu0 %v8697_v14 }
  0x5f   : > { %7611 = vmatpush3.bf16.msra.mxu0 %v8338_v16  ;;  %v8386_v16 = vld [vmem:[%s10545_s6 + $0xc8] sm:$0xff]  }
  0x60   : > { %7612 = vmatprep.subr.bf16.mxu0 %v8697_v14 }
  0x63   : > { %7613 = vmatpush3.bf16.msra.mxu0 %v8340_v18  ;;  %v8388_v18 = vld [vmem:[%s10545_s6 + $0xd0] sm:$0xff]  }
  0x64   : > { %7614 = vmatprep.subr.bf16.mxu0 %v8697_v14 }
  0x67   : > { %7615 = vmatpush3.bf16.msra.mxu0 %v8342_v24  ;;  %v8394_v24 = vld [vmem:[%s10545_s6 + $0xe8] sm:$0xff]  }
  0x68   : > { %7616 = vmatprep.subr.bf16.mxu0 %v8697_v14 }
  0x6b   : > { %7617 = vmatpush3.bf16.msra.mxu0 %v8344_v26  ;;  %v8396_v26 = vld [vmem:[%s10545_s6 + $0xf0] sm:$0xff]  }
  0x6c   : > { %7618 = vmatprep.subr.bf16.mxu0 %v8697_v14 }
  0x6f   : > { %7619 = vmatpush3.bf16.msra.mxu0 %v8346_v28  ;;  %v8398_v28 = vld [vmem:[%s10545_s6 + $0xf8] sm:$0xff]  }
  0x70   : > { %7620 = vmatprep.subr.bf16.mxu0 %v8697_v14 }
  0x73   : > { %7621 = vmatpush3.bf16.msra.mxu0 %v8348_v30  ;;  %v8400_v30 = vld [vmem:[%s10546_s0 + $0x40] sm:$0xff]  }
  0x74   : > { %7622 = vmatprep.subr.bf16.mxu0 %v8697_v14 }
  0x77   : > { %7623 = vmatpush3.bf16.msra.mxu0 %v8350_v32  ;;  %v8402_v32 = vld [vmem:[%s10546_s0 + $0x48] sm:$0xff]  }
  0x78   : > { %7648 = vmatprep.subr.bf16.mxu0 %v8697_v14 }
 0x10d   : > { %v7204_v57 = vpop.f32.mrb[0].mxu0 }
 0x10e   : > { %v7226_v58 = vpop.f32.mrb[0].mxu1  ;;  %v7205_v59 = vpop.f32.mrb[1].mxu0 }
 0x10f   : > { %v7227_v60 = vpop.f32.mrb[1].mxu1  ;;  %v7206_v61 = vadd.f32 %v7205_v59, %v7204_v57  ;;  %v7207_v63 = vpop.f32.mrb[2].mxu0  ;;  %v8365_v57 = vld [vmem:[%s10542_s8 + $0xb8] sm:$0xff]   ;;  %v8367_v59 = vld [vmem:[%s10545_s6] sm:$0xff]  }
 0x110   : > { %v7228_v62 = vadd.f32 %v7227_v60, %v7226_v58  ;;  %v7229_v0 = vpop.f32.mrb[2].mxu1  ;;  %v7208_v1 = vpop.f32.mrb[3].mxu0  ;;  %v8366_v58 = vld [vmem:[%s10542_s8 + $0xf8] sm:$0xff]   ;;  %v8368_v60 = vld [vmem:[%s10545_s6 + $0x40] sm:$0xff]   ;;  %v8371_v63 = vld [vmem:[%s10545_s6 + $0x10] sm:$0xff]  }
 0x111   : > { %v7230_v2 = vpop.f32.mrb[3].mxu1  ;;  %v8372_v0 = vld [vmem:[%s10545_s6 + $0x50] sm:$0xff]   ;;  %v8373_v1 = vld [vmem:[%s10545_s6 + $0x18] sm:$0xff]  }
 0x112   : > { %v1269_v3 = vadd.f32 %v7228_v62, %v7206_v61  ;;  %v8369_v61 = vld [vmem:[%s10545_s6 + $0x8] sm:$0xff]   ;;  %v8374_v2 = vld [vmem:[%s10545_s6 + $0x58] sm:$0xff]  }
 0x113   : > { %v8370_v62 = vld [vmem:[%s10545_s6 + $0x48] sm:$0xff]  }
 0x12d   : > { %v7248_v4 = vpop.f32.mrb[4].mxu0 }
 0x12e   : > { %v7249_v5 = vpop.f32.mrb[5].mxu0 }
 0x12f   : > { %v7250_v6 = vadd.f32 %v7249_v5, %v7248_v4  ;;  %v7251_v7 = vpop.f32.mrb[6].mxu0  ;;  %v8376_v4 = vld [vmem:[%s10545_s6 + $0x60] sm:$0xff]   ;;  %v8377_v5 = vld [vmem:[%s10545_s6 + $0x28] sm:$0xff]  }
 0x130   : > { %v7252_v8 = vpop.f32.mrb[7].mxu0  ;;  %v8379_v7 = vld [vmem:[%s10545_s6 + $0x30] sm:$0xff]  }
 0x131   : > { %v1309_v10 = vadd.f32 %v7250_v6, %v1269_v3  ;;  %v8375_v3 = vld [vmem:[%s10545_s6 + $0x20] sm:$0xff]   ;;  %v8378_v6 = vld [vmem:[%s10545_s6 + $0x68] sm:$0xff]   ;;  %v8380_v8 = vld [vmem:[%s10545_s6 + $0x70] sm:$0xff]  }
 0x133   : > { %v9004_v11 = vadd.f32 %v1309_v10, %v785_v9  ;;  %v8381_v9 = vld [vmem:[%s10545_s6 + $0x38] sm:$0xff]  }
 0x134   : > { %v8382_v10 = vld [vmem:[%s10545_s6 + $0x78] sm:$0xff]  }
 0x135   : > { %1317 = vadd.xlane.f32.xlu0 %v9004_v11 }
 0x1c2   : > { %v1318_v19 = vpop.xlane.xlu0 %1317 }
 0x1c3   : > { %v1320_v20 = vmul.f32 0.0078125, %v1318_v19  ;;  %v8389_v19 = vld [vmem:[%s10545_s6 + $0x98] sm:$0xff]  }
 0x1c5   : > { %v1321_v21 = vsub.f32 %v9004_v11, %v1320_v20  ;;  %v8390_v20 = vld [vmem:[%s10545_s6 + $0xd8] sm:$0xff]  }
 0x1c7   : > { %v1322_v22 = vmul.f32 %v1321_v21, %v1321_v21 }
 0x1c9   : > { %1323 = vadd.xlane.f32.xlu0 %v1322_v22  ;;  %v8392_v22 = vld [vmem:[%s10545_s6 + $0xe0] sm:$0xff]  }
 0x256   : > { %v1324_v33 = vpop.xlane.xlu0 %1323 }
 0x257   : > { %v1325_v34 = vmul.f32 0.0078125, %v1324_v33  ;;  %v8403_v33 = vld [vmem:[%s10546_s0 + $0x10] sm:$0xff]  }
 0x259   : > { %v1326_v35 = vadd.f32 1e-06, %v1325_v34  ;;  %v8404_v34 = vld [vmem:[%s10546_s0 + $0x50] sm:$0xff]  }
 0x25b   : > { %8639 = vrsqrt.f32 %v1326_v35  ;;  %v8405_v35 = vld [vmem:[%s10546_s0 + $0x18] sm:$0xff]  }
 0x265   : > { %v8640_v36 = vpop.eup %8639 }
 0x266   : > { %v1328_v38 = vmul.f32 %v8640_v36, %v1321_v21  ;;  %v8391_v21 = vld [vmem:[%s10545_s6 + $0xa0] sm:$0xff]   ;;  %v8406_v36 = vld [vmem:[%s10546_s0 + $0x58] sm:$0xff]  }
 0x268   : > { %v1335_v40 = vmul.f32 %v6559_v37, %v1328_v38  ;;  %v8407_v37 = vld [vmem:[%s10546_s0 + $0x20] sm:$0xff]  }
 0x269   : > { %v8408_v38 = vld [vmem:[%s10546_s0 + $0x60] sm:$0xff]  }
 0x26a   : > { %v1342_v41 = vadd.f32 %v6560_v39, %v1335_v40  ;;  %v8409_v39 = vld [vmem:[%s10546_s0 + $0x28] sm:$0xff]  }
 0x26b   : > { %v8410_v40 = vld [vmem:[%s10546_s0 + $0x68] sm:$0xff]  }
 0x26c   : > { %v9090_v44 = vpack.c.bf16 %v1342_v41, %v1342_v41  ;;  %v8411_v41 = vld [vmem:[%s10546_s0 + $0x30] sm:$0xff]  }
 0x26e   : > { %7605 = vmatmul.mubr.bf16.vlgmr.msra.gmra.mrb[4].mxu1 %v9090_v44  ;;  %7625 = vmatmul.mubr.bf16.vlgmr.msra.gmra.mrb[8].mxu0 %v9090_v44 }
 0x26f   : > { %7629 = vmatpush3.bf16.msra.mxu1 %v8351_v42  ;;  %7649 = vmatpush3.bf16.msra.mxu0 %v8352_v43  ;;  %v8412_v42 = vld [vmem:[%s10546_s0 + $0x70] sm:$0xff]   ;;  %v8413_v43 = vld [vmem:[%s10546_s0 + $0x38] sm:$0xff]  }
 0x270   : > { %7630 = vmatprep.subr.bf16.mxu1 %v8697_v14  ;;  %7650 = vmatprep.subr.bf16.mxu0 %v8697_v14 }
 0x271   : > { %7644 = vmatprep.mubr.msk.bf16.mxu1 %vm8698_vm0, %v8697_v14  ;;  %7664 = vmatprep.mubr.msk.bf16.mxu0 %vm8698_vm0, %v8697_v14 }
 0x273   : > { %7631 = vmatpush3.bf16.msra.mxu1 %v8353_v45  ;;  %7651 = vmatpush3.bf16.msra.mxu0 %v8354_v46  ;;  %v8414_v45 = vld [vmem:[%s10546_s0 + $0x78] sm:$0xff]   ;;  %v8415_v46 = vld [vmem:[%s10546_s0 + $0x80] sm:$0xff]  }
 0x274   : > { %7632 = vmatprep.subr.bf16.mxu1 %v8697_v14  ;;  %7652 = vmatprep.subr.bf16.mxu0 %v8697_v14 }
 0x277   : > { %7633 = vmatpush3.bf16.msra.mxu1 %v8355_v47  ;;  %7653 = vmatpush3.bf16.msra.mxu0 %v8356_v48  ;;  %v8416_v47 = vld [vmem:[%s10546_s0 + $0xc0] sm:$0xff]   ;;  %v8417_v48 = vld [vmem:[%s10546_s0 + $0x88] sm:$0xff]  }
 0x278   : > { %7634 = vmatprep.subr.bf16.mxu1 %v8697_v14  ;;  %7654 = vmatprep.subr.bf16.mxu0 %v8697_v14 }
 0x27b   : > { %7635 = vmatpush3.bf16.msra.mxu1 %v8357_v49  ;;  %7655 = vmatpush3.bf16.msra.mxu0 %v8358_v50  ;;  %v8418_v49 = vld [vmem:[%s10546_s0 + $0xc8] sm:$0xff]   ;;  %v8419_v50 = vld [vmem:[%s10546_s0 + $0x90] sm:$0xff]  }
 0x27c   : > { %7636 = vmatprep.subr.bf16.mxu1 %v8697_v14  ;;  %7656 = vmatprep.subr.bf16.mxu0 %v8697_v14 }
 0x27f   : > { %7637 = vmatpush3.bf16.msra.mxu1 %v8359_v51  ;;  %7657 = vmatpush3.bf16.msra.mxu0 %v8360_v52  ;;  %v8420_v51 = vld [vmem:[%s10546_s0 + $0xd0] sm:$0xff]   ;;  %v8421_v52 = vld [vmem:[%s10546_s0 + $0x98] sm:$0xff]  }
 0x280   : > { %7638 = vmatprep.subr.bf16.mxu1 %v8697_v14  ;;  %7658 = vmatprep.subr.bf16.mxu0 %v8697_v14 }
 0x283   : > { %7639 = vmatpush3.bf16.msra.mxu1 %v8361_v53  ;;  %7659 = vmatpush3.bf16.msra.mxu0 %v8362_v54  ;;  %v8422_v53 = vld [vmem:[%s10546_s0 + $0xd8] sm:$0xff]   ;;  %v8423_v54 = vld [vmem:[%s10546_s0 + $0xa0] sm:$0xff]  }
 0x284   : > { %7640 = vmatprep.subr.bf16.mxu1 %v8697_v14  ;;  %7660 = vmatprep.subr.bf16.mxu0 %v8697_v14 }
 0x287   : > { %7641 = vmatpush3.bf16.msra.mxu1 %v8363_v55  ;;  %7661 = vmatpush3.bf16.msra.mxu0 %v8364_v56  ;;  %v8424_v55 = vld [vmem:[%s10546_s0 + $0xe0] sm:$0xff]   ;;  %v8425_v56 = vld [vmem:[%s10546_s0 + $0xa8] sm:$0xff]  }
 0x288   : > { %7642 = vmatprep.subr.bf16.mxu1 %v8697_v14  ;;  %7662 = vmatprep.subr.bf16.mxu0 %v8697_v14 }
 0x28b   : > { %7643 = vmatpush3.bf16.msra.mxu1 %v8365_v57  ;;  %7663 = vmatpush3.bf16.msra.mxu0 %v8366_v58  ;;  %v8426_v57 = vld [vmem:[%s10546_s0 + $0xe8] sm:$0xff]   ;;  %v8427_v58 = vld [vmem:[%s10546_s0 + $0xb0] sm:$0xff]  }
 0x28c   : > { %7668 = vmatprep.subr.bf16.mxu1 %v8697_v14  ;;  %7688 = vmatprep.subr.bf16.mxu0 %v8697_v14 }
 0x28e   : > { %7645 = vmatmul.mubr.bf16.vlgmr.msra.gmra.mrb[8].mxu1 %v9090_v44  ;;  %7665 = vmatmul.mubr.bf16.vlgmr.msra.gmra.mrb[12].mxu0 %v9090_v44 }
 0x28f   : > { %7669 = vmatpush3.bf16.msra.mxu1 %v8367_v59  ;;  %7689 = vmatpush3.bf16.msra.mxu0 %v8368_v60  ;;  %v8428_v59 = vld [vmem:[%s10546_s0 + $0xf0] sm:$0xff]   ;;  %v8429_v60 = vld [vmem:[%s10546_s0 + $0xb8] sm:$0xff]  }
 0x290   : > { %7670 = vmatprep.subr.bf16.mxu1 %v8697_v14  ;;  %7690 = vmatprep.subr.bf16.mxu0 %v8697_v14 }
 0x291   : > { %7684 = vmatprep.mubr.msk.bf16.mxu1 %vm8698_vm0, %v8697_v14  ;;  %7704 = vmatprep.mubr.msk.bf16.mxu0 %vm8698_vm0, %v8697_v14 }
 0x293   : > { %7671 = vmatpush3.bf16.msra.mxu1 %v8369_v61  ;;  %7691 = vmatpush3.bf16.msra.mxu0 %v8370_v62  ;;  %v8430_v61 = vld [vmem:[%s10546_s0 + $0xf8] sm:$0xff]  }
 0x294   : > { %7672 = vmatprep.subr.bf16.mxu1 %v8697_v14  ;;  %7692 = vmatprep.subr.bf16.mxu0 %v8697_v14 }
 0x297   : > { %7673 = vmatpush3.bf16.msra.mxu1 %v8371_v63  ;;  %7693 = vmatpush3.bf16.msra.mxu0 %v8372_v0 }
 0x298   : > { %7674 = vmatprep.subr.bf16.mxu1 %v8697_v14  ;;  %7694 = vmatprep.subr.bf16.mxu0 %v8697_v14 }
 0x29b   : > { %7675 = vmatpush3.bf16.msra.mxu1 %v8373_v1  ;;  %7695 = vmatpush3.bf16.msra.mxu0 %v8374_v2 }
 0x29c   : > { %7676 = vmatprep.subr.bf16.mxu1 %v8697_v14  ;;  %7696 = vmatprep.subr.bf16.mxu0 %v8697_v14 }
 0x29f   : > { %7677 = vmatpush3.bf16.msra.mxu1 %v8375_v3  ;;  %7697 = vmatpush3.bf16.msra.mxu0 %v8376_v4 }
 0x2a0   : > { %7678 = vmatprep.subr.bf16.mxu1 %v8697_v14  ;;  %7698 = vmatprep.subr.bf16.mxu0 %v8697_v14 }
 0x2a3   : > { %7679 = vmatpush3.bf16.msra.mxu1 %v8377_v5  ;;  %7699 = vmatpush3.bf16.msra.mxu0 %v8378_v6 }
 0x2a4   : > { %7680 = vmatprep.subr.bf16.mxu1 %v8697_v14  ;;  %7700 = vmatprep.subr.bf16.mxu0 %v8697_v14 }
 0x2a7   : > { %7681 = vmatpush3.bf16.msra.mxu1 %v8379_v7  ;;  %7701 = vmatpush3.bf16.msra.mxu0 %v8380_v8 }
 0x2a8   : > { %7682 = vmatprep.subr.bf16.mxu1 %v8697_v14  ;;  %7702 = vmatprep.subr.bf16.mxu0 %v8697_v14 }
 0x2ab   : > { %7683 = vmatpush3.bf16.msra.mxu1 %v8381_v9  ;;  %7703 = vmatpush3.bf16.msra.mxu0 %v8382_v10 }
 0x2ac   : > { %7708 = vmatprep.subr.bf16.mxu1 %v8697_v14  ;;  %7728 = vmatprep.subr.bf16.mxu0 %v8697_v14 }
 0x2ae   : > { %7685 = vmatmul.mubr.bf16.vlgmr.msra.gmra.mrb[12].mxu1 %v9090_v44  ;;  %7705 = vmatmul.mubr.bf16.vlgmr.msra.gmra.mrb[16].mxu0 %v9090_v44 }
 0x2af   : > { %7709 = vmatpush3.bf16.msra.mxu1 %v8383_v12  ;;  %7729 = vmatpush3.bf16.msra.mxu0 %v8384_v13 }
 0x2b0   : > { %7710 = vmatprep.subr.bf16.mxu1 %v8697_v14  ;;  %7730 = vmatprep.subr.bf16.mxu0 %v8697_v14 }
 0x2b1   : > { %7724 = vmatprep.mubr.msk.bf16.mxu1 %vm8698_vm0, %v8697_v14  ;;  %7744 = vmatprep.mubr.msk.bf16.mxu0 %vm8698_vm0, %v8697_v14 }
 0x2b3   : > { %7711 = vmatpush3.bf16.msra.mxu1 %v8385_v15  ;;  %7731 = vmatpush3.bf16.msra.mxu0 %v8386_v16  ;;  %v6597_v15 = vld [vmem:[%s10547_s5] ss:$0 sm:$0xff] }
 0x2b4   : > { %7712 = vmatprep.subr.bf16.mxu1 %v8697_v14  ;;  %7732 = vmatprep.subr.bf16.mxu0 %v8697_v14 }
 0x2b7   : > { %7713 = vmatpush3.bf16.msra.mxu1 %v8387_v17  ;;  %7733 = vmatpush3.bf16.msra.mxu0 %v8388_v18 }
 0x2b8   : > { %7714 = vmatprep.subr.bf16.mxu1 %v8697_v14  ;;  %7734 = vmatprep.subr.bf16.mxu0 %v8697_v14 }
 0x2bb   : > { %7715 = vmatpush3.bf16.msra.mxu1 %v8389_v19  ;;  %7735 = vmatpush3.bf16.msra.mxu0 %v8390_v20 }
 0x2bc   : > { %7716 = vmatprep.subr.bf16.mxu1 %v8697_v14  ;;  %7736 = vmatprep.subr.bf16.mxu0 %v8697_v14 }
 0x2bf   : > { %7717 = vmatpush3.bf16.msra.mxu1 %v8391_v21  ;;  %7737 = vmatpush3.bf16.msra.mxu0 %v8392_v22  ;;  %v6598_v21 = vld [vmem:[%s10547_s5 + $0x1] ss:$0 sm:$0xff] }
 0x2c0   : > { %7718 = vmatprep.subr.bf16.mxu1 %v8697_v14  ;;  %7738 = vmatprep.subr.bf16.mxu0 %v8697_v14 }
 0x2c3   : > { %7719 = vmatpush3.bf16.msra.mxu1 %v8393_v23  ;;  %7739 = vmatpush3.bf16.msra.mxu0 %v8394_v24 }
 0x2c4   : > { %7720 = vmatprep.subr.bf16.mxu1 %v8697_v14  ;;  %7740 = vmatprep.subr.bf16.mxu0 %v8697_v14 }
 0x2c7   : > { %7721 = vmatpush3.bf16.msra.mxu1 %v8395_v25  ;;  %7741 = vmatpush3.bf16.msra.mxu0 %v8396_v26 }
 0x2c8   : > { %7722 = vmatprep.subr.bf16.mxu1 %v8697_v14  ;;  %7742 = vmatprep.subr.bf16.mxu0 %v8697_v14 }
 0x2cb   : > { %7723 = vmatpush3.bf16.msra.mxu1 %v8397_v27  ;;  %7743 = vmatpush3.bf16.msra.mxu0 %v8398_v28  ;;  %v6561_v27 = vld [vmem:[%s10548_s9] ss:$0 sm:$0xff] }
 0x2cc   : > { %7748 = vmatprep.subr.bf16.mxu1 %v8697_v14  ;;  %7768 = vmatprep.subr.bf16.mxu0 %v8697_v14 }
 0x2ce   : > { %7725 = vmatmul.mubr.bf16.vlgmr.msra.gmra.mrb[16].mxu1 %v9090_v44  ;;  %7745 = vmatmul.mubr.bf16.vlgmr.msra.gmra.mrb[20].mxu0 %v9090_v44 }
 0x2cf   : > { %7749 = vmatpush3.bf16.msra.mxu1 %v8399_v29  ;;  %7769 = vmatpush3.bf16.msra.mxu0 %v8400_v30 }
 0x2d0   : > { %7750 = vmatprep.subr.bf16.mxu1 %v8697_v14  ;;  %7770 = vmatprep.subr.bf16.mxu0 %v8697_v14 }
 0x2d1   : > { %7764 = vmatprep.mubr.msk.bf16.mxu1 %vm8698_vm0, %v8697_v14  ;;  %7784 = vmatprep.mubr.msk.bf16.mxu0 %vm8698_vm0, %v8697_v14 }
 0x2d3   : > { %7751 = vmatpush3.bf16.msra.mxu1 %v8401_v31  ;;  %7771 = vmatpush3.bf16.msra.mxu0 %v8402_v32 }
 0x2d4   : > { %7752 = vmatprep.subr.bf16.mxu1 %v8697_v14  ;;  %7772 = vmatprep.subr.bf16.mxu0 %v8697_v14 }
 0x2d7   : > { %7753 = vmatpush3.bf16.msra.mxu1 %v8403_v33  ;;  %7773 = vmatpush3.bf16.msra.mxu0 %v8404_v34  ;;  %v6562_v33 = vld [vmem:[%s10548_s9 + $0x1] ss:$0 sm:$0xff] }
 0x2d8   : > { %7754 = vmatprep.subr.bf16.mxu1 %v8697_v14  ;;  %7774 = vmatprep.subr.bf16.mxu0 %v8697_v14 }
 0x2db   : > { %7755 = vmatpush3.bf16.msra.mxu1 %v8405_v35  ;;  %7775 = vmatpush3.bf16.msra.mxu0 %v8406_v36 }
 0x2dc   : > { %7756 = vmatprep.subr.bf16.mxu1 %v8697_v14  ;;  %7776 = vmatprep.subr.bf16.mxu0 %v8697_v14 }
 0x2df   : > { %7757 = vmatpush3.bf16.msra.mxu1 %v8407_v37  ;;  %7777 = vmatpush3.bf16.msra.mxu0 %v8408_v38  ;;  %v6599_v37 = vld [vmem:[%s10547_s5 + $0x2] ss:$0 sm:$0xff] }
 0x2e0   : > { %7758 = vmatprep.subr.bf16.mxu1 %v8697_v14  ;;  %7778 = vmatprep.subr.bf16.mxu0 %v8697_v14 }
 0x2e3   : > { %7759 = vmatpush3.bf16.msra.mxu1 %v8409_v39  ;;  %7779 = vmatpush3.bf16.msra.mxu0 %v8410_v40 }
 0x2e4   : > { %7760 = vmatprep.subr.bf16.mxu1 %v8697_v14  ;;  %7780 = vmatprep.subr.bf16.mxu0 %v8697_v14 }
 0x2e7   : > { %7761 = vmatpush3.bf16.msra.mxu1 %v8411_v41  ;;  %7781 = vmatpush3.bf16.msra.mxu0 %v8412_v42 }
 0x2e8   : > { %7762 = vmatprep.subr.bf16.mxu1 %v8697_v14  ;;  %7782 = vmatprep.subr.bf16.mxu0 %v8697_v14 }
 0x2eb   : > { %7763 = vmatpush3.bf16.msra.mxu1 %v8413_v43  ;;  %7783 = vmatpush3.bf16.msra.mxu0 %v8414_v45  ;;  %v6600_v43 = vld [vmem:[%s10547_s5 + $0x3] ss:$0 sm:$0xff] }
 0x2ec   : > { %7788 = vmatprep.subr.bf16.mxu1 %v8697_v14  ;;  %7808 = vmatprep.subr.bf16.mxu0 %v8697_v14 }
 0x2ee   : > { %7765 = vmatmul.mubr.bf16.vlgmr.msra.gmra.mrb[20].mxu1 %v9090_v44  ;;  %7785 = vmatmul.mubr.bf16.vlgmr.msra.gmra.mrb[24].mxu0 %v9090_v44 }
 0x2ef   : > { %7789 = vmatpush3.bf16.msra.mxu1 %v8415_v46  ;;  %7809 = vmatpush3.bf16.msra.mxu0 %v8416_v47 }
 0x2f0   : > { %7790 = vmatprep.subr.bf16.mxu1 %v8697_v14  ;;  %7810 = vmatprep.subr.bf16.mxu0 %v8697_v14 }
 0x2f1   : > { %7804 = vmatprep.mubr.msk.bf16.mxu1 %vm8698_vm0, %v8697_v14  ;;  %7824 = vmatprep.mubr.msk.bf16.mxu0 %vm8698_vm0, %v8697_v14 }
 0x2f3   : > { %7791 = vmatpush3.bf16.msra.mxu1 %v8417_v48  ;;  %7811 = vmatpush3.bf16.msra.mxu0 %v8418_v49 }
 0x2f4   : > { %7792 = vmatprep.subr.bf16.mxu1 %v8697_v14  ;;  %7812 = vmatprep.subr.bf16.mxu0 %v8697_v14 }
 0x2f7   : > { %7793 = vmatpush3.bf16.msra.mxu1 %v8419_v50  ;;  %7813 = vmatpush3.bf16.msra.mxu0 %v8420_v51  ;;  %v6563_v50 = vld [vmem:[%s10548_s9 + $0x2] ss:$0 sm:$0xff] }
 0x2f8   : > { %7794 = vmatprep.subr.bf16.mxu1 %v8697_v14  ;;  %7814 = vmatprep.subr.bf16.mxu0 %v8697_v14 }
 0x2fb   : > { %7795 = vmatpush3.bf16.msra.mxu1 %v8421_v52  ;;  %7815 = vmatpush3.bf16.msra.mxu0 %v8422_v53 }
 0x2fc   : > { %7796 = vmatprep.subr.bf16.mxu1 %v8697_v14  ;;  %7816 = vmatprep.subr.bf16.mxu0 %v8697_v14 }
 0x2ff   : > { %7797 = vmatpush3.bf16.msra.mxu1 %v8423_v54  ;;  %7817 = vmatpush3.bf16.msra.mxu0 %v8424_v55 }
 0x300   : > { %7798 = vmatprep.subr.bf16.mxu1 %v8697_v14  ;;  %7818 = vmatprep.subr.bf16.mxu0 %v8697_v14 }
 0x303   : > { %7799 = vmatpush3.bf16.msra.mxu1 %v8425_v56  ;;  %7819 = vmatpush3.bf16.msra.mxu0 %v8426_v57  ;;  %v6564_v56 = vld [vmem:[%s10548_s9 + $0x3] ss:$0 sm:$0xff] }
 0x304   : > { %7800 = vmatprep.subr.bf16.mxu1 %v8697_v14  ;;  %7820 = vmatprep.subr.bf16.mxu0 %v8697_v14 }
 0x307   : > { %7801 = vmatpush3.bf16.msra.mxu1 %v8427_v58  ;;  %7821 = vmatpush3.bf16.msra.mxu0 %v8428_v59 }
 0x308   : > { %7802 = vmatprep.subr.bf16.mxu1 %v8697_v14  ;;  %7822 = vmatprep.subr.bf16.mxu0 %v8697_v14 }
 0x30b   : > { %7803 = vmatpush3.bf16.msra.mxu1 %v8429_v60  ;;  %7823 = vmatpush3.bf16.msra.mxu0 %v8430_v61  ;;  %v6633_v60 = vld [vmem:[%s10497_s10] ss:$0 sm:$0xff]  ;;  %v6634_v61 = vld [vmem:[%s10497_s10 + $0x1] ss:$0 sm:$0xff] }
 0x30c   : > { %7828 = vmatprep.subr.bf16.mxu1 %v8697_v14  ;;  %7852 = vmatprep.subr.bf16.mxu0 %v8697_v14 }
 0x30e   : > { %7805 = vmatmul.mubr.bf16.vlgmr.msra.gmra.mrb[24].mxu1 %v9090_v44  ;;  %7825 = vmatmul.mubr.bf16.vlgmr.msra.gmra.mrb[28].mxu0 %v9090_v44 }
 0x30f   : > { %7830 = vmatprep.mubr.msk.bf16.mxu1 %vm8698_vm0, %v8697_v14  ;;  %7854 = vmatprep.mubr.msk.bf16.mxu0 %vm8698_vm0, %v8697_v14 }
 0x341   : > { %v1518_v62 = vpop.f32.mrb[4].mxu1  ;;  %v1606_v63 = vpop.f32.mrb[8].mxu0 }
 0x342   : > { %v7606_v0 = vpop.f32.mrb[5].mxu1  ;;  %v7626_v1 = vpop.f32.mrb[9].mxu0  ;;  %v1519_v30 = vadd.f32 %v6561_v27, %v1518_v62  ;;  %v1607_v35 = vadd.f32 %v6562_v33, %v1606_v63 }
 0x343   : > { %v1521_v2 = vpop.f32.mrb[6].mxu1  ;;  %v1609_v3 = vpop.f32.mrb[10].mxu0 }
 0x344   : > { %v7607_v4 = vpop.f32.mrb[7].mxu1  ;;  %v7627_v5 = vpop.f32.mrb[11].mxu0  ;;  %v2676_v32 = vpack.c.bf16 %v1519_v30, %v1519_v30  ;;  %v2677_v36 = vpack.c.bf16 %v1607_v35, %v1607_v35 }
 0x361   : > { %v1694_v6 = vpop.f32.mrb[8].mxu1  ;;  %v9442_v7 = vpop.f32.mrb[12].mxu0 }
 0x362   : > { %v7646_v8 = vpop.f32.mrb[9].mxu1  ;;  %v7666_v9 = vpop.f32.mrb[13].mxu0  ;;  %v1695_v53 = vadd.f32 %v6563_v50, %v1694_v6  ;;  %v1783_v58 = vadd.f32 %v6564_v56, %v9442_v7 }
 0x363   : > { %v1697_v44 = vpop.f32.mrb[10].mxu1  ;;  %v1785_v10 = vpop.f32.mrb[14].mxu0 }
 0x364   : > { %v7647_v12 = vpop.f32.mrb[11].mxu1  ;;  %v7667_v13 = vpop.f32.mrb[15].mxu0  ;;  %v2678_v55 = vpack.c.bf16 %v1695_v53, %v1695_v53  ;;  %v2679_v59 = vpack.c.bf16 %v1783_v58, %v1783_v58 }
 0x381   : > { %v1962_v16 = vpop.f32.mrb[12].mxu1  ;;  %v2050_v17 = vpop.f32.mrb[16].mxu0 }
 0x382   : > { %v1963_v18 = vadd.f32 %v6597_v15, %v1962_v16  ;;  %v7686_v19 = vpop.f32.mrb[13].mxu1  ;;  %v7706_v20 = vpop.f32.mrb[17].mxu0  ;;  %v2051_v29 = vadd.f32 %v6598_v21, %v2050_v17  ;;  %v781_v21 = vlaneseq }
 0x383   : > { %v1965_v22 = vpop.f32.mrb[14].mxu1  ;;  %v2053_v23 = vpop.f32.mrb[18].mxu0 }
 0x384   : > { %v2680_v24 = vpack.c.bf16 %v1963_v18, %v1963_v18  ;;  %v7687_v25 = vpop.f32.mrb[15].mxu1  ;;  %v7707_v26 = vpop.f32.mrb[19].mxu0  ;;  %v2681_v31 = vpack.c.bf16 %v2051_v29, %v2051_v29  ;;  %v782_v22 = vand.u32 127, %v781_v21 }
 0x386   : > { %v2689_v28 = vsel %vm2684_vm1, %v2680_v24, 0  ;;  %v2735_v34 = vsel %vm2684_vm1, %v2681_v31, 0  ;;  %vm783_vm3 = vcmp.lt.s32.totalorder %v782_v22, 5  ;;  %v8699_v24 = vmov -1e+30  }
 0x387   : > { %7829 = vmatpush3.bf16.xpose.msra.mxu1 %v2689_v28  ;;  %v9504_v25 = vsel %vm783_vm3, 0.0, %v8699_v24 }
 0x388   : > { %7834 = vmatprep.subr.bf16.mxu1 %v8697_v14 }
 0x38e   : > { %7831 = vmatmul.mubr.msk.bf16.vlgmr.msra.gmra.mrb[28].mxu1 %vm2684_vm1, %v2676_v32 }
 0x38f   : > { %7835 = vmatpush3.bf16.xpose.msra.mxu1 %v2735_v34  ;;  %7836 = vmatprep.mubr.msk.bf16.mxu1 %vm8698_vm0, %v8697_v14 }
 0x390   : > { %7840 = vmatprep.subr.bf16.mxu1 %v8697_v14 }
 0x396   : > { %7837 = vmatmul.mubr.msk.bf16.vlgmr.msra.gmra.mrb[32].mxu1 %vm2684_vm1, %v2677_v36 }
 0x397   : > { %7842 = vmatprep.mubr.msk.bf16.mxu1 %vm8698_vm0, %v8697_v14 }
 0x3a1   : > { %v2138_v38 = vpop.f32.mrb[16].mxu1  ;;  %v2226_v39 = vpop.f32.mrb[20].mxu0 }
 0x3a2   : > { %v2139_v40 = vadd.f32 %v6599_v37, %v2138_v38  ;;  %v7726_v41 = vpop.f32.mrb[17].mxu1  ;;  %v7746_v42 = vpop.f32.mrb[21].mxu0  ;;  %v2227_v52 = vadd.f32 %v6600_v43, %v2226_v39 }
 0x3a3   : > { %v2141_v45 = vpop.f32.mrb[18].mxu1  ;;  %v2229_v46 = vpop.f32.mrb[22].mxu0 }
 0x3a4   : > { %v2682_v47 = vpack.c.bf16 %v2139_v40, %v2139_v40  ;;  %v7727_v48 = vpop.f32.mrb[19].mxu1  ;;  %v7747_v49 = vpop.f32.mrb[23].mxu0  ;;  %v2683_v54 = vpack.c.bf16 %v2227_v52, %v2227_v52 }
 0x3a6   : > { %v2781_v51 = vsel %vm2684_vm1, %v2682_v47, 0  ;;  %v2827_v57 = vsel %vm2684_vm1, %v2683_v54, 0 }
 0x3a7   : > { %7841 = vmatpush3.bf16.xpose.msra.mxu1 %v2781_v51 }
 0x3a8   : > { %7846 = vmatprep.subr.bf16.mxu1 %v8697_v14 }
 0x3ae   : > { %7843 = vmatmul.mubr.msk.bf16.vlgmr.msra.gmra.mrb[36].mxu1 %vm2684_vm1, %v2678_v55 }
 0x3af   : > { %7847 = vmatpush3.bf16.xpose.msra.mxu1 %v2827_v57  ;;  %7848 = vmatprep.mubr.msk.bf16.mxu1 %vm8698_vm0, %v8697_v14 }
 0x3b0   : > { %7858 = vmatprep.subr.bf16.mxu1 %v8697_v14 }
 0x3b6   : > { %7849 = vmatmul.mubr.msk.bf16.vlgmr.msra.gmra.mrb[40].mxu1 %vm2684_vm1, %v2679_v59 }
 0x3b7   : > { %7860 = vmatprep.mubr.msk.bf16.mxu1 %vm8698_vm0, %v8697_v14 }
 0x3c1   : > { %v2406_v62 = vpop.f32.mrb[20].mxu1  ;;  %v2494_v63 = vpop.f32.mrb[24].mxu0 }
 0x3c2   : > { %v2407_v0 = vadd.f32 %v6633_v60, %v2406_v62  ;;  %v2495_v1 = vadd.f32 %v6634_v61, %v2494_v63  ;;  %v7766_v2 = vpop.f32.mrb[21].mxu1  ;;  %v7786_v3 = vpop.f32.mrb[25].mxu0 }
 0x3c3   : > { %v2409_v4 = vpop.f32.mrb[22].mxu1  ;;  %v2497_v5 = vpop.f32.mrb[26].mxu0 }
 0x3c4   : > { %v2926_v6 = vpack.c.bf16 %v2407_v0, %v2407_v0  ;;  %v2927_v7 = vpack.c.bf16 %v2495_v1, %v2495_v1  ;;  %v7767_v8 = vpop.f32.mrb[23].mxu1  ;;  %v7787_v9 = vpop.f32.mrb[27].mxu0 }
 0x3c6   : > { %v2935_v44 = vsel %vm2933_vm2, %v2926_v6, 0  ;;  %v2981_v10 = vsel %vm2933_vm2, %v2927_v7, 0 }
 0x3c7   : > { %7853 = vmatpush3.bf16.msra.mxu0 %v2935_v44  ;;  %7859 = vmatpush3.bf16.msra.mxu1 %v2981_v10  ;;  %v6635_v10 = vld [vmem:[%s10497_s10 + $0x2] ss:$0 sm:$0xff] }
 0x3c8   : > { %7864 = vmatprep.subr.bf16.mxu0 %v8697_v14  ;;  %7870 = vmatprep.subr.bf16.mxu1 %v8697_v14 }
 0x3e1   : > { %v9499_v12 = vpop.f32.mrb[24].mxu1  ;;  %v9501_v13 = vpop.f32.mrb[28].mxu0 }
 0x3e2   : > { %v7806_v15 = vpop.f32.mrb[25].mxu1  ;;  %v7826_v16 = vpop.f32.mrb[29].mxu0 }
 0x3e3   : > { %v2585_v17 = vpop.f32.mrb[26].mxu1  ;;  %v2673_v18 = vpop.f32.mrb[30].mxu0  ;;  %v2583_v15 = vadd.f32 %v6635_v10, %v9499_v12 }
 0x3e4   : > { %v7807_v19 = vpop.f32.mrb[27].mxu1  ;;  %v7827_v20 = vpop.f32.mrb[31].mxu0 }
 0x3e5   : > { %v2928_v18 = vpack.c.bf16 %v2583_v15, %v2583_v15  ;;  %v6636_v20 = vld [vmem:[%s10497_s10 + $0x3] ss:$0 sm:$0xff] }
 0x3e6   : > { %v2671_v24 = vadd.f32 %v6636_v20, %v9501_v13 }
 0x461   : > { %v2725_v23 = vpop.f32.mrb[28].mxu1 }
 0x462   : > { %v2869_v26 = vmul.f32 0.17677669, %v2725_v23  ;;  %v7832_v27 = vpop.f32.mrb[29].mxu1  ;;  %v3027_v23 = vsel %vm2933_vm2, %v2928_v18, 0 }
 0x463   : > { %v2728_v28 = vpop.f32.mrb[30].mxu1 }
 0x464   : > { %v7833_v29 = vpop.f32.mrb[31].mxu1  ;;  %v2873_v30 = vadd.f32 %v2869_v26, %v9504_v25  ;;  %v2929_v26 = vpack.c.bf16 %v2671_v24, %v2671_v24  ;;  %v6689_v24 = vld [vmem:[%s10499_s12] ss:$0 sm:$0xff] }
 0x466   : > { %v2878_v31 = vsel %vm2877_vm4, %v2873_v30, -inf  ;;  %v3073_v29 = vsel %vm2933_vm2, %v2929_v26, 0 }
 0x467   : > { %2879 = vmax.xlane.f32.xlu1 %v2878_v31 }
 0x469   : > { %v2771_v32 = vpop.f32.mrb[32].mxu1 }
 0x46a   : > { %v2870_v33 = vmul.f32 0.17677669, %v2771_v32  ;;  %v7838_v34 = vpop.f32.mrb[33].mxu1 }
 0x46b   : > { %v2774_v35 = vpop.f32.mrb[34].mxu1 }
 0x46c   : > { %v7839_v36 = vpop.f32.mrb[35].mxu1  ;;  %v2874_v37 = vadd.f32 %v2870_v33, %v9504_v25  ;;  %v8431_v33 = vld [vmem:[%s10498_s11] sm:$0xff]  }
 0x46e   : > { %v2881_v38 = vsel %vm2877_vm4, %v2874_v37, -inf }
 0x46f   : > { %2882 = vmax.xlane.f32.xlu1 %v2881_v38  ;;  %v8432_v38 = vld [vmem:[%s10498_s11 + $0x8] sm:$0xff]  }
 0x481   : > { %v2817_v39 = vpop.f32.mrb[36].mxu1 }
 0x482   : > { %v2871_v40 = vmul.f32 0.17677669, %v2817_v39  ;;  %v7844_v41 = vpop.f32.mrb[37].mxu1  ;;  %v8433_v39 = vld [vmem:[%s10498_s11 + $0x10] sm:$0xff]  }
 0x483   : > { %v2820_v42 = vpop.f32.mrb[38].mxu1 }
 0x484   : > { %v7845_v43 = vpop.f32.mrb[39].mxu1  ;;  %v2875_v45 = vadd.f32 %v2871_v40, %v9504_v25  ;;  %v8434_v40 = vld [vmem:[%s10498_s11 + $0x18] sm:$0xff]   ;;  %v8435_v42 = vld [vmem:[%s10498_s11 + $0x20] sm:$0xff]  }
 0x486   : > { %v2884_v46 = vsel %vm2877_vm4, %v2875_v45, -inf }
 0x487   : > { %2885 = vmax.xlane.f32.xlu0 %v2884_v46 }
 0x489   : > { %v2863_v47 = vpop.f32.mrb[40].mxu1 }
 0x48a   : > { %v2872_v48 = vmul.f32 0.17677669, %v2863_v47  ;;  %v7850_v49 = vpop.f32.mrb[41].mxu1 }
 0x48b   : > { %v2866_v50 = vpop.f32.mrb[42].mxu1 }
 0x48c   : > { %v7851_v51 = vpop.f32.mrb[43].mxu1  ;;  %v2876_v52 = vadd.f32 %v2872_v48, %v9504_v25  ;;  %v8436_v48 = vld [vmem:[%s10498_s11 + $0x28] sm:$0xff]   ;;  %v8437_v50 = vld [vmem:[%s10498_s11 + $0x30] sm:$0xff]  }
 0x48e   : > { %v2887_v53 = vsel %vm2877_vm4, %v2876_v52, -inf }
 0x48f   : > { %2888 = vmax.xlane.f32.xlu1 %v2887_v53 }
 0x4f4   : > { %v2880_v54 = vpop.xlane.xlu1 %2879 }
 0x4f5   : > { %v2890_v55 = vsub.f32 %v2873_v30, %v2880_v54 }
 0x4f7   : > { %v2894_v56 = vmul.f32 1.442695, %v2890_v55  ;;  %v8438_v55 = vld [vmem:[%s10498_s11 + $0x38] sm:$0xff]  }
 0x4f9   : > { %8641 = vpow2.f32 %v2894_v56 }
 0x4fc   : > { %v2883_v57 = vpop.xlane.xlu1 %2882 }
 0x4fd   : > { %v2891_v58 = vsub.f32 %v2874_v37, %v2883_v57 }
 0x4ff   : > { %v2896_v59 = vmul.f32 1.442695, %v2891_v58 }
 0x501   : > { %8643 = vpow2.f32 %v2896_v59 }
 0x503   : > { %v8642_v60 = vpop.eup %8641 }
 0x504   : > { %v2902_v61 = vsel %vm2877_vm4, %v8642_v60, 0.0 }
 0x505   : > { %2903 = vadd.xlane.f32.xlu0 %v2902_v61 }
 0x50b   : > { %v8644_v62 = vpop.eup %8643 }
 0x50c   : > { %v2905_v63 = vsel %vm2877_vm4, %v8644_v62, 0.0 }
 0x50d   : > { %2906 = vadd.xlane.f32.xlu1 %v2905_v63 }
 0x514   : > { %v2886_v0 = vpop.xlane.xlu0 %2885 }
 0x515   : > { %v2892_v1 = vsub.f32 %v2875_v45, %v2886_v0 }
 0x517   : > { %v2898_v2 = vmul.f32 1.442695, %v2892_v1 }
 0x519   : > { %8645 = vpow2.f32 %v2898_v2 }
 0x51c   : > { %v2889_v3 = vpop.xlane.xlu1 %2888 }
 0x51d   : > { %v2893_v4 = vsub.f32 %v2876_v52, %v2889_v3 }
 0x51f   : > { %v2900_v5 = vmul.f32 1.442695, %v2893_v4 }
 0x521   : > { %8647 = vpow2.f32 %v2900_v5 }
 0x523   : > { %v8646_v6 = vpop.eup %8645 }
 0x524   : > { %v2908_v7 = vsel %vm2877_vm4, %v8646_v6, 0.0 }
 0x525   : > { %2909 = vadd.xlane.f32.xlu0 %v2908_v7 }
 0x52b   : > { %v8648_v8 = vpop.eup %8647 }
 0x52c   : > { %v2911_v9 = vsel %vm2877_vm4, %v8648_v8, 0.0 }
 0x52d   : > { %2912 = vadd.xlane.f32.xlu1 %v2911_v9 }
 0x592   : > { %v2904_v44 = vpop.xlane.xlu0 %2903 }
 0x593   : > { %8649 = vrcp.f32 %v2904_v44 }
 0x59a   : > { %v2907_v16 = vpop.xlane.xlu1 %2906 }
 0x59b   : > { %8651 = vrcp.f32 %v2907_v16 }
 0x59d   : > { %v8650_v17 = vpop.eup %8649 }
 0x59e   : > { %v2918_v19 = vmul.f32 %v8650_v17, %v8642_v60 }
 0x5a0   : > { %v2922_v22 = vpack.c.bf16 %v2918_v19, %v2918_v19 }
 0x5a2   : > { %7855 = vmatmul.mubr.msk.bf16.vlgmr.msra.gmra.mrb[32].mxu0 %vm2877_vm4, %v2922_v22 }
 0x5a3   : > { %7865 = vmatpush3.bf16.msra.mxu0 %v3027_v23  ;;  %7866 = vmatprep.mubr.msk.bf16.mxu0 %vm8698_vm0, %v8697_v14 }
 0x5a4   : > { %7876 = vmatprep.subr.bf16.mxu0 %v8697_v14 }
 0x5a5   : > { %v8652_v12 = vpop.eup %8651 }
 0x5a6   : > { %v2919_v27 = vmul.f32 %v8652_v12, %v8644_v62 }
 0x5a8   : > { %v2923_v28 = vpack.c.bf16 %v2919_v27, %v2919_v27 }
 0x5aa   : > { %7861 = vmatmul.mubr.msk.bf16.vlgmr.msra.gmra.mrb[44].mxu1 %vm2877_vm4, %v2923_v28  ;;  %v8439_v28 = vld [vmem:[%s10502_s15] ss:$8 sps:$4 sm:$0xff]  }
 0x5ab   : > { %7871 = vmatpush3.bf16.msra.mxu1 %v3073_v29  ;;  %7872 = vmatprep.mubr.msk.bf16.mxu1 %vm8698_vm0, %v8697_v14  ;;  %v8441_v29 = vld [vmem:[%s10502_s15 + $0x4] ss:$8 sps:$4 sm:$0xff]  }
 0x5ac   : > { %7884 = vmatprep.subr.bf16.mxu1 %v8697_v14 }
 0x5b2   : > { %v2910_v13 = vpop.xlane.xlu0 %2909 }
 0x5b3   : > { %8653 = vrcp.f32 %v2910_v13  ;;  %v8444_v13 = vld [vmem:[%s10502_s15 + $0x14] ss:$8 sps:$4 sm:$0xff]  }
 0x5ba   : > { %v2913_v30 = vpop.xlane.xlu1 %2912 }
 0x5bb   : > { %8655 = vrcp.f32 %v2913_v30  ;;  %v8447_v30 = vld [vmem:[%s10502_s15 + $0x24] ss:$8 sps:$4 sm:$0xff]  }
 0x5bd   : > { %v8654_v31 = vpop.eup %8653 }
 0x5be   : > { %v2920_v32 = vmul.f32 %v8654_v31, %v8646_v6  ;;  %v8445_v31 = vld [vmem:[%s10502_s15 + $0x20] ss:$8 sps:$4 sm:$0xff]  }
 0x5c0   : > { %v2924_v34 = vpack.c.bf16 %v2920_v32, %v2920_v32 }
 0x5c2   : > { %7867 = vmatmul.mubr.msk.bf16.vlgmr.msra.gmra.mrb[36].mxu0 %vm2877_vm4, %v2924_v34 }
 0x5c3   : > { %7877 = vmatpush3.bf16.msra.mxu0 %v8431_v33  ;;  %7880 = vmatprep.mubr.msk.bf16.mxu0 %vm8698_vm0, %v8697_v14 }
 0x5c4   : > { %7878 = vmatprep.subr.bf16.mxu0 %v8697_v14 }
 0x5c5   : > { %v8656_v35 = vpop.eup %8655 }
 0x5c6   : > { %v2921_v36 = vmul.f32 %v8656_v35, %v8648_v8 }
 0x5c7   : > { %7879 = vmatpush3.bf16.msra.mxu0 %v8432_v38  ;;  %v8453_v38 = vld [vmem:[%s10502_s15 + $0x44] ss:$8 sps:$4 sm:$0xff]  }
 0x5c8   : > { %v2925_v37 = vpack.c.bf16 %v2921_v36, %v2921_v36  ;;  %7892 = vmatprep.subr.bf16.mxu0 %v8697_v14  ;;  %v8450_v36 = vld [vmem:[%s10502_s15 + $0x34] ss:$8 sps:$4 sm:$0xff]  }
 0x5ca   : > { %7873 = vmatmul.mubr.msk.bf16.vlgmr.msra.gmra.mrb[48].mxu1 %vm2877_vm4, %v2925_v37  ;;  %v8448_v37 = vld [vmem:[%s10502_s15 + $0x30] ss:$8 sps:$4 sm:$0xff]  }
 0x5cb   : > { %7888 = vmatprep.mubr.msk.bf16.mxu1 %vm8698_vm0, %v8697_v14  ;;  %7885 = vmatpush3.bf16.msra.mxu1 %v8433_v39  ;;  %v8451_v39 = vld [vmem:[%s10502_s15 + $0x40] ss:$8 sps:$4 sm:$0xff]  }
 0x5cc   : > { %7886 = vmatprep.subr.bf16.mxu1 %v8697_v14 }
 0x5cf   : > { %7887 = vmatpush3.bf16.msra.mxu1 %v8434_v40  ;;  %v8456_v40 = vld [vmem:[%s10502_s15 + $0x54] ss:$8 sps:$4 sm:$0xff]  }
 0x5d0   : > { %7900 = vmatprep.subr.bf16.mxu1 %v8697_v14 }
 0x675   : > { %v2971_v41 = vpop.f32.mrb[32].mxu0 }
 0x676   : > { %v3115_v43 = vpack.c.bf16 %v2971_v41, %v2971_v41  ;;  %v7856_v45 = vpop.f32.mrb[33].mxu0  ;;  %v8700_v41 = vmov 0  }
 0x677   : > { %v2974_v46 = vpop.f32.mrb[34].mxu0  ;;  %v8457_v45 = vld [vmem:[%s10502_s15 + $0x60] ss:$8 sps:$4 sm:$0xff]  }
 0x678   : > { %v7857_v47 = vpop.f32.mrb[35].mxu0  ;;  %7881 = vmatmul.mubr.msk.bf16.vlgmr.msra.gmra.mrb[40].mxu0 %vm2684_vm1, %v3115_v43  ;;  %v8459_v43 = vld [vmem:[%s10502_s15 + $0x64] ss:$8 sps:$4 sm:$0xff]   ;;  %v8462_v46 = vld [vmem:[%s10502_s15 + $0x74] ss:$8 sps:$4 sm:$0xff]  }
 0x679   : > { %7893 = vmatpush3.bf16.msra.mxu0 %v8435_v42  ;;  %7896 = vmatprep.mubr.msk.bf16.mxu0 %vm8698_vm0, %v8697_v14  ;;  %v8454_v42 = vld [vmem:[%s10502_s15 + $0x50] ss:$8 sps:$4 sm:$0xff]  }
 0x67a   : > { %7894 = vmatprep.subr.bf16.mxu0 %v8697_v14  ;;  %v8460_v47 = vld [vmem:[%s10502_s15 + $0x70] ss:$8 sps:$4 sm:$0xff]  }
 0x67d   : > { %v3017_v49 = vpop.f32.mrb[44].mxu1  ;;  %7895 = vmatpush3.bf16.msra.mxu0 %v8436_v48 }
 0x67e   : > { %v3116_v51 = vpack.c.bf16 %v3017_v49, %v3017_v49  ;;  %v7862_v52 = vpop.f32.mrb[45].mxu1  ;;  %3503 = vmatprep.subr.bf16.mxu0 %v8441_v29 }
 0x67f   : > { %v3020_v53 = vpop.f32.mrb[46].mxu1  ;;  %v6690_v52 = vld [vmem:[%s10500_s13] ss:$0 sm:$0xff] }
 0x680   : > { %v7863_v54 = vpop.f32.mrb[47].mxu1  ;;  %7889 = vmatmul.mubr.msk.bf16.vlgmr.msra.gmra.mrb[52].mxu1 %vm2684_vm1, %v3116_v51 }
 0x681   : > { %7901 = vmatpush3.bf16.msra.mxu1 %v8437_v50  ;;  %7904 = vmatprep.mubr.msk.bf16.mxu1 %vm8698_vm0, %v8697_v14  ;;  %v6691_v54 = vld [vmem:[%s10501_s14] ss:$0 sm:$0xff] }
 0x682   : > { %7902 = vmatprep.subr.bf16.mxu1 %v8697_v14 }
 0x685   : > { %7903 = vmatpush3.bf16.msra.mxu1 %v8438_v55 }
 0x695   : > { %v3063_v56 = vpop.f32.mrb[36].mxu0 }
 0x696   : > { %v3117_v57 = vpack.c.bf16 %v3063_v56, %v3063_v56  ;;  %v7868_v58 = vpop.f32.mrb[37].mxu0 }
 0x697   : > { %v3066_v59 = vpop.f32.mrb[38].mxu0  ;;  %v8463_v58 = vld [vmem:[%s10504_s17 + $0x40] sm:$0xff]  }
 0x698   : > { %v7869_v60 = vpop.f32.mrb[39].mxu0  ;;  %7897 = vmatmul.mubr.msk.bf16.vlgmr.msra.gmra.mrb[44].mxu0 %vm2684_vm1, %v3117_v57  ;;  %v8464_v59 = vld [vmem:[%s10504_s17] sm:$0xff]   ;;  %7390 = vmatprep.subr.bf16.mxu1 %v8463_v58  ;;  %v8484_v58 = vld [vmem:[%s10542_s8 + $0x150] sm:$0xff]  }
 0x699   : > { %3504 = vmatpush1.bf16.msra.mxu0 %v8439_v28  ;;  %3535 = vmatprep.mubr.bf16.mxu0 %v8700_v41  ;;  %v8465_v60 = vld [vmem:[%s10504_s17 + $0x48] sm:$0xff]  }
 0x69a   : > { %3505 = vmatprep.subr.bf16.mxu0 %v8444_v13 }
 0x69d   : > { %v3109_v61 = vpop.f32.mrb[48].mxu1 }
 0x69e   : > { %v3118_v62 = vpack.c.bf16 %v3109_v61, %v3109_v61  ;;  %v7874_v63 = vpop.f32.mrb[49].mxu1  ;;  %v8466_v61 = vld [vmem:[%s10504_s17 + $0x8] sm:$0xff]  }
 0x69f   : > { %v3112_v0 = vpop.f32.mrb[50].mxu1  ;;  %v8468_v63 = vld [vmem:[%s10504_s17 + $0x10] sm:$0xff]  }
 0x6a0   : > { %v7875_v1 = vpop.f32.mrb[51].mxu1  ;;  %7905 = vmatmul.mubr.msk.bf16.vlgmr.msra.gmra.mrb[56].mxu1 %vm2684_vm1, %v3118_v62  ;;  %v8467_v62 = vld [vmem:[%s10504_s17 + $0x50] sm:$0xff]   ;;  %v8469_v0 = vld [vmem:[%s10504_s17 + $0x58] sm:$0xff]  }
 0x6a1   : > { %7391 = vmatpush3.bf16.msra.mxu1 %v8464_v59  ;;  %v8470_v1 = vld [vmem:[%s10504_s17 + $0x18] sm:$0xff]  }
 0x6a2   : > { %7392 = vmatprep.subr.bf16.mxu1 %v8465_v60 }
 0x6a5   : > { %7393 = vmatpush3.bf16.msra.mxu1 %v8466_v61 }
 0x6a6   : > { %7394 = vmatprep.subr.bf16.mxu1 %v8467_v62 }
 0x6a9   : > { %7395 = vmatpush3.bf16.msra.mxu1 %v8468_v63  ;;  %v8485_v63 = vld [vmem:[%s10542_s8 + $0x118] sm:$0xff]  }
 0x6aa   : > { %7396 = vmatprep.subr.bf16.mxu1 %v8469_v0  ;;  %v8486_v0 = vld [vmem:[%s10542_s8 + $0x158] sm:$0xff]  }
 0x6ad   : > { %7397 = vmatpush3.bf16.msra.mxu1 %v8470_v1  ;;  %v8487_v1 = vld [vmem:[%s10542_s8 + $0x120] sm:$0xff]  }
 0x74b   : > { %v3184_v2 = vpop.f32.mrb[40].mxu0 }
 0x74c   : > { %v7882_v3 = vpop.f32.mrb[41].mxu0 }
 0x74d   : > { %v3187_v4 = vpop.f32.mrb[42].mxu0  ;;  %v8472_v3 = vld [vmem:[%s10504_s17 + $0x20] sm:$0xff]  }
 0x74e   : > { %v7883_v5 = vpop.f32.mrb[43].mxu0  ;;  %v8473_v4 = vld [vmem:[%s10504_s17 + $0x68] sm:$0xff]  }
 0x74f   : > { %v8474_v5 = vld [vmem:[%s10504_s17 + $0x28] sm:$0xff]  }
 0x753   : > { %v3239_v6 = vpop.f32.mrb[52].mxu1 }
 0x754   : > { %v3355_v7 = vadd.f32 %v3239_v6, %v3184_v2  ;;  %v7890_v8 = vpop.f32.mrb[53].mxu1  ;;  %v8471_v2 = vld [vmem:[%s10504_s17 + $0x60] sm:$0xff]   ;;  %v8475_v6 = vld [vmem:[%s10504_s17 + $0x70] sm:$0xff]  }
 0x755   : > { %v3242_v9 = vpop.f32.mrb[54].mxu1  ;;  %7398 = vmatprep.subr.bf16.mxu1 %v8471_v2  ;;  %v8477_v8 = vld [vmem:[%s10504_s17 + $0x78] sm:$0xff]   ;;  %v8488_v2 = vld [vmem:[%s10542_s8 + $0x160] sm:$0xff]  }
 0x756   : > { %v7891_v44 = vpop.f32.mrb[55].mxu1  ;;  %7399 = vmatpush3.bf16.msra.mxu1 %v8472_v3  ;;  %v8478_v9 = vld [vmem:[%s10504_s17 + $0x38] sm:$0xff]   ;;  %v8489_v3 = vld [vmem:[%s10542_s8 + $0x128] sm:$0xff]  }
 0x757   : > { %7400 = vmatprep.subr.bf16.mxu1 %v8473_v4  ;;  %v9696_v44 = vshrl.u32 %v781_v21, 7  ;;  %v8490_v4 = vld [vmem:[%s10542_s8 + $0x168] sm:$0xff]  }
 0x75a   : > { %7401 = vmatpush3.bf16.msra.mxu1 %v8474_v5  ;;  %v8491_v5 = vld [vmem:[%s10542_s8 + $0x130] sm:$0xff]  }
 0x75b   : > { %7402 = vmatprep.subr.bf16.mxu1 %v8475_v6  ;;  %v8492_v6 = vld [vmem:[%s10542_s8 + $0x170] sm:$0xff]  }
 0x76b   : > { %v3294_v10 = vpop.f32.mrb[44].mxu0 }
 0x76c   : > { %v3356_v15 = vadd.f32 %v3355_v7, %v3294_v10  ;;  %v7898_v16 = vpop.f32.mrb[45].mxu0  ;;  %v8476_v7 = vld [vmem:[%s10504_s17 + $0x30] sm:$0xff]   ;;  %v3415_v10 = vsub.s32 0, %v9696_v44 }
 0x76d   : > { %v3297_v17 = vpop.f32.mrb[46].mxu0  ;;  %7403 = vmatpush3.bf16.msra.mxu1 %v8476_v7  ;;  %v3419_v16 = vsub.s32 1, %v9696_v44  ;;  %v8493_v7 = vld [vmem:[%s10542_s8 + $0x138] sm:$0xff]  }
 0x76e   : > { %v7899_v18 = vpop.f32.mrb[47].mxu0  ;;  %7404 = vmatprep.subr.bf16.mxu1 %v8477_v8  ;;  %v8494_v8 = vld [vmem:[%s10542_s8 + $0x178] sm:$0xff]  }
 0x771   : > { %7405 = vmatpush3.bf16.msra.mxu1 %v8478_v9 }
 0x772   : > { %7928 = vmatprep.subr.bf16.mxu1 %v8697_v14 }
 0x773   : > { %v3349_v19 = vpop.f32.mrb[56].mxu1 }
 0x774   : > { %v3357_v20 = vadd.f32 %v3356_v15, %v3349_v19  ;;  %v7906_v22 = vpop.f32.mrb[57].mxu1  ;;  %v3411_v15 = vld [vmem:[%s10503_s16] sm:$0x3] }
 0x775   : > { %v3352_v23 = vpop.f32.mrb[58].mxu1  ;;  %v3416_v17 = vrot.slane %v3411_v15, %v3415_v10  ;;  %v3420_v18 = vrot.slane %v3411_v15, %v3419_v16 }
 0x776   : > { %v3358_v12 = vadd.f32 %v3357_v20, %v9004_v11  ;;  %v7907_v26 = vpop.f32.mrb[59].mxu1  ;;  %v8442_v11 = vld [vmem:[%s10502_s15 + $0x10] ss:$8 sps:$4 sm:$0xff]  }
 0x777   : > { %3506 = vmatpush1.bf16.msra.mxu0 %v8442_v11 }
 0x778   : > { %v9584_v27 = vadd.f32 %v6689_v24, %v3358_v12  ;;  %3507 = vmatprep.subr.bf16.mxu0 %v8447_v30 }
 0x77a   : > { %3369 = vadd.xlane.f32.xlu0 %v9584_v27 }
 0x77b   : > { %3508 = vmatpush1.bf16.msra.mxu0 %v8445_v31 }
 0x77c   : > { %3509 = vmatprep.subr.bf16.mxu0 %v8450_v36 }
 0x77f   : > { %3510 = vmatpush1.bf16.msra.mxu0 %v8448_v37 }
 0x780   : > { %3511 = vmatprep.subr.bf16.mxu0 %v8453_v38 }
 0x783   : > { %3512 = vmatpush1.bf16.msra.mxu0 %v8451_v39 }
 0x784   : > { %3513 = vmatprep.subr.bf16.mxu0 %v8456_v40 }
 0x787   : > { %3514 = vmatpush1.bf16.msra.mxu0 %v8454_v42 }
 0x788   : > { %3515 = vmatprep.subr.bf16.mxu0 %v8459_v43 }
 0x78b   : > { %3516 = vmatpush1.bf16.msra.mxu0 %v8457_v45 }
 0x78c   : > { %3517 = vmatprep.subr.bf16.mxu0 %v8462_v46 }
 0x78f   : > { %3518 = vmatpush1.bf16.msra.mxu0 %v8460_v47 }
 0x790   : > { %7908 = vmatprep.subr.bf16.mxu0 %v8697_v14 }
 0x807   : > { %v3370_v32 = vpop.xlane.xlu0 %3369 }
 0x808   : > { %v3371_v33 = vmul.f32 0.0078125, %v3370_v32 }
 0x80a   : > { %v3372_v34 = vsub.f32 %v9584_v27, %v3371_v33 }
 0x80c   : > { %v3373_v35 = vmul.f32 %v3372_v34, %v3372_v34 }
 0x80e   : > { %3374 = vadd.xlane.f32.xlu1 %v3373_v35 }
 0x89b   : > { %v3375_v48 = vpop.xlane.xlu1 %3374 }
 0x89c   : > { %v3376_v49 = vmul.f32 0.0078125, %v3375_v48 }
 0x89e   : > { %v3377_v50 = vadd.f32 1e-06, %v3376_v49 }
 0x8a0   : > { %8657 = vrsqrt.f32 %v3377_v50 }
 0x8aa   : > { %v8658_v51 = vpop.eup %8657 }
 0x8ab   : > { %v3379_v53 = vmul.f32 %v8658_v51, %v3372_v34  ;;  %v6724_v51 = vld [vmem:[%s10505_s18] ss:$0 sm:$0xff] }
 0x8ad   : > { %v3386_v55 = vmul.f32 %v6690_v52, %v3379_v53 }
 0x8af   : > { %v3393_v56 = vadd.f32 %v6691_v54, %v3386_v55  ;;  %v8479_v54 = vld [vmem:[%s10542_s8 + $0x100] sm:$0xff]  }
 0x8b0   : > { %v8480_v55 = vld [vmem:[%s10542_s8 + $0x140] sm:$0xff]  }
 0x8b1   : > { %v3410_v57 = vpack.c.bf16 %v3393_v56, %v3393_v56  ;;  %v8481_v56 = vld [vmem:[%s10542_s8 + $0x108] sm:$0xff]  }
 0x8b3   : > { %3536 = vmatmul.mubr.bf16.vlgmr.msra.gmra.mrb[48].mxu0 %v3410_v57  ;;  %v8483_v57 = vld [vmem:[%s10542_s8 + $0x110] sm:$0xff]  }
 0x8b4   : > { %7924 = vmatprep.mubr.msk.bf16.mxu0 %vm8698_vm0, %v8697_v14  ;;  %7909 = vmatpush3.bf16.msra.mxu0 %v8479_v54  ;;  %v8522_v54 = vld [vmem:[%s10545_s6 + $0x168] sm:$0xff]  }
 0x8b5   : > { %7910 = vmatprep.subr.bf16.mxu0 %v8697_v14 }
 0x8b8   : > { %7911 = vmatpush3.bf16.msra.mxu0 %v8481_v56  ;;  %v8524_v56 = vld [vmem:[%s10545_s6 + $0x170] sm:$0xff]  }
 0x8b9   : > { %7912 = vmatprep.subr.bf16.mxu0 %v8697_v14 }
 0x8bc   : > { %7913 = vmatpush3.bf16.msra.mxu0 %v8483_v57  ;;  %v8526_v57 = vld [vmem:[%s10545_s6 + $0x178] sm:$0xff]  }
 0x8bd   : > { %7914 = vmatprep.subr.bf16.mxu0 %v8697_v14 }
 0x8c0   : > { %7915 = vmatpush3.bf16.msra.mxu0 %v8485_v63  ;;  %v8532_v63 = vld [vmem:[%s10545_s6 + $0x1d0] sm:$0xff]  }
 0x8c1   : > { %7916 = vmatprep.subr.bf16.mxu0 %v8697_v14 }
 0x8c4   : > { %7917 = vmatpush3.bf16.msra.mxu0 %v8487_v1  ;;  %v8534_v1 = vld [vmem:[%s10545_s6 + $0x1d8] sm:$0xff]  }
 0x8c5   : > { %7918 = vmatprep.subr.bf16.mxu0 %v8697_v14 }
 0x8c8   : > { %7919 = vmatpush3.bf16.msra.mxu0 %v8489_v3  ;;  %v8536_v3 = vld [vmem:[%s10545_s6 + $0x1e0] sm:$0xff]  }
 0x8c9   : > { %7920 = vmatprep.subr.bf16.mxu0 %v8697_v14 }
 0x8cc   : > { %7921 = vmatpush3.bf16.msra.mxu0 %v8491_v5  ;;  %v8538_v5 = vld [vmem:[%s10545_s6 + $0x1e8] sm:$0xff]  }
 0x8cd   : > { %7922 = vmatprep.subr.bf16.mxu0 %v8697_v14 }
 0x8d0   : > { %7923 = vmatpush3.bf16.msra.mxu0 %v8493_v7  ;;  %v8540_v7 = vld [vmem:[%s10545_s6 + $0x1f0] sm:$0xff]  }
 0x8d1   : > { %7948 = vmatprep.subr.bf16.mxu0 %v8697_v14 }
 0x986   : > { %v3537_v19 = vpop.f32.mrb[48].mxu0 }
 0x987   : > { %v3538_v20 = vadd.f32 %v3537_v19, %v3416_v17  ;;  %v3539_v22 = vpop.f32.mrb[49].mxu0  ;;  %v6727_v19 = vld [vmem:[%s10543_s27 + $0x1] ss:$0 sm:$0xff] }
 0x988   : > { %v3540_v23 = vadd.f32 %v3539_v22, %v3420_v18  ;;  %v3541_v21 = vpop.f32.mrb[50].mxu0  ;;  %v6728_v22 = vld [vmem:[%s10544_s1 + $0x1] ss:$0 sm:$0xff] }
 0x989   : > { %v3544_v24 = vmul.f32 %v3538_v20, %v3538_v20  ;;  %v3542_v12 = vpop.f32.mrb[51].mxu0 }
 0x98a   : > { %v3545_v26 = vmul.f32 %v3540_v23, %v3540_v23  ;;  %v8496_v12 = vld [vmem:[%s10542_s8 + $0x1c0] sm:$0xff]  }
 0x98b   : > { %v3546_v28 = vmul.f32 %v3544_v24, %v3538_v20  ;;  %v8495_v24 = vld [vmem:[%s10542_s8 + $0x180] sm:$0xff]  }
 0x98c   : > { %v3547_v29 = vmul.f32 %v3545_v26, %v3540_v23 }
 0x98d   : > { %v3548_v13 = vmul.f32 0.044715, %v3546_v28  ;;  %v8497_v28 = vld [vmem:[%s10542_s8 + $0x188] sm:$0xff]  }
 0x98e   : > { %v3549_v11 = vmul.f32 0.044715, %v3547_v29  ;;  %v8498_v29 = vld [vmem:[%s10542_s8 + $0x1c8] sm:$0xff]  }
 0x98f   : > { %v3550_v30 = vadd.f32 %v3548_v13, %v3538_v20  ;;  %v8499_v13 = vld [vmem:[%s10542_s8 + $0x190] sm:$0xff]  }
 0x990   : > { %v3551_v31 = vadd.f32 %v3549_v11, %v3540_v23  ;;  %v8500_v11 = vld [vmem:[%s10542_s8 + $0x1d0] sm:$0xff]  }
 0x991   : > { %v3552_v32 = vmul.f32 0.7978846, %v3550_v30  ;;  %v8501_v30 = vld [vmem:[%s10542_s8 + $0x198] sm:$0xff]  }
 0x992   : > { %v3553_v33 = vmul.f32 0.7978846, %v3551_v31  ;;  %v8502_v31 = vld [vmem:[%s10542_s8 + $0x1d8] sm:$0xff]  }
 0x993   : > { %8659 = vtanh.f32 %v3552_v32  ;;  %v8503_v32 = vld [vmem:[%s10542_s8 + $0x1a0] sm:$0xff]  }
 0x994   : > { %8661 = vtanh.f32 %v3553_v33  ;;  %v8504_v33 = vld [vmem:[%s10542_s8 + $0x1e0] sm:$0xff]  }
 0x99d   : > { %v8660_v34 = vpop.eup %8659 }
 0x99e   : > { %v8662_v35 = vpop.eup %8661  ;;  %v3556_v36 = vadd.f32 1.0, %v8660_v34  ;;  %v8505_v34 = vld [vmem:[%s10542_s8 + $0x1a8] sm:$0xff]  }
 0x99f   : > { %v3557_v37 = vadd.f32 1.0, %v8662_v35  ;;  %v8506_v35 = vld [vmem:[%s10542_s8 + $0x1e8] sm:$0xff]  }
 0x9a0   : > { %v3558_v38 = vmul.f32 0.5, %v3556_v36  ;;  %v8507_v36 = vld [vmem:[%s10542_s8 + $0x1b0] sm:$0xff]  }
 0x9a1   : > { %v3559_v39 = vmul.f32 0.5, %v3557_v37  ;;  %v8508_v37 = vld [vmem:[%s10542_s8 + $0x1f0] sm:$0xff]  }
 0x9a2   : > { %v3560_v40 = vmul.f32 %v3558_v38, %v3538_v20  ;;  %v8509_v38 = vld [vmem:[%s10542_s8 + $0x1b8] sm:$0xff]  }
 0x9a3   : > { %v3561_v42 = vmul.f32 %v3559_v39, %v3540_v23  ;;  %v8510_v39 = vld [vmem:[%s10542_s8 + $0x1f8] sm:$0xff]  }
 0x9a4   : > { %v3594_v45 = vpack.c.bf16 %v3560_v40, %v3560_v40  ;;  %v8511_v40 = vld [vmem:[%s10545_s6 + $0x100] sm:$0xff]  }
 0x9a5   : > { %v3595_v43 = vpack.c.bf16 %v3561_v42, %v3561_v42  ;;  %v8512_v42 = vld [vmem:[%s10545_s6 + $0x140] sm:$0xff]  }
 0x9a7   : > { %3724 = vmatprep.mubr.bf16.mxu1 %v3595_v43  ;;  %v8513_v43 = vld [vmem:[%s10545_s6 + $0x108] sm:$0xff]  }
 0x9a8   : > { %3725 = vmatmul.mubr.bf16.vlgmr.msra.gmra.mrb[60].mxu1 %v3594_v45  ;;  %v8514_v45 = vld [vmem:[%s10545_s6 + $0x148] sm:$0xff]  }
 0x9a9   : > { %7944 = vmatprep.mubr.msk.bf16.mxu1 %vm8698_vm0, %v8697_v14  ;;  %7929 = vmatpush3.bf16.msra.mxu1 %v8480_v55  ;;  %v8523_v55 = vld [vmem:[%s10545_s6 + $0x130] sm:$0xff]  }
 0x9aa   : > { %7930 = vmatprep.subr.bf16.mxu1 %v8697_v14 }
 0xa7b   : > { %v7406_v46 = vpop.f32.mrb[60].mxu1 }
 0xa7c   : > { %v7407_v47 = vpop.f32.mrb[61].mxu1 }
 0xa7d   : > { %v7408_v48 = vadd.f32 %v7407_v47, %v7406_v46  ;;  %v7409_v49 = vpop.f32.mrb[62].mxu1  ;;  %v8515_v46 = vld [vmem:[%s10545_s6 + $0x110] sm:$0xff]  }
 0xa7e   : > { %v7410_v50 = vpop.f32.mrb[63].mxu1  ;;  %v8516_v47 = vld [vmem:[%s10545_s6 + $0x150] sm:$0xff]   ;;  %v8518_v49 = vld [vmem:[%s10545_s6 + $0x158] sm:$0xff]  }
 0xa7f   : > { %v3732_v52 = vadd.f32 %v7408_v48, %v9584_v27  ;;  %v8482_v27 = vld [vmem:[%s10542_s8 + $0x148] sm:$0xff]   ;;  %v8517_v48 = vld [vmem:[%s10545_s6 + $0x118] sm:$0xff]   ;;  %v8519_v50 = vld [vmem:[%s10545_s6 + $0x120] sm:$0xff]  }
 0xa80   : > { %7931 = vmatpush3.bf16.msra.mxu1 %v8482_v27  ;;  %v8525_v27 = vld [vmem:[%s10545_s6 + $0x138] sm:$0xff]  }
 0xa81   : > { %v9713_v53 = vadd.f32 %v6724_v51, %v3732_v52  ;;  %7932 = vmatprep.subr.bf16.mxu1 %v8697_v14  ;;  %v8520_v51 = vld [vmem:[%s10545_s6 + $0x160] sm:$0xff]   ;;  %v8521_v52 = vld [vmem:[%s10545_s6 + $0x128] sm:$0xff]  }
 0xa83   : > { %3745 = vadd.xlane.f32.xlu0 %v9713_v53 }
 0xa84   : > { %7933 = vmatpush3.bf16.msra.mxu1 %v8484_v58  ;;  %v8527_v58 = vld [vmem:[%s10545_s6 + $0x180] sm:$0xff]  }
 0xa85   : > { %7934 = vmatprep.subr.bf16.mxu1 %v8697_v14 }
 0xa88   : > { %7935 = vmatpush3.bf16.msra.mxu1 %v8486_v0  ;;  %v8533_v0 = vld [vmem:[%s10545_s6 + $0x198] sm:$0xff]  }
 0xa89   : > { %7936 = vmatprep.subr.bf16.mxu1 %v8697_v14 }
 0xa8c   : > { %7937 = vmatpush3.bf16.msra.mxu1 %v8488_v2  ;;  %v8535_v2 = vld [vmem:[%s10545_s6 + $0x1a0] sm:$0xff]  }
 0xa8d   : > { %7938 = vmatprep.subr.bf16.mxu1 %v8697_v14 }
 0xa90   : > { %7939 = vmatpush3.bf16.msra.mxu1 %v8490_v4  ;;  %v8537_v4 = vld [vmem:[%s10545_s6 + $0x1a8] sm:$0xff]  }
 0xa91   : > { %7940 = vmatprep.subr.bf16.mxu1 %v8697_v14 }
 0xa94   : > { %7941 = vmatpush3.bf16.msra.mxu1 %v8492_v6  ;;  %v8539_v6 = vld [vmem:[%s10545_s6 + $0x1b0] sm:$0xff]  }
 0xa95   : > { %7942 = vmatprep.subr.bf16.mxu1 %v8697_v14 }
 0xa98   : > { %7943 = vmatpush3.bf16.msra.mxu1 %v8494_v8  ;;  %v8541_v8 = vld [vmem:[%s10545_s6 + $0x1b8] sm:$0xff]  }
 0xa99   : > { %7968 = vmatprep.subr.bf16.mxu1 %v8697_v14 }
 0xb10   : > { %v3746_v59 = vpop.xlane.xlu0 %3745 }
 0xb11   : > { %v3747_v60 = vmul.f32 0.0078125, %v3746_v59  ;;  %v8528_v59 = vld [vmem:[%s10545_s6 + $0x1c0] sm:$0xff]  }
 0xb13   : > { %v3748_v61 = vsub.f32 %v9713_v53, %v3747_v60  ;;  %v8529_v60 = vld [vmem:[%s10545_s6 + $0x188] sm:$0xff]  }
 0xb15   : > { %v3749_v62 = vmul.f32 %v3748_v61, %v3748_v61 }
 0xb17   : > { %3750 = vadd.xlane.f32.xlu1 %v3749_v62  ;;  %v8531_v62 = vld [vmem:[%s10545_s6 + $0x190] sm:$0xff]  }
 0xba4   : > { %v3751_v9 = vpop.xlane.xlu1 %3750 }
 0xba5   : > { %v3752_v15 = vmul.f32 0.0078125, %v3751_v9  ;;  %v8542_v9 = vld [vmem:[%s10545_s6 + $0x1f8] sm:$0xff]  }
 0xba7   : > { %v3753_v17 = vadd.f32 1e-06, %v3752_v15  ;;  %v8543_v15 = vld [vmem:[%s10546_s0 + $0x100] sm:$0xff]  }
 0xba9   : > { %8663 = vrsqrt.f32 %v3753_v17  ;;  %v8544_v17 = vld [vmem:[%s10546_s0 + $0x140] sm:$0xff]  }
 0xbb3   : > { %v8664_v18 = vpop.eup %8663 }
 0xbb4   : > { %v3755_v20 = vmul.f32 %v8664_v18, %v3748_v61  ;;  %v8530_v61 = vld [vmem:[%s10545_s6 + $0x1c8] sm:$0xff]  }
 0xbb5   : > { %v8545_v18 = vld [vmem:[%s10546_s0 + $0x108] sm:$0xff]  }
 0xbb6   : > { %v3762_v23 = vmul.f32 %v6727_v19, %v3755_v20  ;;  %v8546_v19 = vld [vmem:[%s10546_s0 + $0x148] sm:$0xff]   ;;  %v8547_v20 = vld [vmem:[%s10546_s0 + $0x110] sm:$0xff]  }
 0xbb8   : > { %v3769_v21 = vadd.f32 %v6728_v22, %v3762_v23  ;;  %v8548_v22 = vld [vmem:[%s10546_s0 + $0x150] sm:$0xff]   ;;  %v8549_v23 = vld [vmem:[%s10546_s0 + $0x118] sm:$0xff]  }
 0xbba   : > { %v9793_v26 = vpack.c.bf16 %v3769_v21, %v3769_v21  ;;  %v8550_v21 = vld [vmem:[%s10546_s0 + $0x158] sm:$0xff]  }
 0xbbc   : > { %7925 = vmatmul.mubr.bf16.vlgmr.msra.gmra.mrb[52].mxu0 %v9793_v26  ;;  %7945 = vmatmul.mubr.bf16.vlgmr.msra.gmra.mrb[64].mxu1 %v9793_v26 }
 0xbbd   : > { %7949 = vmatpush3.bf16.msra.mxu0 %v8495_v24  ;;  %7969 = vmatpush3.bf16.msra.mxu1 %v8496_v12  ;;  %v8551_v24 = vld [vmem:[%s10546_s0 + $0x120] sm:$0xff]  }
 0xbbe   : > { %7950 = vmatprep.subr.bf16.mxu0 %v8697_v14  ;;  %7970 = vmatprep.subr.bf16.mxu1 %v8697_v14  ;;  %v8552_v12 = vld [vmem:[%s10546_s0 + $0x160] sm:$0xff]  }
 0xbbf   : > { %7964 = vmatprep.mubr.msk.bf16.mxu0 %vm8698_vm0, %v8697_v14  ;;  %7984 = vmatprep.mubr.msk.bf16.mxu1 %vm8698_vm0, %v8697_v14 }
 0xbc1   : > { %7951 = vmatpush3.bf16.msra.mxu0 %v8497_v28  ;;  %7971 = vmatpush3.bf16.msra.mxu1 %v8498_v29  ;;  %v8553_v28 = vld [vmem:[%s10546_s0 + $0x128] sm:$0xff]  }
 0xbc2   : > { %7952 = vmatprep.subr.bf16.mxu0 %v8697_v14  ;;  %7972 = vmatprep.subr.bf16.mxu1 %v8697_v14  ;;  %v8554_v29 = vld [vmem:[%s10546_s0 + $0x168] sm:$0xff]  }
 0xbc5   : > { %7953 = vmatpush3.bf16.msra.mxu0 %v8499_v13  ;;  %7973 = vmatpush3.bf16.msra.mxu1 %v8500_v11  ;;  %v8555_v13 = vld [vmem:[%s10546_s0 + $0x130] sm:$0xff]  }
 0xbc6   : > { %7954 = vmatprep.subr.bf16.mxu0 %v8697_v14  ;;  %7974 = vmatprep.subr.bf16.mxu1 %v8697_v14  ;;  %v8556_v11 = vld [vmem:[%s10546_s0 + $0x170] sm:$0xff]  }
 0xbc9   : > { %7955 = vmatpush3.bf16.msra.mxu0 %v8501_v30  ;;  %7975 = vmatpush3.bf16.msra.mxu1 %v8502_v31  ;;  %v8557_v30 = vld [vmem:[%s10546_s0 + $0x138] sm:$0xff]  }
 0xbca   : > { %7956 = vmatprep.subr.bf16.mxu0 %v8697_v14  ;;  %7976 = vmatprep.subr.bf16.mxu1 %v8697_v14  ;;  %v8558_v31 = vld [vmem:[%s10546_s0 + $0x178] sm:$0xff]  }
 0xbcd   : > { %7957 = vmatpush3.bf16.msra.mxu0 %v8503_v32  ;;  %7977 = vmatpush3.bf16.msra.mxu1 %v8504_v33  ;;  %v8559_v32 = vld [vmem:[%s10546_s0 + $0x180] sm:$0xff]  }
 0xbce   : > { %7958 = vmatprep.subr.bf16.mxu0 %v8697_v14  ;;  %7978 = vmatprep.subr.bf16.mxu1 %v8697_v14  ;;  %v8560_v33 = vld [vmem:[%s10546_s0 + $0x1c0] sm:$0xff]  }
 0xbd1   : > { %7959 = vmatpush3.bf16.msra.mxu0 %v8505_v34  ;;  %7979 = vmatpush3.bf16.msra.mxu1 %v8506_v35  ;;  %v8561_v34 = vld [vmem:[%s10546_s0 + $0x188] sm:$0xff]  }
 0xbd2   : > { %7960 = vmatprep.subr.bf16.mxu0 %v8697_v14  ;;  %7980 = vmatprep.subr.bf16.mxu1 %v8697_v14  ;;  %v8562_v35 = vld [vmem:[%s10546_s0 + $0x1c8] sm:$0xff]  }
 0xbd5   : > { %7961 = vmatpush3.bf16.msra.mxu0 %v8507_v36  ;;  %7981 = vmatpush3.bf16.msra.mxu1 %v8508_v37  ;;  %v8563_v36 = vld [vmem:[%s10546_s0 + $0x190] sm:$0xff]  }
 0xbd6   : > { %7962 = vmatprep.subr.bf16.mxu0 %v8697_v14  ;;  %7982 = vmatprep.subr.bf16.mxu1 %v8697_v14  ;;  %v8564_v37 = vld [vmem:[%s10546_s0 + $0x1d0] sm:$0xff]  }
 0xbd9   : > { %7963 = vmatpush3.bf16.msra.mxu0 %v8509_v38  ;;  %7983 = vmatpush3.bf16.msra.mxu1 %v8510_v39  ;;  %v8565_v38 = vld [vmem:[%s10546_s0 + $0x198] sm:$0xff]  }
 0xbda   : > { %7988 = vmatprep.subr.bf16.mxu0 %v8697_v14  ;;  %8008 = vmatprep.subr.bf16.mxu1 %v8697_v14  ;;  %v8566_v39 = vld [vmem:[%s10546_s0 + $0x1d8] sm:$0xff]  }
 0xbdc   : > { %7965 = vmatmul.mubr.bf16.vlgmr.msra.gmra.mrb[56].mxu0 %v9793_v26  ;;  %7985 = vmatmul.mubr.bf16.vlgmr.msra.gmra.mrb[68].mxu1 %v9793_v26 }
 0xbdd   : > { %7989 = vmatpush3.bf16.msra.mxu0 %v8511_v40  ;;  %8009 = vmatpush3.bf16.msra.mxu1 %v8512_v42  ;;  %v8567_v40 = vld [vmem:[%s10546_s0 + $0x1a0] sm:$0xff]  }
 0xbde   : > { %7990 = vmatprep.subr.bf16.mxu0 %v8697_v14  ;;  %8010 = vmatprep.subr.bf16.mxu1 %v8697_v14  ;;  %v8568_v42 = vld [vmem:[%s10546_s0 + $0x1e0] sm:$0xff]  }
 0xbdf   : > { %8004 = vmatprep.mubr.msk.bf16.mxu0 %vm8698_vm0, %v8697_v14  ;;  %8024 = vmatprep.mubr.msk.bf16.mxu1 %vm8698_vm0, %v8697_v14 }
 0xbe1   : > { %7991 = vmatpush3.bf16.msra.mxu0 %v8513_v43  ;;  %8011 = vmatpush3.bf16.msra.mxu1 %v8514_v45  ;;  %v8569_v43 = vld [vmem:[%s10546_s0 + $0x1a8] sm:$0xff]  }
 0xbe2   : > { %7992 = vmatprep.subr.bf16.mxu0 %v8697_v14  ;;  %8012 = vmatprep.subr.bf16.mxu1 %v8697_v14  ;;  %v8570_v45 = vld [vmem:[%s10546_s0 + $0x1e8] sm:$0xff]  }
 0xbe5   : > { %7993 = vmatpush3.bf16.msra.mxu0 %v8515_v46  ;;  %8013 = vmatpush3.bf16.msra.mxu1 %v8516_v47  ;;  %v8571_v46 = vld [vmem:[%s10546_s0 + $0x1b0] sm:$0xff]  }
 0xbe6   : > { %7994 = vmatprep.subr.bf16.mxu0 %v8697_v14  ;;  %8014 = vmatprep.subr.bf16.mxu1 %v8697_v14  ;;  %v8572_v47 = vld [vmem:[%s10546_s0 + $0x1f0] sm:$0xff]  }
 0xbe9   : > { %7995 = vmatpush3.bf16.msra.mxu0 %v8517_v48  ;;  %8015 = vmatpush3.bf16.msra.mxu1 %v8518_v49  ;;  %v8573_v48 = vld [vmem:[%s10546_s0 + $0x1b8] sm:$0xff]  }
 0xbea   : > { %7996 = vmatprep.subr.bf16.mxu0 %v8697_v14  ;;  %8016 = vmatprep.subr.bf16.mxu1 %v8697_v14  ;;  %v8574_v49 = vld [vmem:[%s10546_s0 + $0x1f8] sm:$0xff]   ;;  %s779_s0 = scalar_lea.vmem %s10552_s3, %s10551_s30 }
 0xbed   : > { %7997 = vmatpush3.bf16.msra.mxu0 %v8519_v50  ;;  %8017 = vmatpush3.bf16.msra.mxu1 %v8520_v51 }
 0xbee   : > { %7998 = vmatprep.subr.bf16.mxu0 %v8697_v14  ;;  %8018 = vmatprep.subr.bf16.mxu1 %v8697_v14 }
 0xbf1   : > { %7999 = vmatpush3.bf16.msra.mxu0 %v8521_v52  ;;  %8019 = vmatpush3.bf16.msra.mxu1 %v8522_v54 }
 0xbf2   : > { %8000 = vmatprep.subr.bf16.mxu0 %v8697_v14  ;;  %8020 = vmatprep.subr.bf16.mxu1 %v8697_v14 }
 0xbf5   : > { %8001 = vmatpush3.bf16.msra.mxu0 %v8523_v55  ;;  %8021 = vmatpush3.bf16.msra.mxu1 %v8524_v56 }
 0xbf6   : > { %8002 = vmatprep.subr.bf16.mxu0 %v8697_v14  ;;  %8022 = vmatprep.subr.bf16.mxu1 %v8697_v14 }
 0xbf9   : > { %8003 = vmatpush3.bf16.msra.mxu0 %v8525_v27  ;;  %8023 = vmatpush3.bf16.msra.mxu1 %v8526_v57 }
 0xbfa   : > { %8028 = vmatprep.subr.bf16.mxu0 %v8697_v14  ;;  %8048 = vmatprep.subr.bf16.mxu1 %v8697_v14 }
 0xbfc   : > { %8005 = vmatmul.mubr.bf16.vlgmr.msra.gmra.mrb[60].mxu0 %v9793_v26  ;;  %8025 = vmatmul.mubr.bf16.vlgmr.msra.gmra.mrb[72].mxu1 %v9793_v26 }
 0xbfd   : > { %8029 = vmatpush3.bf16.msra.mxu0 %v8527_v58  ;;  %8049 = vmatpush3.bf16.msra.mxu1 %v8528_v59 }
 0xbfe   : > { %8030 = vmatprep.subr.bf16.mxu0 %v8697_v14  ;;  %8050 = vmatprep.subr.bf16.mxu1 %v8697_v14 }
 0xbff   : > { %8044 = vmatprep.mubr.msk.bf16.mxu0 %vm8698_vm0, %v8697_v14  ;;  %8064 = vmatprep.mubr.msk.bf16.mxu1 %vm8698_vm0, %v8697_v14 }
 0xc01   : > { %8031 = vmatpush3.bf16.msra.mxu0 %v8529_v60  ;;  %8051 = vmatpush3.bf16.msra.mxu1 %v8530_v61 }
 0xc02   : > { %8032 = vmatprep.subr.bf16.mxu0 %v8697_v14  ;;  %8052 = vmatprep.subr.bf16.mxu1 %v8697_v14 }
 0xc05   : > { %8033 = vmatpush3.bf16.msra.mxu0 %v8531_v62  ;;  %8053 = vmatpush3.bf16.msra.mxu1 %v8532_v63 }
 0xc06   : > { %8034 = vmatprep.subr.bf16.mxu0 %v8697_v14  ;;  %8054 = vmatprep.subr.bf16.mxu1 %v8697_v14 }
 0xc09   : > { %8035 = vmatpush3.bf16.msra.mxu0 %v8533_v0  ;;  %8055 = vmatpush3.bf16.msra.mxu1 %v8534_v1  ;;  %v6901_v1 = vld [vmem:[%s10547_s5 + $0x4] ss:$0 sm:$0xff] }
 0xc0a   : > { %8036 = vmatprep.subr.bf16.mxu0 %v8697_v14  ;;  %8056 = vmatprep.subr.bf16.mxu1 %v8697_v14 }
 0xc0d   : > { %8037 = vmatpush3.bf16.msra.mxu0 %v8535_v2  ;;  %8057 = vmatpush3.bf16.msra.mxu1 %v8536_v3  ;;  %v6902_v2 = vld [vmem:[%s10547_s5 + $0x5] ss:$0 sm:$0xff] }
 0xc0e   : > { %8038 = vmatprep.subr.bf16.mxu0 %v8697_v14  ;;  %8058 = vmatprep.subr.bf16.mxu1 %v8697_v14 }
 0xc11   : > { %8039 = vmatpush3.bf16.msra.mxu0 %v8537_v4  ;;  %8059 = vmatpush3.bf16.msra.mxu1 %v8538_v5 }
 0xc12   : > { %8040 = vmatprep.subr.bf16.mxu0 %v8697_v14  ;;  %8060 = vmatprep.subr.bf16.mxu1 %v8697_v14 }
 0xc15   : > { %8041 = vmatpush3.bf16.msra.mxu0 %v8539_v6  ;;  %8061 = vmatpush3.bf16.msra.mxu1 %v8540_v7 }
 0xc16   : > { %8042 = vmatprep.subr.bf16.mxu0 %v8697_v14  ;;  %8062 = vmatprep.subr.bf16.mxu1 %v8697_v14 }
 0xc19   : > { %8043 = vmatpush3.bf16.msra.mxu0 %v8541_v8  ;;  %8063 = vmatpush3.bf16.msra.mxu1 %v8542_v9 }
 0xc1a   : > { %8068 = vmatprep.subr.bf16.mxu0 %v8697_v14  ;;  %8088 = vmatprep.subr.bf16.mxu1 %v8697_v14 }
 0xc1c   : > { %8045 = vmatmul.mubr.bf16.vlgmr.msra.gmra.mrb[64].mxu0 %v9793_v26  ;;  %8065 = vmatmul.mubr.bf16.vlgmr.msra.gmra.mrb[76].mxu1 %v9793_v26 }
 0xc1d   : > { %8069 = vmatpush3.bf16.msra.mxu0 %v8543_v15  ;;  %8089 = vmatpush3.bf16.msra.mxu1 %v8544_v17 }
 0xc1e   : > { %8070 = vmatprep.subr.bf16.mxu0 %v8697_v14  ;;  %8090 = vmatprep.subr.bf16.mxu1 %v8697_v14 }
 0xc1f   : > { %8084 = vmatprep.mubr.msk.bf16.mxu0 %vm8698_vm0, %v8697_v14  ;;  %8104 = vmatprep.mubr.msk.bf16.mxu1 %vm8698_vm0, %v8697_v14 }
 0xc21   : > { %8071 = vmatpush3.bf16.msra.mxu0 %v8545_v18  ;;  %8091 = vmatpush3.bf16.msra.mxu1 %v8546_v19 }
 0xc22   : > { %8072 = vmatprep.subr.bf16.mxu0 %v8697_v14  ;;  %8092 = vmatprep.subr.bf16.mxu1 %v8697_v14 }
 0xc25   : > { %8073 = vmatpush3.bf16.msra.mxu0 %v8547_v20  ;;  %8093 = vmatpush3.bf16.msra.mxu1 %v8548_v22  ;;  %v6797_v22 = vld [vmem:[%s10548_s9 + $0x4] ss:$0 sm:$0xff] }
 0xc26   : > { %8074 = vmatprep.subr.bf16.mxu0 %v8697_v14  ;;  %8094 = vmatprep.subr.bf16.mxu1 %v8697_v14 }
 0xc29   : > { %8075 = vmatpush3.bf16.msra.mxu0 %v8549_v23  ;;  %8095 = vmatpush3.bf16.msra.mxu1 %v8550_v21  ;;  %v6798_v23 = vld [vmem:[%s10548_s9 + $0x5] ss:$0 sm:$0xff] }
 0xc2a   : > { %8076 = vmatprep.subr.bf16.mxu0 %v8697_v14  ;;  %8096 = vmatprep.subr.bf16.mxu1 %v8697_v14 }
 0xc2d   : > { %8077 = vmatpush3.bf16.msra.mxu0 %v8551_v24  ;;  %8097 = vmatpush3.bf16.msra.mxu1 %v8552_v12 }
 0xc2e   : > { %8078 = vmatprep.subr.bf16.mxu0 %v8697_v14  ;;  %8098 = vmatprep.subr.bf16.mxu1 %v8697_v14 }
 0xc31   : > { %8079 = vmatpush3.bf16.msra.mxu0 %v8553_v28  ;;  %8099 = vmatpush3.bf16.msra.mxu1 %v8554_v29 }
 0xc32   : > { %8080 = vmatprep.subr.bf16.mxu0 %v8697_v14  ;;  %8100 = vmatprep.subr.bf16.mxu1 %v8697_v14 }
 0xc35   : > { %8081 = vmatpush3.bf16.msra.mxu0 %v8555_v13  ;;  %8101 = vmatpush3.bf16.msra.mxu1 %v8556_v11  ;;  %v6903_v11 = vld [vmem:[%s10547_s5 + $0x6] ss:$0 sm:$0xff] }
 0xc36   : > { %8082 = vmatprep.subr.bf16.mxu0 %v8697_v14  ;;  %8102 = vmatprep.subr.bf16.mxu1 %v8697_v14 }
 0xc39   : > { %8083 = vmatpush3.bf16.msra.mxu0 %v8557_v30  ;;  %8103 = vmatpush3.bf16.msra.mxu1 %v8558_v31  ;;  %v6904_v30 = vld [vmem:[%s10547_s5 + $0x7] ss:$0 sm:$0xff] }
 0xc3a   : > { %8108 = vmatprep.subr.bf16.mxu0 %v8697_v14  ;;  %8128 = vmatprep.subr.bf16.mxu1 %v8697_v14 }
 0xc3c   : > { %8085 = vmatmul.mubr.bf16.vlgmr.msra.gmra.mrb[68].mxu0 %v9793_v26  ;;  %8105 = vmatmul.mubr.bf16.vlgmr.msra.gmra.mrb[80].mxu1 %v9793_v26 }
 0xc3d   : > { %8109 = vmatpush3.bf16.msra.mxu0 %v8559_v32  ;;  %8129 = vmatpush3.bf16.msra.mxu1 %v8560_v33 }
 0xc3e   : > { %8110 = vmatprep.subr.bf16.mxu0 %v8697_v14  ;;  %8130 = vmatprep.subr.bf16.mxu1 %v8697_v14 }
 0xc3f   : > { %8124 = vmatprep.mubr.msk.bf16.mxu0 %vm8698_vm0, %v8697_v14  ;;  %8144 = vmatprep.mubr.msk.bf16.mxu1 %vm8698_vm0, %v8697_v14 }
 0xc41   : > { %8111 = vmatpush3.bf16.msra.mxu0 %v8561_v34  ;;  %8131 = vmatpush3.bf16.msra.mxu1 %v8562_v35 }
 0xc42   : > { %8112 = vmatprep.subr.bf16.mxu0 %v8697_v14  ;;  %8132 = vmatprep.subr.bf16.mxu1 %v8697_v14 }
 0xc45   : > { %8113 = vmatpush3.bf16.msra.mxu0 %v8563_v36  ;;  %8133 = vmatpush3.bf16.msra.mxu1 %v8564_v37 }
 0xc46   : > { %8114 = vmatprep.subr.bf16.mxu0 %v8697_v14  ;;  %8134 = vmatprep.subr.bf16.mxu1 %v8697_v14 }
 0xc49   : > { %8115 = vmatpush3.bf16.msra.mxu0 %v8565_v38  ;;  %8135 = vmatpush3.bf16.msra.mxu1 %v8566_v39 }
 0xc4a   : > { %8116 = vmatprep.subr.bf16.mxu0 %v8697_v14  ;;  %8136 = vmatprep.subr.bf16.mxu1 %v8697_v14 }
 0xc4d   : > { %8117 = vmatpush3.bf16.msra.mxu0 %v8567_v40  ;;  %8137 = vmatpush3.bf16.msra.mxu1 %v8568_v42 }
 0xc4e   : > { %8118 = vmatprep.subr.bf16.mxu0 %v8697_v14  ;;  %8138 = vmatprep.subr.bf16.mxu1 %v8697_v14 }
 0xc51   : > { %8119 = vmatpush3.bf16.msra.mxu0 %v8569_v43  ;;  %8139 = vmatpush3.bf16.msra.mxu1 %v8570_v45  ;;  %v6799_v45 = vld [vmem:[%s10548_s9 + $0x6] ss:$0 sm:$0xff] }
 0xc52   : > { %8120 = vmatprep.subr.bf16.mxu0 %v8697_v14  ;;  %8140 = vmatprep.subr.bf16.mxu1 %v8697_v14 }
 0xc55   : > { %8121 = vmatpush3.bf16.msra.mxu0 %v8571_v46  ;;  %8141 = vmatpush3.bf16.msra.mxu1 %v8572_v47  ;;  %v6800_v46 = vld [vmem:[%s10548_s9 + $0x7] ss:$0 sm:$0xff] }
 0xc56   : > { %8122 = vmatprep.subr.bf16.mxu0 %v8697_v14  ;;  %8142 = vmatprep.subr.bf16.mxu1 %v8697_v14 }
 0xc59   : > { %8123 = vmatpush3.bf16.msra.mxu0 %v8573_v48  ;;  %8143 = vmatpush3.bf16.msra.mxu1 %v8574_v49 }
 0xc5a   : > { %8148 = vmatprep.subr.bf16.mxu0 %v8697_v14  ;;  %8154 = vmatprep.subr.bf16.mxu1 %v8697_v14 }
 0xc5c   : > { %8125 = vmatmul.mubr.bf16.vlgmr.msra.gmra.mrb[72].mxu0 %v9793_v26  ;;  %8145 = vmatmul.mubr.bf16.vlgmr.msra.gmra.mrb[84].mxu1 %v9793_v26 }
 0xc5d   : > { %8150 = vmatprep.mubr.msk.bf16.mxu0 %vm8698_vm0, %v8697_v14  ;;  %8156 = vmatprep.mubr.msk.bf16.mxu1 %vm8698_vm0, %v8697_v14 }
 0xc8f   : > { %v3947_v50 = vpop.f32.mrb[52].mxu0  ;;  %v4035_v51 = vpop.f32.mrb[64].mxu1 }
 0xc90   : > { %v7926_v52 = vpop.f32.mrb[53].mxu0  ;;  %v7946_v54 = vpop.f32.mrb[65].mxu1  ;;  %v3948_v12 = vadd.f32 %v6797_v22, %v3947_v50  ;;  %v4036_v28 = vadd.f32 %v6798_v23, %v4035_v51 }
 0xc91   : > { %v3950_v55 = vpop.f32.mrb[54].mxu0  ;;  %v4038_v56 = vpop.f32.mrb[66].mxu1  ;;  %v7005_v54 = vld [vmem:[%s10497_s10 + $0x4] ss:$0 sm:$0xff] }
 0xc92   : > { %v7927_v27 = vpop.f32.mrb[55].mxu0  ;;  %v7947_v57 = vpop.f32.mrb[67].mxu1  ;;  %v5109_v29 = vpack.c.bf16 %v3948_v12, %v3948_v12  ;;  %v5110_v13 = vpack.c.bf16 %v4036_v28, %v4036_v28  ;;  %v7006_v55 = vld [vmem:[%s10497_s10 + $0x5] ss:$0 sm:$0xff] }
 0xcaf   : > { %v4123_v58 = vpop.f32.mrb[56].mxu0  ;;  %v4211_v59 = vpop.f32.mrb[68].mxu1 }
 0xcb0   : > { %v7966_v60 = vpop.f32.mrb[57].mxu0  ;;  %v7986_v61 = vpop.f32.mrb[69].mxu1  ;;  %v4124_v49 = vadd.f32 %v6799_v45, %v4123_v58  ;;  %v4212_v50 = vadd.f32 %v6800_v46, %v4211_v59 }
 0xcb1   : > { %v4126_v62 = vpop.f32.mrb[58].mxu0  ;;  %v4214_v26 = vpop.f32.mrb[70].mxu1 }
 0xcb2   : > { %v7967_v63 = vpop.f32.mrb[59].mxu0  ;;  %v7987_v0 = vpop.f32.mrb[71].mxu1  ;;  %v5111_v51 = vpack.c.bf16 %v4124_v49, %v4124_v49  ;;  %v5112_v52 = vpack.c.bf16 %v4212_v50, %v4212_v50 }
 0xccf   : > { %v4393_v3 = vpop.f32.mrb[60].mxu0  ;;  %v4481_v4 = vpop.f32.mrb[72].mxu1 }
 0xcd0   : > { %v4394_v5 = vadd.f32 %v6901_v1, %v4393_v3  ;;  %v4482_v6 = vadd.f32 %v6902_v2, %v4481_v4  ;;  %v8006_v7 = vpop.f32.mrb[61].mxu0  ;;  %v8026_v8 = vpop.f32.mrb[73].mxu1 }
 0xcd1   : > { %v4396_v9 = vpop.f32.mrb[62].mxu0  ;;  %v4484_v15 = vpop.f32.mrb[74].mxu1 }
 0xcd2   : > { %v5113_v17 = vpack.c.bf16 %v4394_v5, %v4394_v5  ;;  %v5114_v18 = vpack.c.bf16 %v4482_v6, %v4482_v6  ;;  %v8007_v19 = vpop.f32.mrb[63].mxu0  ;;  %v8027_v20 = vpop.f32.mrb[75].mxu1 }
 0xcd4   : > { %v5121_v21 = vsel %vm2684_vm1, %v5113_v17, 0  ;;  %v5167_v24 = vsel %vm2684_vm1, %v5114_v18, 0 }
 0xcd5   : > { %8149 = vmatpush3.bf16.xpose.msra.mxu0 %v5121_v21  ;;  %8155 = vmatpush3.bf16.xpose.msra.mxu1 %v5167_v24 }
 0xcd6   : > { %8160 = vmatprep.subr.bf16.mxu0 %v8697_v14  ;;  %8166 = vmatprep.subr.bf16.mxu1 %v8697_v14 }
 0xcdc   : > { %8151 = vmatmul.mubr.msk.bf16.vlgmr.msra.gmra.mrb[76].mxu0 %vm2684_vm1, %v5109_v29  ;;  %8157 = vmatmul.mubr.msk.bf16.vlgmr.msra.gmra.mrb[88].mxu1 %vm2684_vm1, %v5110_v13 }
 0xcdd   : > { %8162 = vmatprep.mubr.msk.bf16.mxu0 %vm8698_vm0, %v8697_v14  ;;  %8168 = vmatprep.mubr.msk.bf16.mxu1 %vm8698_vm0, %v8697_v14 }
 0xcef   : > { %v4569_v31 = vpop.f32.mrb[64].mxu0  ;;  %v4657_v32 = vpop.f32.mrb[76].mxu1 }
 0xcf0   : > { %v4570_v33 = vadd.f32 %v6903_v11, %v4569_v31  ;;  %v4658_v34 = vadd.f32 %v6904_v30, %v4657_v32  ;;  %v8046_v35 = vpop.f32.mrb[65].mxu0  ;;  %v8066_v36 = vpop.f32.mrb[77].mxu1 }
 0xcf1   : > { %v4572_v37 = vpop.f32.mrb[66].mxu0  ;;  %v4660_v38 = vpop.f32.mrb[78].mxu1 }
 0xcf2   : > { %v5115_v39 = vpack.c.bf16 %v4570_v33, %v4570_v33  ;;  %v5116_v40 = vpack.c.bf16 %v4658_v34, %v4658_v34  ;;  %v8047_v42 = vpop.f32.mrb[67].mxu0  ;;  %v8067_v43 = vpop.f32.mrb[79].mxu1 }
 0xcf4   : > { %v5213_v47 = vsel %vm2684_vm1, %v5115_v39, 0  ;;  %v5259_v48 = vsel %vm2684_vm1, %v5116_v40, 0 }
 0xcf5   : > { %8161 = vmatpush3.bf16.xpose.msra.mxu0 %v5213_v47  ;;  %8167 = vmatpush3.bf16.xpose.msra.mxu1 %v5259_v48 }
 0xcf6   : > { %8172 = vmatprep.subr.bf16.mxu0 %v8697_v14  ;;  %8178 = vmatprep.subr.bf16.mxu1 %v8697_v14 }
 0xcfc   : > { %8163 = vmatmul.mubr.msk.bf16.vlgmr.msra.gmra.mrb[80].mxu0 %vm2684_vm1, %v5111_v51  ;;  %8169 = vmatmul.mubr.msk.bf16.vlgmr.msra.gmra.mrb[92].mxu1 %vm2684_vm1, %v5112_v52 }
 0xcfd   : > { %8174 = vmatprep.mubr.msk.bf16.mxu0 %vm8698_vm0, %v8697_v14  ;;  %8180 = vmatprep.mubr.msk.bf16.mxu1 %vm8698_vm0, %v8697_v14 }
 0xd0f   : > { %v4839_v56 = vpop.f32.mrb[68].mxu0  ;;  %v4927_v27 = vpop.f32.mrb[80].mxu1 }
 0xd10   : > { %v4840_v57 = vadd.f32 %v7005_v54, %v4839_v56  ;;  %v4928_v58 = vadd.f32 %v7006_v55, %v4927_v27  ;;  %v8086_v59 = vpop.f32.mrb[69].mxu0  ;;  %v8106_v60 = vpop.f32.mrb[81].mxu1 }
 0xd11   : > { %v4842_v61 = vpop.f32.mrb[70].mxu0  ;;  %v4930_v62 = vpop.f32.mrb[82].mxu1 }
 0xd12   : > { %v5357_v26 = vpack.c.bf16 %v4840_v57, %v4840_v57  ;;  %v5358_v63 = vpack.c.bf16 %v4928_v58, %v4928_v58  ;;  %v8087_v0 = vpop.f32.mrb[71].mxu0  ;;  %v8107_v1 = vpop.f32.mrb[83].mxu1 }
 0xd14   : > { %v5365_v2 = vsel %vm2933_vm2, %v5357_v26, 0  ;;  %v5411_v3 = vsel %vm2933_vm2, %v5358_v63, 0 }
 0xd15   : > { %8173 = vmatpush3.bf16.msra.mxu0 %v5365_v2  ;;  %8179 = vmatpush3.bf16.msra.mxu1 %v5411_v3 }
 0xd16   : > { %8184 = vmatprep.subr.bf16.mxu0 %v8697_v14  ;;  %8190 = vmatprep.subr.bf16.mxu1 %v8697_v14 }
 0xd2f   : > { %v10199_v4 = vpop.f32.mrb[72].mxu0  ;;  %v10201_v5 = vpop.f32.mrb[84].mxu1 }
 0xd30   : > { %v8126_v6 = vpop.f32.mrb[73].mxu0  ;;  %v8146_v7 = vpop.f32.mrb[85].mxu1 }
 0xd31   : > { %v5018_v8 = vpop.f32.mrb[74].mxu0  ;;  %v5106_v9 = vpop.f32.mrb[86].mxu1  ;;  %v7008_v6 = vld [vmem:[%s10497_s10 + $0x7] ss:$0 sm:$0xff]  ;;  %v7007_v7 = vld [vmem:[%s10497_s10 + $0x6] ss:$0 sm:$0xff] }
 0xd32   : > { %v8127_v15 = vpop.f32.mrb[75].mxu0  ;;  %v8147_v17 = vpop.f32.mrb[87].mxu1  ;;  %v5104_v8 = vadd.f32 %v7008_v6, %v10201_v5  ;;  %v5016_v9 = vadd.f32 %v7007_v7, %v10199_v4 }
 0xdaf   : > { %v5157_v18 = vpop.f32.mrb[76].mxu0  ;;  %v5203_v19 = vpop.f32.mrb[88].mxu1 }
 0xdb0   : > { %v5301_v20 = vmul.f32 0.17677669, %v5157_v18  ;;  %v5302_v22 = vmul.f32 0.17677669, %v5203_v19  ;;  %v8152_v23 = vpop.f32.mrb[77].mxu0  ;;  %v8158_v21 = vpop.f32.mrb[89].mxu1  ;;  %v5360_v18 = vpack.c.bf16 %v5104_v8, %v5104_v8 }
 0xdb1   : > { %v5160_v24 = vpop.f32.mrb[78].mxu0  ;;  %v5206_v12 = vpop.f32.mrb[90].mxu1 }
 0xdb2   : > { %v8153_v28 = vpop.f32.mrb[79].mxu0  ;;  %v8159_v29 = vpop.f32.mrb[91].mxu1  ;;  %v5306_v13 = vadd.f32 %v5302_v22, %v9504_v25  ;;  %v5305_v11 = vadd.f32 %v5301_v20, %v9504_v25  ;;  %v5359_v20 = vpack.c.bf16 %v5016_v9, %v5016_v9  ;;  %v5503_v24 = vsel %vm2933_vm2, %v5360_v18, 0 }
 0xdb4   : > { %v5312_v30 = vsel %vm2877_vm4, %v5306_v13, -inf  ;;  %v5309_v31 = vsel %vm2877_vm4, %v5305_v11, -inf  ;;  %v5457_v12 = vsel %vm2933_vm2, %v5359_v20, 0 }
 0xdb5   : > { %5313 = vmax.xlane.f32.xlu1 %v5312_v30  ;;  %5310 = vmax.xlane.f32.xlu0 %v5309_v31  ;;  %v8576_v30 = vld [vmem:[%s10498_s11 + $0x50] sm:$0xff]  }
 0xdcf   : > { %v5249_v32 = vpop.f32.mrb[80].mxu0  ;;  %v5295_v33 = vpop.f32.mrb[92].mxu1 }
 0xdd0   : > { %v5303_v34 = vmul.f32 0.17677669, %v5249_v32  ;;  %v5304_v35 = vmul.f32 0.17677669, %v5295_v33  ;;  %v8164_v36 = vpop.f32.mrb[81].mxu0  ;;  %v8170_v37 = vpop.f32.mrb[93].mxu1 }
 0xdd1   : > { %v5252_v38 = vpop.f32.mrb[82].mxu0  ;;  %v5298_v39 = vpop.f32.mrb[94].mxu1  ;;  %v8575_v32 = vld [vmem:[%s10498_s11 + $0x40] sm:$0xff]   ;;  %v8580_v37 = vld [vmem:[%s10498_s11 + $0x70] sm:$0xff]  }
 0xdd2   : > { %v8165_v40 = vpop.f32.mrb[83].mxu0  ;;  %v8171_v42 = vpop.f32.mrb[95].mxu1  ;;  %v5308_v43 = vadd.f32 %v5304_v35, %v9504_v25  ;;  %v5307_v45 = vadd.f32 %v5303_v34, %v9504_v25  ;;  %v8577_v34 = vld [vmem:[%s10498_s11 + $0x48] sm:$0xff]   ;;  %v8578_v35 = vld [vmem:[%s10498_s11 + $0x58] sm:$0xff]  }
 0xdd3   : > { %v8579_v42 = vld [vmem:[%s10498_s11 + $0x60] sm:$0xff]  }
 0xdd4   : > { %v5318_v46 = vsel %vm2877_vm4, %v5308_v43, -inf  ;;  %v5315_v47 = vsel %vm2877_vm4, %v5307_v45, -inf }
 0xdd5   : > { %5319 = vmax.xlane.f32.xlu1 %v5318_v46  ;;  %5316 = vmax.xlane.f32.xlu0 %v5315_v47 }
 0xe42   : > { %v5314_v48 = vpop.xlane.xlu1 %5313  ;;  %v5311_v49 = vpop.xlane.xlu0 %5310 }
 0xe43   : > { %v5322_v50 = vsub.f32 %v5306_v13, %v5314_v48  ;;  %v5321_v51 = vsub.f32 %v5305_v11, %v5311_v49 }
 0xe45   : > { %v5327_v52 = vmul.f32 1.442695, %v5322_v50  ;;  %v5325_v54 = vmul.f32 1.442695, %v5321_v51  ;;  %v8582_v50 = vld [vmem:[%s10498_s11 + $0x78] sm:$0xff]   ;;  %v8581_v51 = vld [vmem:[%s10498_s11 + $0x68] sm:$0xff]  }
 0xe47   : > { %8665 = vpow2.f32 %v5327_v52 }
 0xe48   : > { %8667 = vpow2.f32 %v5325_v54 }
 0xe51   : > { %v8666_v55 = vpop.eup %8665 }
 0xe52   : > { %v8668_v56 = vpop.eup %8667  ;;  %v5336_v27 = vsel %vm2877_vm4, %v8666_v55, 0.0 }
 0xe53   : > { %5337 = vadd.xlane.f32.xlu1 %v5336_v27  ;;  %v5333_v25 = vsel %vm2877_vm4, %v8668_v56, 0.0 }
 0xe54   : > { %5334 = vadd.xlane.f32.xlu0 %v5333_v25 }
 0xe62   : > { %v5320_v57 = vpop.xlane.xlu1 %5319  ;;  %v5317_v58 = vpop.xlane.xlu0 %5316 }
 0xe63   : > { %v5324_v59 = vsub.f32 %v5308_v43, %v5320_v57  ;;  %v5323_v60 = vsub.f32 %v5307_v45, %v5317_v58 }
 0xe65   : > { %v5331_v61 = vmul.f32 1.442695, %v5324_v59  ;;  %v5329_v62 = vmul.f32 1.442695, %v5323_v60 }
 0xe67   : > { %8669 = vpow2.f32 %v5331_v61 }
 0xe68   : > { %8671 = vpow2.f32 %v5329_v62 }
 0xe71   : > { %v8670_v26 = vpop.eup %8669 }
 0xe72   : > { %v8672_v63 = vpop.eup %8671  ;;  %v5342_v0 = vsel %vm2877_vm4, %v8670_v26, 0.0 }
 0xe73   : > { %5343 = vadd.xlane.f32.xlu1 %v5342_v0  ;;  %v5339_v1 = vsel %vm2877_vm4, %v8672_v63, 0.0 }
 0xe74   : > { %5340 = vadd.xlane.f32.xlu0 %v5339_v1 }
 0xee0   : > { %v5338_v2 = vpop.xlane.xlu1 %5337 }
 0xee1   : > { %8673 = vrcp.f32 %v5338_v2  ;;  %v5335_v3 = vpop.xlane.xlu0 %5334 }
 0xee2   : > { %8675 = vrcp.f32 %v5335_v3 }
 0xeeb   : > { %v8674_v15 = vpop.eup %8673 }
 0xeec   : > { %v8676_v17 = vpop.eup %8675  ;;  %v5350_v19 = vmul.f32 %v8674_v15, %v8666_v55 }
 0xeed   : > { %v5349_v22 = vmul.f32 %v8676_v17, %v8668_v56 }
 0xeee   : > { %v5354_v23 = vpack.c.bf16 %v5350_v19, %v5350_v19 }
 0xeef   : > { %v5353_v21 = vpack.c.bf16 %v5349_v22, %v5349_v22 }
 0xef0   : > { %8181 = vmatmul.mubr.msk.bf16.vlgmr.msra.gmra.mrb[96].mxu1 %vm2877_vm4, %v5354_v23 }
 0xef1   : > { %8175 = vmatmul.mubr.msk.bf16.vlgmr.msra.gmra.mrb[84].mxu0 %vm2877_vm4, %v5353_v21  ;;  %8191 = vmatpush3.bf16.msra.mxu1 %v5503_v24 }
 0xef2   : > { %8185 = vmatpush3.bf16.msra.mxu0 %v5457_v12  ;;  %8186 = vmatprep.mubr.msk.bf16.mxu0 %vm8698_vm0, %v8697_v14  ;;  %v8583_v12 = vld [vmem:[%s10502_s15 + $0x80] ss:$8 sps:$4 sm:$0xff]  }
 0xef3   : > { %8192 = vmatprep.mubr.msk.bf16.mxu1 %vm8698_vm0, %v8697_v14  ;;  %8196 = vmatprep.subr.bf16.mxu0 %v8697_v14 }
 0xef4   : > { %8204 = vmatprep.subr.bf16.mxu1 %v8697_v14 }
 0xf00   : > { %v5344_v4 = vpop.xlane.xlu1 %5343 }
 0xf01   : > { %8677 = vrcp.f32 %v5344_v4  ;;  %v5341_v5 = vpop.xlane.xlu0 %5340  ;;  %v8585_v4 = vld [vmem:[%s10502_s15 + $0x84] ss:$8 sps:$4 sm:$0xff]  }
 0xf02   : > { %8679 = vrcp.f32 %v5341_v5  ;;  %v8588_v5 = vld [vmem:[%s10502_s15 + $0x94] ss:$8 sps:$4 sm:$0xff]  }
 0xf0b   : > { %v8678_v28 = vpop.eup %8677 }
 0xf0c   : > { %v8680_v29 = vpop.eup %8679  ;;  %v5352_v13 = vmul.f32 %v8678_v28, %v8670_v26  ;;  %v8591_v28 = vld [vmem:[%s10502_s15 + $0xa4] ss:$8 sps:$4 sm:$0xff]  }
 0xf0d   : > { %v5351_v11 = vmul.f32 %v8680_v29, %v8672_v63  ;;  %v8589_v29 = vld [vmem:[%s10502_s15 + $0xa0] ss:$8 sps:$4 sm:$0xff]  }
 0xf0e   : > { %v5356_v31 = vpack.c.bf16 %v5352_v13, %v5352_v13 }
 0xf0f   : > { %v5355_v33 = vpack.c.bf16 %v5351_v11, %v5351_v11 }
 0xf10   : > { %8193 = vmatmul.mubr.msk.bf16.vlgmr.msra.gmra.mrb[100].mxu1 %vm2877_vm4, %v5356_v31 }
 0xf11   : > { %8187 = vmatmul.mubr.msk.bf16.vlgmr.msra.gmra.mrb[88].mxu0 %vm2877_vm4, %v5355_v33  ;;  %8205 = vmatpush3.bf16.msra.mxu1 %v8576_v30  ;;  %v8592_v33 = vld [vmem:[%s10502_s15 + $0xb0] ss:$8 sps:$4 sm:$0xff]  }
 0xf12   : > { %8197 = vmatpush3.bf16.msra.mxu0 %v8575_v32  ;;  %8206 = vmatprep.subr.bf16.mxu1 %v8697_v14  ;;  %v8594_v32 = vld [vmem:[%s10502_s15 + $0xb4] ss:$8 sps:$4 sm:$0xff]  }
 0xf13   : > { %8198 = vmatprep.subr.bf16.mxu0 %v8697_v14  ;;  %8200 = vmatprep.mubr.msk.bf16.mxu0 %vm8698_vm0, %v8697_v14 }
 0xf14   : > { %8208 = vmatprep.mubr.msk.bf16.mxu1 %vm8698_vm0, %v8697_v14 }
 0xf15   : > { %8207 = vmatpush3.bf16.msra.mxu1 %v8578_v35  ;;  %v8595_v35 = vld [vmem:[%s10502_s15 + $0xc0] ss:$8 sps:$4 sm:$0xff]  }
 0xf16   : > { %8199 = vmatpush3.bf16.msra.mxu0 %v8577_v34  ;;  %8220 = vmatprep.subr.bf16.mxu1 %v8697_v14  ;;  %v8597_v34 = vld [vmem:[%s10502_s15 + $0xc4] ss:$8 sps:$4 sm:$0xff]  }
 0xf17   : > { %8212 = vmatprep.subr.bf16.mxu0 %v8697_v14 }
 0xfc3   : > { %v5447_v36 = vpop.f32.mrb[96].mxu1 }
 0xfc4   : > { %v5401_v38 = vpop.f32.mrb[84].mxu0  ;;  %v5546_v39 = vpack.c.bf16 %v5447_v36, %v5447_v36  ;;  %v8182_v40 = vpop.f32.mrb[97].mxu1  ;;  %v8600_v36 = vld [vmem:[%s10502_s15 + $0xd4] ss:$8 sps:$4 sm:$0xff]  }
 0xfc5   : > { %v5545_v43 = vpack.c.bf16 %v5401_v38, %v5401_v38  ;;  %v8176_v45 = vpop.f32.mrb[85].mxu0  ;;  %v5450_v46 = vpop.f32.mrb[98].mxu1  ;;  %v8603_v38 = vld [vmem:[%s10502_s15 + $0xe4] ss:$8 sps:$4 sm:$0xff]   ;;  %v8606_v40 = vld [vmem:[%s10502_s15 + $0xf4] ss:$8 sps:$4 sm:$0xff]  }
 0xfc6   : > { %v5404_v47 = vpop.f32.mrb[86].mxu0  ;;  %v8183_v48 = vpop.f32.mrb[99].mxu1  ;;  %8209 = vmatmul.mubr.msk.bf16.vlgmr.msra.gmra.mrb[104].mxu1 %vm2684_vm1, %v5546_v39  ;;  %v8601_v39 = vld [vmem:[%s10502_s15 + $0xe0] ss:$8 sps:$4 sm:$0xff]  }
 0xfc7   : > { %v8177_v49 = vpop.f32.mrb[87].mxu0  ;;  %8201 = vmatmul.mubr.msk.bf16.vlgmr.msra.gmra.mrb[92].mxu0 %vm2684_vm1, %v5545_v43  ;;  %8221 = vmatpush3.bf16.msra.mxu1 %v8580_v37  ;;  %v8598_v37 = vld [vmem:[%s10502_s15 + $0xd0] ss:$8 sps:$4 sm:$0xff]   ;;  %v7081_v48 = vld [vmem:[%s10500_s13 + $0x1] ss:$0 sm:$0xff] }
 0xfc8   : > { %8213 = vmatpush3.bf16.msra.mxu0 %v8579_v42  ;;  %8222 = vmatprep.subr.bf16.mxu1 %v8697_v14  ;;  %v8604_v42 = vld [vmem:[%s10502_s15 + $0xf0] ss:$8 sps:$4 sm:$0xff]  }
 0xfc9   : > { %8214 = vmatprep.subr.bf16.mxu0 %v8697_v14  ;;  %8216 = vmatprep.mubr.msk.bf16.mxu0 %vm8698_vm0, %v8697_v14 }
 0xfca   : > { %8224 = vmatprep.mubr.msk.bf16.mxu1 %vm8698_vm0, %v8697_v14 }
 0xfcb   : > { %8223 = vmatpush3.bf16.msra.mxu1 %v8582_v50  ;;  %v7082_v50 = vld [vmem:[%s10501_s14 + $0x1] ss:$0 sm:$0xff] }
 0xfcc   : > { %8215 = vmatpush3.bf16.msra.mxu0 %v8581_v51 }
 0xfcd   : > { %5939 = vmatprep.subr.bf16.mxu0 %v8585_v4 }
 0xfe3   : > { %v5539_v52 = vpop.f32.mrb[100].mxu1 }
 0xfe4   : > { %v5493_v54 = vpop.f32.mrb[88].mxu0  ;;  %v5548_v55 = vpack.c.bf16 %v5539_v52, %v5539_v52  ;;  %v8194_v56 = vpop.f32.mrb[101].mxu1 }
 0xfe5   : > { %v5547_v27 = vpack.c.bf16 %v5493_v54, %v5493_v54  ;;  %v8188_v25 = vpop.f32.mrb[89].mxu0  ;;  %v5542_v57 = vpop.f32.mrb[102].mxu1  ;;  %v8608_v56 = vld [vmem:[%s10504_s17 + $0x80] sm:$0xff]  }
 0xfe6   : > { %v5496_v58 = vpop.f32.mrb[90].mxu0  ;;  %v8195_v59 = vpop.f32.mrb[103].mxu1  ;;  %8225 = vmatmul.mubr.msk.bf16.vlgmr.msra.gmra.mrb[108].mxu1 %vm2684_vm1, %v5548_v55  ;;  %v8607_v55 = vld [vmem:[%s10504_s17 + $0xc0] sm:$0xff]   ;;  %v8610_v25 = vld [vmem:[%s10504_s17 + $0x88] sm:$0xff]   ;;  %v8611_v57 = vld [vmem:[%s10504_s17 + $0xd0] sm:$0xff]  }
 0xfe7   : > { %v8189_v60 = vpop.f32.mrb[91].mxu0  ;;  %8217 = vmatmul.mubr.msk.bf16.vlgmr.msra.gmra.mrb[96].mxu0 %vm2684_vm1, %v5547_v27  ;;  %7548 = vmatprep.subr.bf16.mxu1 %v8607_v55  ;;  %v8609_v27 = vld [vmem:[%s10504_s17 + $0xc8] sm:$0xff]   ;;  %v8612_v58 = vld [vmem:[%s10504_s17 + $0x90] sm:$0xff]   ;;  %v8613_v59 = vld [vmem:[%s10504_s17 + $0xd8] sm:$0xff]  }
 0xfe8   : > { %5971 = vmatprep.mubr.bf16.mxu0 %v8700_v41  ;;  %v7078_v41 = vld [vmem:[%s10499_s12 + $0x1] ss:$0 sm:$0xff]  ;;  %5940 = vmatpush1.bf16.msra.mxu0 %v8583_v12  ;;  %v8614_v60 = vld [vmem:[%s10504_s17 + $0x98] sm:$0xff]   ;;  %v8629_v55 = vld [vmem:[%s10508_s21 + $0x30] sm:$0xff]  }
 0xfe9   : > { %5941 = vmatprep.subr.bf16.mxu0 %v8588_v5  ;;  %7549 = vmatpush3.bf16.msra.mxu1 %v8608_v56  ;;  %v8630_v56 = vld [vmem:[%s10508_s21 + $0x38] sm:$0xff]  }
 0xfea   : > { %7550 = vmatprep.subr.bf16.mxu1 %v8609_v27  ;;  %v8631_v27 = vld [vmem:[%s10510_s23] sm:$0xff]  }
 0xfed   : > { %7551 = vmatpush3.bf16.msra.mxu1 %v8610_v25  ;;  %v8632_v25 = vld [vmem:[%s10510_s23 + $0x8] sm:$0xff]  }
 0xfee   : > { %7552 = vmatprep.subr.bf16.mxu1 %v8611_v57  ;;  %v8633_v57 = vld [vmem:[%s10510_s23 + $0x10] sm:$0xff]  }
 0xff1   : > { %7553 = vmatpush3.bf16.msra.mxu1 %v8612_v58  ;;  %v8634_v58 = vld [vmem:[%s10510_s23 + $0x18] sm:$0xff]  }
 0xff2   : > { %7554 = vmatprep.subr.bf16.mxu1 %v8613_v59  ;;  %v8635_v59 = vld [vmem:[%s10510_s23 + $0x20] sm:$0xff]  }
 0xff5   : > { %7555 = vmatpush3.bf16.msra.mxu1 %v8614_v60  ;;  %v8636_v60 = vld [vmem:[%s10510_s23 + $0x28] sm:$0xff]  }
0x1099   : > { %v5670_v61 = vpop.f32.mrb[104].mxu1 }
0x109a   : > { %v5615_v62 = vpop.f32.mrb[92].mxu0  ;;  %v8210_v26 = vpop.f32.mrb[105].mxu1 }
0x109b   : > { %v5786_v63 = vadd.f32 %v5670_v61, %v5615_v62  ;;  %v8202_v0 = vpop.f32.mrb[93].mxu0  ;;  %v5673_v1 = vpop.f32.mrb[106].mxu1  ;;  %v8615_v61 = vld [vmem:[%s10504_s17 + $0xe0] sm:$0xff]   ;;  %v8617_v26 = vld [vmem:[%s10504_s17 + $0xe8] sm:$0xff]  }
0x109c   : > { %v5618_v2 = vpop.f32.mrb[94].mxu0  ;;  %v8211_v3 = vpop.f32.mrb[107].mxu1  ;;  %v8616_v62 = vld [vmem:[%s10504_s17 + $0xa0] sm:$0xff]   ;;  %7556 = vmatprep.subr.bf16.mxu1 %v8615_v61  ;;  %v8619_v0 = vld [vmem:[%s10504_s17 + $0xf0] sm:$0xff]  }
0x109d   : > { %v8203_v6 = vpop.f32.mrb[95].mxu0  ;;  %7557 = vmatpush3.bf16.msra.mxu1 %v8616_v62  ;;  %v8620_v1 = vld [vmem:[%s10504_s17 + $0xb0] sm:$0xff]   ;;  %v8621_v2 = vld [vmem:[%s10504_s17 + $0xf8] sm:$0xff]  }
0x109e   : > { %7558 = vmatprep.subr.bf16.mxu1 %v8617_v26  ;;  %v8622_v3 = vld [vmem:[%s10504_s17 + $0xb8] sm:$0xff]   ;;  %v7099_v6 = vld [vmem:[%s10503_s16 + $0x2] sm:$0x3] }
0x10b9   : > { %v5780_v7 = vpop.f32.mrb[108].mxu1 }
0x10ba   : > { %v5725_v8 = vpop.f32.mrb[96].mxu0  ;;  %v8226_v9 = vpop.f32.mrb[109].mxu1 }
0x10bb   : > { %v5787_v15 = vadd.f32 %v5786_v63, %v5725_v8  ;;  %v8218_v17 = vpop.f32.mrb[97].mxu0  ;;  %v5783_v18 = vpop.f32.mrb[110].mxu1  ;;  %v8618_v63 = vld [vmem:[%s10504_s17 + $0xa8] sm:$0xff]   ;;  %v5856_v8 = vrot.slane %v7099_v6, %v3419_v16 }
0x10bc   : > { %v5728_v19 = vpop.f32.mrb[98].mxu0  ;;  %v8227_v20 = vpop.f32.mrb[111].mxu1  ;;  %7559 = vmatpush3.bf16.msra.mxu1 %v8618_v63 }
0x10bd   : > { %v5788_v22 = vadd.f32 %v5787_v15, %v5780_v7  ;;  %v8219_v23 = vpop.f32.mrb[99].mxu0  ;;  %7560 = vmatprep.subr.bf16.mxu1 %v8619_v0  ;;  %v5852_v7 = vrot.slane %v7099_v6, %v3415_v10  ;;  %v7166_v0 = vld [vmem:[%s10506_s19] ss:$0 sm:$0xff] }
0x10bf   : > { %v5789_v21 = vadd.f32 %v5788_v22, %v9713_v53  ;;  %v8586_v53 = vld [vmem:[%s10502_s15 + $0x90] ss:$8 sps:$4 sm:$0xff]  }
0x10c0   : > { %5942 = vmatpush1.bf16.msra.mxu0 %v8586_v53  ;;  %7561 = vmatpush3.bf16.msra.mxu1 %v8620_v1 }
0x10c1   : > { %v10282_v24 = vadd.f32 %v7078_v41, %v5789_v21  ;;  %5943 = vmatprep.subr.bf16.mxu0 %v8591_v28  ;;  %7562 = vmatprep.subr.bf16.mxu1 %v8621_v2  ;;  %v7167_v2 = vld [vmem:[%s10507_s20] ss:$0 sm:$0xff] }
0x10c3   : > { %5803 = vadd.xlane.f32.xlu0 %v10282_v24 }
0x10c4   : > { %5944 = vmatpush1.bf16.msra.mxu0 %v8589_v29  ;;  %7563 = vmatpush3.bf16.msra.mxu1 %v8622_v3 }
0x10c5   : > { %5945 = vmatprep.subr.bf16.mxu0 %v8594_v32  ;;  %8248 = vmatprep.subr.bf16.mxu1 %v8697_v14 }
0x10c8   : > { %5946 = vmatpush1.bf16.msra.mxu0 %v8592_v33 }
0x10c9   : > { %5947 = vmatprep.subr.bf16.mxu0 %v8597_v34 }
0x10cc   : > { %5948 = vmatpush1.bf16.msra.mxu0 %v8595_v35 }
0x10cd   : > { %5949 = vmatprep.subr.bf16.mxu0 %v8600_v36 }
0x10d0   : > { %5950 = vmatpush1.bf16.msra.mxu0 %v8598_v37 }
0x10d1   : > { %5951 = vmatprep.subr.bf16.mxu0 %v8603_v38 }
0x10d4   : > { %5952 = vmatpush1.bf16.msra.mxu0 %v8601_v39 }
0x10d5   : > { %5953 = vmatprep.subr.bf16.mxu0 %v8606_v40  ;;  %v7165_v40 = vld [vmem:[%s10505_s18 + $0x1] ss:$0 sm:$0xff] }
0x10d8   : > { %5954 = vmatpush1.bf16.msra.mxu0 %v8604_v42 }
0x10d9   : > { %8228 = vmatprep.subr.bf16.mxu0 %v8697_v14 }
0x1150   : > { %v5804_v13 = vpop.xlane.xlu0 %5803 }
0x1151   : > { %v5805_v11 = vmul.f32 0.0078125, %v5804_v13 }
0x1153   : > { %v5806_v30 = vsub.f32 %v10282_v24, %v5805_v11 }
0x1155   : > { %v5807_v31 = vmul.f32 %v5806_v30, %v5806_v30 }
0x1157   : > { %5808 = vadd.xlane.f32.xlu1 %v5807_v31 }
0x11e4   : > { %v5809_v43 = vpop.xlane.xlu1 %5808 }
0x11e5   : > { %v5810_v45 = vmul.f32 0.0078125, %v5809_v43 }
0x11e7   : > { %v5811_v46 = vadd.f32 1e-06, %v5810_v45  ;;  %v8623_v45 = vld [vmem:[%s10508_s21] sm:$0xff]  }
0x11e9   : > { %8681 = vrsqrt.f32 %v5811_v46  ;;  %v8624_v46 = vld [vmem:[%s10508_s21 + $0x8] sm:$0xff]  }
0x11f3   : > { %v8682_v47 = vpop.eup %8681 }
0x11f4   : > { %v5813_v49 = vmul.f32 %v8682_v47, %v5806_v30 }
0x11f6   : > { %v5820_v51 = vmul.f32 %v7081_v48, %v5813_v49 }
0x11f8   : > { %v5827_v52 = vadd.f32 %v7082_v50, %v5820_v51  ;;  %v8625_v50 = vld [vmem:[%s10508_s21 + $0x10] sm:$0xff]   ;;  %v8626_v51 = vld [vmem:[%s10508_s21 + $0x18] sm:$0xff]  }
0x11fa   : > { %v5845_v54 = vpack.c.bf16 %v5827_v52, %v5827_v52  ;;  %v8627_v52 = vld [vmem:[%s10508_s21 + $0x20] sm:$0xff]  }
0x11fc   : > { %5972 = vmatmul.mubr.bf16.vlgmr.msra.gmra.mrb[100].mxu0 %v5845_v54  ;;  %v8628_v54 = vld [vmem:[%s10508_s21 + $0x28] sm:$0xff]  }
0x11fd   : > { %8244 = vmatprep.mubr.msk.bf16.mxu0 %vm8698_vm0, %v8697_v14  ;;  %8229 = vmatpush3.bf16.msra.mxu0 %v8623_v45 }
0x11fe   : > { %8230 = vmatprep.subr.bf16.mxu0 %v8697_v14 }
0x1201   : > { %8231 = vmatpush3.bf16.msra.mxu0 %v8624_v46 }
0x1202   : > { %8232 = vmatprep.subr.bf16.mxu0 %v8697_v14 }
0x1205   : > { %8233 = vmatpush3.bf16.msra.mxu0 %v8625_v50 }
0x1206   : > { %8234 = vmatprep.subr.bf16.mxu0 %v8697_v14 }
0x1209   : > { %8235 = vmatpush3.bf16.msra.mxu0 %v8626_v51 }
0x120a   : > { %8236 = vmatprep.subr.bf16.mxu0 %v8697_v14 }
0x120d   : > { %8237 = vmatpush3.bf16.msra.mxu0 %v8627_v52 }
0x120e   : > { %8238 = vmatprep.subr.bf16.mxu0 %v8697_v14 }
0x1211   : > { %8239 = vmatpush3.bf16.msra.mxu0 %v8628_v54 }
0x1212   : > { %8240 = vmatprep.subr.bf16.mxu0 %v8697_v14 }
0x1215   : > { %8241 = vmatpush3.bf16.msra.mxu0 %v8629_v55 }
0x1216   : > { %8242 = vmatprep.subr.bf16.mxu0 %v8697_v14 }
0x1219   : > { %8243 = vmatpush3.bf16.msra.mxu0 %v8630_v56 }
0x12cf   : > { %v5973_v9 = vpop.f32.mrb[100].mxu0 }
0x12d0   : > { %v5974_v15 = vadd.f32 %v5973_v9, %v5852_v7  ;;  %v5975_v17 = vpop.f32.mrb[101].mxu0  ;;  %v8638_v9 = vld [vmem:[%s10510_s23 + $0x38] sm:$0xff]  }
0x12d1   : > { %v5976_v18 = vadd.f32 %v5975_v17, %v5856_v8  ;;  %v5977_v19 = vpop.f32.mrb[102].mxu0  ;;  %v8637_v8 = vld [vmem:[%s10510_s23 + $0x30] sm:$0xff]  }
0x12d2   : > { %v5980_v20 = vmul.f32 %v5974_v15, %v5974_v15  ;;  %v5978_v22 = vpop.f32.mrb[103].mxu0 }
0x12d3   : > { %v5981_v23 = vmul.f32 %v5976_v18, %v5976_v18 }
0x12d4   : > { %v5982_v41 = vmul.f32 %v5980_v20, %v5974_v15 }
0x12d5   : > { %v5983_v21 = vmul.f32 %v5981_v23, %v5976_v18 }
0x12d6   : > { %v5984_v12 = vmul.f32 0.044715, %v5982_v41 }
0x12d7   : > { %v5985_v4 = vmul.f32 0.044715, %v5983_v21 }
0x12d8   : > { %v5986_v5 = vadd.f32 %v5984_v12, %v5974_v15 }
0x12d9   : > { %v5987_v53 = vadd.f32 %v5985_v4, %v5976_v18 }
0x12da   : > { %v5988_v28 = vmul.f32 0.7978846, %v5986_v5 }
0x12db   : > { %v5989_v29 = vmul.f32 0.7978846, %v5987_v53 }
0x12dc   : > { %8683 = vtanh.f32 %v5988_v28 }
0x12dd   : > { %8685 = vtanh.f32 %v5989_v29 }
0x12e6   : > { %v8684_v44 = vpop.eup %8683 }
0x12e7   : > { %v8686_v10 = vpop.eup %8685  ;;  %v5992_v16 = vadd.f32 1.0, %v8684_v44 }
0x12e8   : > { %v5993_v13 = vadd.f32 1.0, %v8686_v10 }
0x12e9   : > { %v5994_v11 = vmul.f32 0.5, %v5992_v16 }
0x12ea   : > { %v5995_v30 = vmul.f32 0.5, %v5993_v13 }
0x12eb   : > { %v5996_v31 = vmul.f32 %v5994_v11, %v5974_v15  ;;  %v7168_v15 = vld [vmem:[%s10549_s7] ss:$0 sm:$0xff] }
0x12ec   : > { %v5997_v32 = vmul.f32 %v5995_v30, %v5976_v18 }
0x12ed   : > { %v6031_v34 = vpack.c.bf16 %v5996_v31, %v5996_v31 }
0x12ee   : > { %v6032_v33 = vpack.c.bf16 %v5997_v32, %v5997_v32 }
0x12f0   : > { %6161 = vmatprep.mubr.bf16.mxu1 %v6032_v33 }
0x12f1   : > { %6162 = vmatmul.mubr.bf16.vlgmr.msra.gmra.mrb[112].mxu1 %v6031_v34 }
0x12f2   : > { %8264 = vmatprep.mubr.msk.bf16.mxu1 %vm8698_vm0, %v8697_v14  ;;  %8249 = vmatpush3.bf16.msra.mxu1 %v8631_v27 }
0x12f3   : > { %8250 = vmatprep.subr.bf16.mxu1 %v8697_v14 }
0x12f6   : > { %8251 = vmatpush3.bf16.msra.mxu1 %v8632_v25 }
0x12f7   : > { %8252 = vmatprep.subr.bf16.mxu1 %v8697_v14 }
0x12fa   : > { %8253 = vmatpush3.bf16.msra.mxu1 %v8633_v57 }
0x12fb   : > { %8254 = vmatprep.subr.bf16.mxu1 %v8697_v14 }
0x12fe   : > { %8255 = vmatpush3.bf16.msra.mxu1 %v8634_v58 }
0x12ff   : > { %8256 = vmatprep.subr.bf16.mxu1 %v8697_v14 }
0x1302   : > { %8257 = vmatpush3.bf16.msra.mxu1 %v8635_v59 }
0x1303   : > { %8258 = vmatprep.subr.bf16.mxu1 %v8697_v14 }
0x1306   : > { %8259 = vmatpush3.bf16.msra.mxu1 %v8636_v60 }
0x1307   : > { %8260 = vmatprep.subr.bf16.mxu1 %v8697_v14 }
0x130a   : > { %8261 = vmatpush3.bf16.msra.mxu1 %v8637_v8 }
0x130b   : > { %8262 = vmatprep.subr.bf16.mxu1 %v8697_v14  ;;  %v7177_v14 = vld [vmem:[%s10550_s29] ss:$0 sm:$0xff] }
0x130e   : > { %8263 = vmatpush3.bf16.msra.mxu1 %v8638_v9 }
0x13c4   : > { %v7564_v35 = vpop.f32.mrb[112].mxu1 }
0x13c5   : > { %v7565_v36 = vpop.f32.mrb[113].mxu1 }
0x13c6   : > { %v7566_v37 = vadd.f32 %v7565_v36, %v7564_v35  ;;  %v7567_v38 = vpop.f32.mrb[114].mxu1 }
0x13c7   : > { %v7568_v39 = vpop.f32.mrb[115].mxu1 }
0x13c8   : > { %v6169_v42 = vadd.f32 %v7566_v37, %v10282_v24 }
0x13ca   : > { %v6178_v43 = vadd.f32 %v7165_v40, %v6169_v42 }
0x13cc   : > { %6181 = vadd.xlane.f32.xlu0 %v6178_v43 }
0x1459   : > { %v6182_v47 = vpop.xlane.xlu0 %6181 }
0x145a   : > { %v6183_v48 = vmul.f32 0.0078125, %v6182_v47 }
0x145c   : > { %v6184_v49 = vsub.f32 %v6178_v43, %v6183_v48 }
0x145e   : > { %v6185_v24 = vmul.f32 %v6184_v49, %v6184_v49 }
0x1460   : > { %6186 = vadd.xlane.f32.xlu1 %v6185_v24 }
0x14ed   : > { %v6187_v61 = vpop.xlane.xlu1 %6186 }
0x14ee   : > { %v6188_v62 = vmul.f32 0.0078125, %v6187_v61 }
0x14f0   : > { %v6189_v26 = vadd.f32 1e-06, %v6188_v62 }
0x14f2   : > { %8687 = vrsqrt.f32 %v6189_v26 }
0x14fc   : > { %v8688_v63 = vpop.eup %8687 }
0x14fd   : > { %v6191_v1 = vmul.f32 %v8688_v63, %v6184_v49 }
0x14ff   : > { %v6198_v3 = vmul.f32 %v7166_v0, %v6191_v1 }
0x1501   : > { %v6205_v6 = vadd.f32 %v7167_v2, %v6198_v3 }
0x1503   : > { %v6222_v7 = vpack.c.bf16 %v6205_v6, %v6205_v6 }
0x1505   : > { %8245 = vmatmul.mubr.bf16.vlgmr.msra.gmra.mrb[104].mxu0 %v6222_v7 }
0x15d8   : > { %v6312_v17 = vpop.f32.mrb[104].mxu0 }
0x15d9   : > { %v6313_v18 = vadd.f32 %v7168_v15, %v6312_v17  ;;  %v8246_v19 = vpop.f32.mrb[105].mxu0 }
0x15da   : > { %v6315_v20 = vpop.f32.mrb[106].mxu0 }
0x15db   : > { %v6318_v22 = vmax.f32 %v6313_v18, 0.0  ;;  %v8247_v23 = vpop.f32.mrb[107].mxu0 }
0x15dd   : > { %v6335_v41 = vpack.c.bf16 %v6318_v22, %v6318_v22 }
0x15df   : > { %8265 = vmatmul.mubr.bf16.vlgmr.msra.gmra.mrb[116].mxu1 %v6335_v41 }
0x16b2   : > { %v6425_v21 = vpop.f32.mrb[116].mxu1 }
0x16b3   : > { %v6426_v12 = vadd.f32 %v7177_v14, %v6425_v21  ;;  %v8266_v4 = vpop.f32.mrb[117].mxu1 }
0x16b4   : > { %v6428_v5 = vpop.f32.mrb[118].mxu1 }
0x16b5   : > { %6431 = vst [vmem:[%s779_s0] sm:$0xff] %v6426_v12  ;;  %v8267_v53 = vpop.f32.mrb[119].mxu1 }
0x16b6 PF: > { %s10553_s26 = sld [smem:[#allocation2_spill]] }
0x16bc   : > { %s35_s29 = sadd.s32 1, %s10553_s26  }
0x16bd   : > { %p32_p4 = scmp.ge.s32.totalorder %s35_s29, 4  }
0x16bf   :  { %34 = sbr.rel (!%p32_p4) target bundleno = 14 (0xe), region = 169 }

</bundles_post_ra>
